<compile_context>
chip_gen: v7x
topology: tpu7x:2x2x1
jax: 0.10.0
libtpu: 0.0.40
codegen_flags: <defaults>
</compile_context>

<pallas_src>
import jax
import jax.numpy as jnp
from jax.experimental import pallas as pl
from jax.experimental.pallas import tpu as pltpu

IN_FEATURES = 28 * 28          # 784, fixed by the module
K_PAD = 896                    # 7 * 128: lane-aligned contraction dim, layer 1
HID1, HID2, HID3 = 256, 512, 256
OUT_FEATURES = 10
N_PAD = 128                    # lane-dense padded output width


def _round_up(x, m):
    return ((x + m - 1) // m) * m


def _silu_f32(x):
    # SiLU in f32: sigmoid's exp goes to the EUP, mul on the VPU.
    return x * jax.nn.sigmoid(x)


def mlp_kernel(x_ref, w1_ref, b1_ref, w2_ref, b2_ref, w3_ref, b3_ref,
               w4_ref, b4_ref, o_ref):
    # x / weights are bf16 (MXU fast path); accumulate in f32, bias+SiLU in f32.
    h = jnp.dot(x_ref[...], w1_ref[...],
                preferred_element_type=jnp.float32) + b1_ref[...]
    h = _silu_f32(h)

    h = jnp.dot(h.astype(jnp.bfloat16), w2_ref[...],
                preferred_element_type=jnp.float32) + b2_ref[...]
    h = _silu_f32(h)

    h = jnp.dot(h.astype(jnp.bfloat16), w3_ref[...],
                preferred_element_type=jnp.float32) + b3_ref[...]
    h = _silu_f32(h)

    out = jnp.dot(h.astype(jnp.bfloat16), w4_ref[...],
                  preferred_element_type=jnp.float32) + b4_ref[...]
    o_ref[...] = out.astype(o_ref.dtype)


def prepare_params(params):
    """Pad + cast f32 (in, out) weights / (1, out) biases to kernel layout."""
    (w1, b1), (w2, b2), (w3, b3), (w4, b4) = params
    # Zero-pad the contraction dim of layer 1: (784, 256) -> (896, 256).
    w1p = jnp.zeros((K_PAD, HID1), jnp.float32).at[:IN_FEATURES, :].set(w1)
    # Zero-pad the output features of layer 4: (256, 10) -> (256, 128).
    w4p = jnp.zeros((HID3, N_PAD), jnp.float32).at[:, :OUT_FEATURES].set(w4)
    b4p = jnp.zeros((1, N_PAD), jnp.float32).at[:, :OUT_FEATURES].set(
        b4.reshape(1, -1))
    bf16 = jnp.bfloat16
    return (w1p.astype(bf16), b1.reshape(1, -1).astype(jnp.float32),
            w2.astype(bf16),  b2.reshape(1, -1).astype(jnp.float32),
            w3.astype(bf16),  b3.reshape(1, -1).astype(jnp.float32),
            w4p.astype(bf16), b4p)


def fc_model_forward(x, params, *, tile_b=256):
    """x: (B, 1, 28, 28) float32 (NCHW). Returns (B, 10) float32."""
    B = x.shape[0]
    x2d = x.reshape(B, -1).astype(jnp.float32)       # nn.Flatten(): (B, 784)
    assert x2d.shape[1] == IN_FEATURES

    # Pad batch to a multiple of the tile (zero rows are sliced away at the end)
    # and the feature dim to 896; cast activations to bf16 for the MXU / DMA.
    B_pad = _round_up(max(B, 1), tile_b)
    x_pad = jnp.zeros((B_pad, K_PAD), jnp.bfloat16)
    x_pad = x_pad.at[:B, :IN_FEATURES].set(x2d.astype(jnp.bfloat16))

    w1, b1, w2, b2, w3, b3, w4, b4 = prepare_params(params)

    grid = (B_pad // tile_b,)
    const = lambda i: (0, 0)          # weights/biases resident across the grid
    in_specs = [
        pl.BlockSpec((tile_b, K_PAD), lambda i: (i, 0)),   # x  (pipelined)
        pl.BlockSpec((K_PAD, HID1), const),                # w1
        pl.BlockSpec((1, HID1), const),                    # b1
        pl.BlockSpec((HID1, HID2), const),                 # w2
        pl.BlockSpec((1, HID2), const),                    # b2
        pl.BlockSpec((HID2, HID3), const),                 # w3
        pl.BlockSpec((1, HID3), const),                    # b3
        pl.BlockSpec((HID3, N_PAD), const),                # w4 (padded cols)
        pl.BlockSpec((1, N_PAD), const),                   # b4 (padded cols)
    ]
    out_specs = pl.BlockSpec((tile_b, N_PAD), lambda i: (i, 0))

    flops = 2 * B_pad * (K_PAD * HID1 + HID1 * HID2 + HID2 * HID3 + HID3 * N_PAD)
    transcendentals = B_pad * (HID1 + HID2 + HID3)
    bytes_accessed = (
        x_pad.size * 2
        + (w1.size + w2.size + w3.size + w4.size) * 2
        + (b1.size + b2.size + b3.size + b4.size) * 4
        + B_pad * N_PAD * 4)

    out = pl.pallas_call(
        mlp_kernel,
        out_shape=jax.ShapeDtypeStruct((B_pad, N_PAD), jnp.float32),
        grid=grid,
        in_specs=in_specs,
        out_specs=out_specs,
        compiler_params=pltpu.CompilerParams(
            dimension_semantics=("parallel",)),
        cost_estimate=pl.CostEstimate(
            flops=flops,
            transcendentals=transcendentals,
            bytes_accessed=bytes_accessed),
    )(x_pad, w1, b1, w2, b2, w3, b3, w4, b4)

    return out[:B, :OUT_FEATURES]


def init_params(key):
    """PyTorch nn.Linear-style init (U(-k, k), k = 1/sqrt(fan_in)).
    Weights are stored transposed as (in_features, out_features)."""
    dims = [(IN_FEATURES, HID1), (HID1, HID2), (HID2, HID3), (HID3, OUT_FEATURES)]
    params = []
    for (fan_in, fan_out) in dims:
        key, kw, kb = jax.random.split(key, 3)
        bound = 1.0 / jnp.sqrt(fan_in)
        w = jax.random.uniform(kw, (fan_in, fan_out), jnp.float32, -bound, bound)
        b = jax.random.uniform(kb, (1, fan_out), jnp.float32, -bound, bound)
        params.append((w, b))
    return params


def reference_forward(x, params):
    """Pure-JAX reference mirroring the kernel's numerics (bf16 matmul inputs,
    f32 accumulation, f32 bias + SiLU)."""
    B = x.shape[0]
    h = x.reshape(B, -1).astype(jnp.float32)
    n = len(params)
    for i, (w, b) in enumerate(params):
        h = jnp.dot(h.astype(jnp.bfloat16), w.astype(jnp.bfloat16),
                    preferred_element_type=jnp.float32) + b.reshape(1, -1)
        if i < n - 1:
            h = h * jax.nn.sigmoid(h)
    return h


if __name__ == "__main__":
    key = jax.random.PRNGKey(0)
    kx, kp = jax.random.split(key)

    # MNIST-like batch: (B=2, C=1, H=28, W=28); 28*28 = 784 is fixed by the module.
    x = jax.random.normal(kx, (2, 1, 28, 28), jnp.float32)
    params = init_params(kp)

    out = fc_model_forward(x, params)
    out = jax.block_until_ready(out)

    ref = reference_forward(x, params)
    assert out.shape == (2, 10)
    max_err = float(jnp.max(jnp.abs(out - ref)))
    assert jnp.allclose(out, ref, atol=5e-3, rtol=5e-3), \
        f"mismatch vs reference (max abs err {max_err})"

    print("KERNEL_OK")
</pallas_src>

<mosaic_0001>
module attributes {stable_mosaic.version = 11 : i64} {
  func.func @mlp_kernel(%arg0: i32, %arg1: memref<256x896xbf16, #tpu.memory_space<vmem>>, %arg2: memref<896x256xbf16, #tpu.memory_space<vmem>>, %arg3: memref<1x256xf32, #tpu.memory_space<vmem>>, %arg4: memref<256x512xbf16, #tpu.memory_space<vmem>>, %arg5: memref<1x512xf32, #tpu.memory_space<vmem>>, %arg6: memref<512x256xbf16, #tpu.memory_space<vmem>>, %arg7: memref<1x256xf32, #tpu.memory_space<vmem>>, %arg8: memref<256x128xbf16, #tpu.memory_space<vmem>>, %arg9: memref<1x128xf32, #tpu.memory_space<vmem>>, %arg10: memref<256x128xf32, #tpu.memory_space<vmem>>) attributes {dimension_semantics = [#tpu.dimension_semantics<parallel>], iteration_bounds = array<i64: 1>, scalar_prefetch = 0 : i64, scratch_operands = 0 : i64, tpu.core_type = #tpu.core_type<tc>, window_params = [{transform_indices = @transform_0, window_bounds = array<i64: 256, 896>}, {pipeline_mode = #tpu.pipeline_mode<synchronous>, transform_indices = @transform_1, window_bounds = array<i64: 896, 256>}, {pipeline_mode = #tpu.pipeline_mode<synchronous>, transform_indices = @transform_2, window_bounds = array<i64: 1, 256>}, {pipeline_mode = #tpu.pipeline_mode<synchronous>, transform_indices = @transform_3, window_bounds = array<i64: 256, 512>}, {pipeline_mode = #tpu.pipeline_mode<synchronous>, transform_indices = @transform_4, window_bounds = array<i64: 1, 512>}, {pipeline_mode = #tpu.pipeline_mode<synchronous>, transform_indices = @transform_5, window_bounds = array<i64: 512, 256>}, {pipeline_mode = #tpu.pipeline_mode<synchronous>, transform_indices = @transform_6, window_bounds = array<i64: 1, 256>}, {pipeline_mode = #tpu.pipeline_mode<synchronous>, transform_indices = @transform_7, window_bounds = array<i64: 256, 128>}, {pipeline_mode = #tpu.pipeline_mode<synchronous>, transform_indices = @transform_8, window_bounds = array<i64: 1, 128>}, {transform_indices = @transform_9, window_bounds = array<i64: 256, 128>}]} {
    %c0 = arith.constant 0 : index
    %c0_0 = arith.constant 0 : index
    %0 = vector.load %arg1[%c0, %c0_0] : memref<256x896xbf16, #tpu.memory_space<vmem>>, vector<256x896xbf16>
    %c0_1 = arith.constant 0 : index
    %c0_2 = arith.constant 0 : index
    %1 = vector.load %arg2[%c0_1, %c0_2] : memref<896x256xbf16, #tpu.memory_space<vmem>>, vector<896x256xbf16>
    %cst = arith.constant dense<0.000000e+00> : vector<256x256xf32>
    %2 = tpu.matmul %0, %1, %cst {dimension_numbers = #tpu.dot_dimension_numbers<[1], [0], [0], [1], [0, 0, 1, 1], [], []>} : vector<256x896xbf16>, vector<896x256xbf16>, vector<256x256xf32> -> vector<256x256xf32>
    %c0_3 = arith.constant 0 : index
    %c0_4 = arith.constant 0 : index
    %3 = vector.load %arg3[%c0_3, %c0_4] : memref<1x256xf32, #tpu.memory_space<vmem>>, vector<1x256xf32>
    %4 = vector.broadcast %3 : vector<1x256xf32> to vector<256x256xf32>
    %5 = arith.addf %2, %4 : vector<256x256xf32>
    %6 = arith.negf %5 : vector<256x256xf32>
    %7 = math.exp %6 : vector<256x256xf32>
    %cst_5 = arith.constant 1.000000e+00 : f32
    %8 = vector.broadcast %cst_5 : f32 to vector<256x256xf32>
    %9 = arith.addf %8, %7 : vector<256x256xf32>
    %10 = arith.divf %8, %9 : vector<256x256xf32>
    %11 = arith.mulf %5, %10 : vector<256x256xf32>
    %12 = arith.truncf %11 : vector<256x256xf32> to vector<256x256xbf16>
    %c0_6 = arith.constant 0 : index
    %c0_7 = arith.constant 0 : index
    %13 = vector.load %arg4[%c0_6, %c0_7] : memref<256x512xbf16, #tpu.memory_space<vmem>>, vector<256x512xbf16>
    %cst_8 = arith.constant dense<0.000000e+00> : vector<256x512xf32>
    %14 = tpu.matmul %12, %13, %cst_8 {dimension_numbers = #tpu.dot_dimension_numbers<[1], [0], [0], [1], [0, 0, 1, 1], [], []>} : vector<256x256xbf16>, vector<256x512xbf16>, vector<256x512xf32> -> vector<256x512xf32>
    %c0_9 = arith.constant 0 : index
    %c0_10 = arith.constant 0 : index
    %15 = vector.load %arg5[%c0_9, %c0_10] : memref<1x512xf32, #tpu.memory_space<vmem>>, vector<1x512xf32>
    %16 = vector.broadcast %15 : vector<1x512xf32> to vector<256x512xf32>
    %17 = arith.addf %14, %16 : vector<256x512xf32>
    %18 = arith.negf %17 : vector<256x512xf32>
    %19 = math.exp %18 : vector<256x512xf32>
    %cst_11 = arith.constant 1.000000e+00 : f32
    %20 = vector.broadcast %cst_11 : f32 to vector<256x512xf32>
    %21 = arith.addf %20, %19 : vector<256x512xf32>
    %22 = arith.divf %20, %21 : vector<256x512xf32>
    %23 = arith.mulf %17, %22 : vector<256x512xf32>
    %24 = arith.truncf %23 : vector<256x512xf32> to vector<256x512xbf16>
    %c0_12 = arith.constant 0 : index
    %c0_13 = arith.constant 0 : index
    %25 = vector.load %arg6[%c0_12, %c0_13] : memref<512x256xbf16, #tpu.memory_space<vmem>>, vector<512x256xbf16>
    %cst_14 = arith.constant dense<0.000000e+00> : vector<256x256xf32>
    %26 = tpu.matmul %24, %25, %cst_14 {dimension_numbers = #tpu.dot_dimension_numbers<[1], [0], [0], [1], [0, 0, 1, 1], [], []>} : vector<256x512xbf16>, vector<512x256xbf16>, vector<256x256xf32> -> vector<256x256xf32>
    %c0_15 = arith.constant 0 : index
    %c0_16 = arith.constant 0 : index
    %27 = vector.load %arg7[%c0_15, %c0_16] : memref<1x256xf32, #tpu.memory_space<vmem>>, vector<1x256xf32>
    %28 = vector.broadcast %27 : vector<1x256xf32> to vector<256x256xf32>
    %29 = arith.addf %26, %28 : vector<256x256xf32>
    %30 = arith.negf %29 : vector<256x256xf32>
    %31 = math.exp %30 : vector<256x256xf32>
    %cst_17 = arith.constant 1.000000e+00 : f32
    %32 = vector.broadcast %cst_17 : f32 to vector<256x256xf32>
    %33 = arith.addf %32, %31 : vector<256x256xf32>
    %34 = arith.divf %32, %33 : vector<256x256xf32>
    %35 = arith.mulf %29, %34 : vector<256x256xf32>
    %36 = arith.truncf %35 : vector<256x256xf32> to vector<256x256xbf16>
    %c0_18 = arith.constant 0 : index
    %c0_19 = arith.constant 0 : index
    %37 = vector.load %arg8[%c0_18, %c0_19] : memref<256x128xbf16, #tpu.memory_space<vmem>>, vector<256x128xbf16>
    %cst_20 = arith.constant dense<0.000000e+00> : vector<256x128xf32>
    %38 = tpu.matmul %36, %37, %cst_20 {dimension_numbers = #tpu.dot_dimension_numbers<[1], [0], [0], [1], [0, 0, 1, 1], [], []>} : vector<256x256xbf16>, vector<256x128xbf16>, vector<256x128xf32> -> vector<256x128xf32>
    %c0_21 = arith.constant 0 : index
    %c0_22 = arith.constant 0 : index
    %39 = vector.load %arg9[%c0_21, %c0_22] : memref<1x128xf32, #tpu.memory_space<vmem>>, vector<1x128xf32>
    %40 = vector.broadcast %39 : vector<1x128xf32> to vector<256x128xf32>
    %41 = arith.addf %38, %40 : vector<256x128xf32>
    %c0_23 = arith.constant 0 : index
    %c0_24 = arith.constant 0 : index
    %42 = vector.load %arg10[%c0_23, %c0_24] : memref<256x128xf32, #tpu.memory_space<vmem>>, vector<256x128xf32>
    tpu.vector_store %arg10[%c0_23, %c0_24], %41 {strides = array<i32>} : memref<256x128xf32, #tpu.memory_space<vmem>>, vector<256x128xf32>,
    return
  }
  func.func @transform_0(%arg0: i32) -> (i32, i32) {
    %c0_i32 = arith.constant 0 : i32
    %c0_i32_0 = arith.constant 0 : i32
    return %arg0, %c0_i32 : i32, i32
  }
  func.func @transform_1(%arg0: i32) -> (i32, i32) {
    %c0_i32 = arith.constant 0 : i32
    %c0_i32_0 = arith.constant 0 : i32
    %c0_i32_1 = arith.constant 0 : i32
    return %c0_i32, %c0_i32_0 : i32, i32
  }
  func.func @transform_2(%arg0: i32) -> (i32, i32) {
    %c0_i32 = arith.constant 0 : i32
    %c0_i32_0 = arith.constant 0 : i32
    %c0_i32_1 = arith.constant 0 : i32
    return %c0_i32, %c0_i32_0 : i32, i32
  }
  func.func @transform_3(%arg0: i32) -> (i32, i32) {
    %c0_i32 = arith.constant 0 : i32
    %c0_i32_0 = arith.constant 0 : i32
    %c0_i32_1 = arith.constant 0 : i32
    return %c0_i32, %c0_i32_0 : i32, i32
  }
  func.func @transform_4(%arg0: i32) -> (i32, i32) {
    %c0_i32 = arith.constant 0 : i32
    %c0_i32_0 = arith.constant 0 : i32
    %c0_i32_1 = arith.constant 0 : i32
    return %c0_i32, %c0_i32_0 : i32, i32
  }
  func.func @transform_5(%arg0: i32) -> (i32, i32) {
    %c0_i32 = arith.constant 0 : i32
    %c0_i32_0 = arith.constant 0 : i32
    %c0_i32_1 = arith.constant 0 : i32
    return %c0_i32, %c0_i32_0 : i32, i32
  }
  func.func @transform_6(%arg0: i32) -> (i32, i32) {
    %c0_i32 = arith.constant 0 : i32
    %c0_i32_0 = arith.constant 0 : i32
    %c0_i32_1 = arith.constant 0 : i32
    return %c0_i32, %c0_i32_0 : i32, i32
  }
  func.func @transform_7(%arg0: i32) -> (i32, i32) {
    %c0_i32 = arith.constant 0 : i32
    %c0_i32_0 = arith.constant 0 : i32
    %c0_i32_1 = arith.constant 0 : i32
    return %c0_i32, %c0_i32_0 : i32, i32
  }
  func.func @transform_8(%arg0: i32) -> (i32, i32) {
    %c0_i32 = arith.constant 0 : i32
    %c0_i32_0 = arith.constant 0 : i32
    %c0_i32_1 = arith.constant 0 : i32
    return %c0_i32, %c0_i32_0 : i32, i32
  }
  func.func @transform_9(%arg0: i32) -> (i32, i32) {
    %c0_i32 = arith.constant 0 : i32
    %c0_i32_0 = arith.constant 0 : i32
    return %arg0, %c0_i32 : i32, i32
  }
}

</mosaic_0001>

<bundles_post_ra>
// kernel: tpu_custom_call.1
= control target key start
LH: loop header
LB: loop body
LE: loop exit
PB: predicated region body
PF: predicated region fallthrough
CT: control target
= control target key end

     0   :  { %14 = vsyncpa [#allocation3], 0  ;;  %s10866_s0 = inlined_call_operand.hbm [shape: bf16[256,896], index: 0, kind: input, shape index: {}]   ;;  %s10867_s1 = inlined_call_operand.hbm [shape: bf16[896,256], index: 1, kind: input, shape index: {}]   ;;  %s10868_s2 = inlined_call_operand.vmem [shape: f32[1,256], index: 2, kind: input, shape index: {}]   ;;  %s10869_s3 = inlined_call_operand.hbm [shape: bf16[256,512], index: 3, kind: input, shape index: {}]   ;;  %s10870_s4 = inlined_call_operand.vmem [shape: f32[1,512], index: 4, kind: input, shape index: {}]   ;;  %s10871_s5 = inlined_call_operand.hbm [shape: bf16[512,256], index: 5, kind: input, shape index: {}]   ;;  %s10872_s6 = inlined_call_operand.vmem [shape: f32[1,256], index: 6, kind: input, shape index: {}]   ;;  %s10873_s7 = inlined_call_operand.hbm [shape: bf16[256,128], index: 7, kind: input, shape index: {}]   ;;  %s10874_s8 = inlined_call_operand.vmem [shape: f32[1,128], index: 8, kind: input, shape index: {}]   ;;  %s10875_s9 = inlined_call_operand.hbm [shape: f32[256,128], index: 9, kind: output, shape index: {}]  }
   0x1   :  { %15 = vsyncpa [#allocation6], 0 }
   0x2   :  { %16 = vsyncpa [#allocation9], 0 }
   0x3   :  { %17 = vsyncpa [#allocation4], 0  ;;  %s8956_s30 = smov [#allocation5]   ;;  %s8816_s13 = scalar_lea.hbm %s10867_s1, 14336 }
   0x4   :  { %s35_s10 = sshll.u32 %s8956_s30, 4  ;;  %p8817_p0 = scmp.ne.s32.totalorder %s10867_s1, %s8816_s13  ;;  %s36_s10 = int_to_ptr.vmem [resolvable:$true] %s35_s10 }
   0x5   :  { %p8820_p1 = scmp.lt.u32.totalorder %s8816_s13, %s10867_s1 }
   0x7   :  { %p8822_p2 = pnand %p8820_p1, %p8817_p0 }
   0x9   :  { %8825 = shalt.err (!%p8822_p2)
}
   0xa   :  { %s8826_s18 = scalar_lea.vmem %s36_s10, 14336  ;;  %p8831_p4 = scmp.lt.s32.totalorder %s36_s10, %s36_s10 }
   0xb   :  { %p8827_p3 = scmp.ne.s32.totalorder %s36_s10, %s8826_s18  ;;  %p8832_p5 = scmp.lt.s32.totalorder %s8826_s18, %s8826_s18 }
   0xd   :  { %p8833_p6 = por %p8832_p5, %p8831_p4 }
   0xf   :  { %p8834_p7 = pnand %p8833_p6, %p8827_p3 }
  0x11   :  { %8837 = shalt.err (!%p8834_p7)
}
  0x12   :  { %s8957_s19 = smov 128   ;;  %s8958_s20 = smov 8  }
  0x13   :  { %41 = dma.hbm_to_vmem [thread:$0]  %s10867_s1, 14336, %s36_s10, [#allocation6], %s8957_s19, %s8957_s19, %s8958_s20  }
  0x14   :  { %s8959_s23 = smov [#allocation8]   ;;  %s8960_s25 = smov [#allocation2]  }
  0x15   :  { %s63_s24 = sshll.u32 %s8959_s23, 4  ;;  %s23_s26 = sshll.u32 %s8960_s25, 4  ;;  %s64_s24 = int_to_ptr.vmem [resolvable:$true] %s63_s24  ;;  %s24_s26 = int_to_ptr.vmem [resolvable:$true] %s23_s26 }
  0x16   :  { %s8838_s29 = scalar_lea.hbm %s10871_s5, 8192 }
  0x17   :  { %p8839_p8 = scmp.ne.s32.totalorder %s10871_s5, %s8838_s29  ;;  %p8842_p9 = scmp.lt.u32.totalorder %s8838_s29, %s10871_s5 }
  0x19   :  { %p8844_p10 = pnand %p8842_p9, %p8839_p8 }
  0x1b   :  { %8847 = shalt.err (!%p8844_p10)
}
  0x1c   :  { %s8848_s1 = scalar_lea.vmem %s64_s24, 8192  ;;  %p8853_p12 = scmp.lt.s32.totalorder %s64_s24, %s64_s24 }
  0x1d   :  { %p8849_p11 = scmp.ne.s32.totalorder %s64_s24, %s8848_s1  ;;  %p8854_p13 = scmp.lt.s32.totalorder %s8848_s1, %s8848_s1 }
  0x1f   :  { %p8855_p0 = por %p8854_p13, %p8853_p12 }
  0x21   :  { %p8856_p1 = pnand %p8855_p0, %p8849_p11 }
  0x23   :  { %8859 = shalt.err (!%p8856_p1)
}
  0x24   :  { %69 = dma.hbm_to_vmem [thread:$0]  %s10871_s5, 8192, %s64_s24, [#allocation9], %s8957_s19, %s8957_s19, %s8958_s20  }
  0x25   :  { %s8860_s17 = scalar_lea.hbm %s10866_s0, 14336 }
  0x26   :  { %p8861_p2 = scmp.ne.s32.totalorder %s10866_s0, %s8860_s17  ;;  %p8864_p3 = scmp.lt.u32.totalorder %s8860_s17, %s10866_s0 }
  0x28   :  { %p8866_p4 = pnand %p8864_p3, %p8861_p2 }
  0x2a   :  { %8869 = shalt.err (!%p8866_p4)
}
  0x2b   :  { %s8870_s25 = scalar_lea.vmem %s24_s26, 14336  ;;  %p8875_p6 = scmp.lt.s32.totalorder %s24_s26, %s24_s26 }
  0x2c   :  { %p8871_p5 = scmp.ne.s32.totalorder %s24_s26, %s8870_s25  ;;  %p8876_p7 = scmp.lt.s32.totalorder %s8870_s25, %s8870_s25 }
  0x2e   :  { %p8877_p8 = por %p8876_p7, %p8875_p6 }
  0x30   :  { %p8878_p9 = pnand %p8877_p8, %p8871_p5 }
  0x32   :  { %8881 = shalt.err (!%p8878_p9)
}
  0x33   :  { %s8961_s5 = smov 448   ;;  %s8962_s24 = smov 28  }
  0x34   :  { %29 = dma.hbm_to_vmem [thread:$0]  %s10866_s0, 14336, %s24_s26, [#allocation3], %s8961_s5, %s8961_s5, %s8962_s24  }
  0x35   :  { %s8963_s29 = smov [#allocation7]   ;;  %s8882_s13 = scalar_lea.hbm %s10869_s3, 8192 }
  0x36   :  { %s49_s30 = sshll.u32 %s8963_s29, 4  ;;  %p8883_p10 = scmp.ne.s32.totalorder %s10869_s3, %s8882_s13  ;;  %s50_s30 = int_to_ptr.vmem [resolvable:$true] %s49_s30 }
  0x37   :  { %p8886_p11 = scmp.lt.u32.totalorder %s8882_s13, %s10869_s3 }
  0x39   :  { %p8888_p12 = pnand %p8886_p11, %p8883_p10 }
  0x3b   :  { %8891 = shalt.err (!%p8888_p12)
}
  0x3c   :  { %s8892_s16 = scalar_lea.vmem %s50_s30, 8192  ;;  %p8897_p0 = scmp.lt.s32.totalorder %s50_s30, %s50_s30 }
  0x3d   :  { %p8893_p13 = scmp.ne.s32.totalorder %s50_s30, %s8892_s16  ;;  %p8898_p1 = scmp.lt.s32.totalorder %s8892_s16, %s8892_s16 }
  0x3f   :  { %p8899_p2 = por %p8898_p1, %p8897_p0 }
  0x41   :  { %p8900_p3 = pnand %p8899_p2, %p8893_p13 }
  0x43   :  { %8903 = shalt.err (!%p8900_p3)
}
  0x44   :  { %s8964_s0 = smov 256   ;;  %s8965_s26 = smov 16  }
  0x45   :  { %55 = dma.hbm_to_vmem [thread:$0]  %s10869_s3, 8192, %s50_s30, [#allocation6], %s8964_s0, %s8964_s0, %s8965_s26  }
  0x46   :  { %s8966_s21 = smov [#allocation10]   ;;  %s8904_s5 = scalar_lea.hbm %s10873_s7, 2048 }
  0x47   :  { %s77_s22 = sshll.u32 %s8966_s21, 4  ;;  %p8905_p4 = scmp.ne.s32.totalorder %s10873_s7, %s8904_s5  ;;  %s78_s22 = int_to_ptr.vmem [resolvable:$true] %s77_s22 }
  0x48   :  { %p8908_p5 = scmp.lt.u32.totalorder %s8904_s5, %s10873_s7 }
  0x4a   :  { %p8910_p6 = pnand %p8908_p5, %p8905_p4 }
  0x4c   :  { %8913 = shalt.err (!%p8910_p6)
}
  0x4d   :  { %s8914_s11 = scalar_lea.vmem %s78_s22, 2048  ;;  %p8919_p8 = scmp.lt.s32.totalorder %s78_s22, %s78_s22 }
  0x4e   :  { %p8915_p7 = scmp.ne.s32.totalorder %s78_s22, %s8914_s11  ;;  %p8920_p9 = scmp.lt.s32.totalorder %s8914_s11, %s8914_s11 }
  0x50   :  { %p8921_p10 = por %p8920_p9, %p8919_p8 }
  0x52   :  { %p8922_p11 = pnand %p8921_p10, %p8915_p7 }
  0x54   :  { %8925 = shalt.err (!%p8922_p11)
}
  0x55   :  { %s8967_s3 = smov 64   ;;  %s8968_s30 = smov 4  }
  0x56   :  { %83 = dma.hbm_to_vmem [thread:$0]  %s10873_s7, 2048, %s78_s22, [#allocation9], %s8967_s3, %s8967_s3, %s8968_s30  }
  0x57   :  { %8948 = dma.done.wait [#allocation3], 14336  }
  0x58   :  { %8949 = vsyncadd [#allocation3], 4294952960 }
  0x59   :  { %8950 = dma.done.wait [#allocation6], 22528  }
  0x5a   :  { %8951 = vsyncadd [#allocation6], 4294944768 }
  0x5b   :  { %8952 = dma.done.wait [#allocation9], 10240  }
  0x5c   :  { %8953 = vsyncadd [#allocation9], 4294957056  ;;  %v7255_v0 = vld [vmem:[#allocation5 + $0x4] ss:$8 sps:$4 sm:$0xff]   ;;  %v7257_v1 = vld [vmem:[#allocation5] ss:$8 sps:$4 sm:$0xff]  }
  0x5d   :  { %1490 = vmatprep.subr.bf16.mxu0 %v7255_v0  ;;  %v7258_v2 = vld [vmem:[#allocation5 + $0x14] ss:$8 sps:$4 sm:$0xff]   ;;  %v7260_v3 = vld [vmem:[#allocation5 + $0x10] ss:$8 sps:$4 sm:$0xff]   ;;  %v7261_v4 = vld [vmem:[#allocation5 + $0x24] ss:$8 sps:$4 sm:$0xff]  }
  0x5e   :  { %1491 = vmatpush1.bf16.msra.mxu0 %v7257_v1  ;;  %v7263_v5 = vld [vmem:[#allocation5 + $0x20] ss:$8 sps:$4 sm:$0xff]   ;;  %v7264_v6 = vld [vmem:[#allocation5 + $0x34] ss:$8 sps:$4 sm:$0xff]   ;;  %v7266_v7 = vld [vmem:[#allocation5 + $0x30] ss:$8 sps:$4 sm:$0xff]  }
  0x5f   :  { %1492 = vmatprep.subr.bf16.mxu0 %v7258_v2  ;;  %v7267_v8 = vld [vmem:[#allocation5 + $0x44] ss:$8 sps:$4 sm:$0xff]   ;;  %v7269_v9 = vld [vmem:[#allocation5 + $0x40] ss:$8 sps:$4 sm:$0xff]   ;;  %v7270_v10 = vld [vmem:[#allocation5 + $0x54] ss:$8 sps:$4 sm:$0xff]  }
  0x60   :  { %v7272_v11 = vld [vmem:[#allocation5 + $0x50] ss:$8 sps:$4 sm:$0xff]   ;;  %v7273_v12 = vld [vmem:[#allocation5 + $0x64] ss:$8 sps:$4 sm:$0xff]   ;;  %v7275_v14 = vld [vmem:[#allocation5 + $0x60] ss:$8 sps:$4 sm:$0xff]  }
  0x61   :  { %v7305_v13 = vld [vmem:[#allocation2 + $0x4] ss:$28 sps:$4 sm:$0xff]   ;;  %v7276_v15 = vld [vmem:[#allocation5 + $0x74] ss:$8 sps:$4 sm:$0xff]   ;;  %v7278_v16 = vld [vmem:[#allocation5 + $0x70] ss:$8 sps:$4 sm:$0xff]  }
  0x62   :  { %1493 = vmatpush1.bf16.msra.mxu0 %v7260_v3  ;;  %1522 = vmatprep.mubr.bf16.mxu0 %v7305_v13  ;;  %v7279_v17 = vld [vmem:[#allocation5 + $0x84] ss:$8 sps:$4 sm:$0xff]   ;;  %v7281_v18 = vld [vmem:[#allocation5 + $0x80] ss:$8 sps:$4 sm:$0xff]   ;;  %v7282_v19 = vld [vmem:[#allocation5 + $0x94] ss:$8 sps:$4 sm:$0xff]  }
  0x63   :  { %1494 = vmatprep.subr.bf16.mxu0 %v7261_v4  ;;  %v7284_v20 = vld [vmem:[#allocation5 + $0x90] ss:$8 sps:$4 sm:$0xff]   ;;  %v7285_v21 = vld [vmem:[#allocation5 + $0xa4] ss:$8 sps:$4 sm:$0xff]   ;;  %v7287_v22 = vld [vmem:[#allocation5 + $0xa0] ss:$8 sps:$4 sm:$0xff]  }
  0x64   :  { %v7288_v23 = vld [vmem:[#allocation5 + $0xb4] ss:$8 sps:$4 sm:$0xff]   ;;  %v7290_v24 = vld [vmem:[#allocation5 + $0xb0] ss:$8 sps:$4 sm:$0xff]   ;;  %v7291_v25 = vld [vmem:[#allocation5 + $0xc4] ss:$8 sps:$4 sm:$0xff]  }
  0x65   :  { %v7293_v26 = vld [vmem:[#allocation5 + $0xc0] ss:$8 sps:$4 sm:$0xff]   ;;  %v7294_v27 = vld [vmem:[#allocation5 + $0xd4] ss:$8 sps:$4 sm:$0xff]   ;;  %v7296_v28 = vld [vmem:[#allocation5 + $0xd0] ss:$8 sps:$4 sm:$0xff]  }
  0x66   :  { %1495 = vmatpush1.bf16.msra.mxu0 %v7263_v5  ;;  %v7297_v29 = vld [vmem:[#allocation5 + $0xe4] ss:$8 sps:$4 sm:$0xff]   ;;  %v7299_v30 = vld [vmem:[#allocation5 + $0xe0] ss:$8 sps:$4 sm:$0xff]   ;;  %v7300_v31 = vld [vmem:[#allocation5 + $0xf4] ss:$8 sps:$4 sm:$0xff]  }
  0x67   :  { %1496 = vmatprep.subr.bf16.mxu0 %v7264_v6  ;;  %v7302_v32 = vld [vmem:[#allocation5 + $0xf0] ss:$8 sps:$4 sm:$0xff]   ;;  %v7308_v33 = vld [vmem:[#allocation5 + $0x104] ss:$8 sps:$4 sm:$0xff]   ;;  %v7303_v34 = vld [vmem:[#allocation2] ss:$28 sps:$4 sm:$0xff]  }
  0x68   :  { %v7306_v35 = vld [vmem:[#allocation5 + $0x100] ss:$8 sps:$4 sm:$0xff]   ;;  %v7309_v36 = vld [vmem:[#allocation2 + $0x3c] ss:$28 sps:$4 sm:$0xff]   ;;  %v7320_v39 = vld [vmem:[#allocation5 + $0x124] ss:$8 sps:$4 sm:$0xff]  }
  0x69   :  { %v7314_v37 = vld [vmem:[#allocation5 + $0x114] ss:$8 sps:$4 sm:$0xff]   ;;  %v7312_v38 = vld [vmem:[#allocation5 + $0x110] ss:$8 sps:$4 sm:$0xff]   ;;  %v7318_v42 = vld [vmem:[#allocation5 + $0x120] ss:$8 sps:$4 sm:$0xff]  }
  0x6a   :  { %1497 = vmatpush1.bf16.msra.mxu0 %v7266_v7  ;;  %v7311_v40 = vld [vmem:[#allocation2 + $0x38] ss:$28 sps:$4 sm:$0xff]   ;;  %v7332_v45 = vld [vmem:[#allocation5 + $0x144] ss:$8 sps:$4 sm:$0xff]   ;;  %v7330_v48 = vld [vmem:[#allocation5 + $0x140] ss:$8 sps:$4 sm:$0xff]  }
  0x6b   :  { %1498 = vmatprep.subr.bf16.mxu0 %v7267_v8  ;;  %v7315_v41 = vld [vmem:[#allocation2 + $0x74] ss:$28 sps:$4 sm:$0xff]   ;;  %v7321_v47 = vld [vmem:[#allocation2 + $0xac] ss:$28 sps:$4 sm:$0xff]   ;;  %v7327_v53 = vld [vmem:[#allocation2 + $0xe4] ss:$28 sps:$4 sm:$0xff]  }
  0x6c   :  { %v7326_v43 = vld [vmem:[#allocation5 + $0x134] ss:$8 sps:$4 sm:$0xff]   ;;  %v7324_v44 = vld [vmem:[#allocation5 + $0x130] ss:$8 sps:$4 sm:$0xff]   ;;  %v7344_v51 = vld [vmem:[#allocation5 + $0x164] ss:$8 sps:$4 sm:$0xff]  }
  0x6d   :  { %v7317_v46 = vld [vmem:[#allocation2 + $0x70] ss:$28 sps:$4 sm:$0xff]   ;;  %v7338_v49 = vld [vmem:[#allocation5 + $0x154] ss:$8 sps:$4 sm:$0xff]   ;;  %v7323_v52 = vld [vmem:[#allocation2 + $0xa8] ss:$28 sps:$4 sm:$0xff]  }
  0x6e   :  { %1499 = vmatpush1.bf16.msra.mxu0 %v7269_v9  ;;  %v7336_v50 = vld [vmem:[#allocation5 + $0x150] ss:$8 sps:$4 sm:$0xff]   ;;  %v7342_v54 = vld [vmem:[#allocation5 + $0x160] ss:$8 sps:$4 sm:$0xff]   ;;  %v7350_v55 = vld [vmem:[#allocation5 + $0x174] ss:$8 sps:$4 sm:$0xff]  }
  0x6f   :  { %1500 = vmatprep.subr.bf16.mxu0 %v7270_v10  ;;  %v7348_v56 = vld [vmem:[#allocation5 + $0x170] ss:$8 sps:$4 sm:$0xff]   ;;  %v7356_v57 = vld [vmem:[#allocation5 + $0x184] ss:$8 sps:$4 sm:$0xff]   ;;  %v7329_v58 = vld [vmem:[#allocation2 + $0xe0] ss:$28 sps:$4 sm:$0xff]  }
  0x70   :  { %v7333_v59 = vld [vmem:[#allocation2 + $0x11c] ss:$28 sps:$4 sm:$0xff]   ;;  %v7354_v60 = vld [vmem:[#allocation5 + $0x180] ss:$8 sps:$4 sm:$0xff]   ;;  %v7368_v63 = vld [vmem:[#allocation5 + $0x1a4] ss:$8 sps:$4 sm:$0xff]  }
  0x71   :  { %v7362_v61 = vld [vmem:[#allocation5 + $0x194] ss:$8 sps:$4 sm:$0xff]   ;;  %v7360_v62 = vld [vmem:[#allocation5 + $0x190] ss:$8 sps:$4 sm:$0xff]   ;;  %v7366_v2 = vld [vmem:[#allocation5 + $0x1a0] ss:$8 sps:$4 sm:$0xff]  }
  0x72   :  { %1501 = vmatpush1.bf16.msra.mxu0 %v7272_v11  ;;  %v7335_v0 = vld [vmem:[#allocation2 + $0x118] ss:$28 sps:$4 sm:$0xff]   ;;  %v7380_v5 = vld [vmem:[#allocation5 + $0x1c4] ss:$8 sps:$4 sm:$0xff]   ;;  %v7378_v8 = vld [vmem:[#allocation5 + $0x1c0] ss:$8 sps:$4 sm:$0xff]  }
  0x73   :  { %1502 = vmatprep.subr.bf16.mxu0 %v7273_v12  ;;  %v7339_v1 = vld [vmem:[#allocation2 + $0x154] ss:$28 sps:$4 sm:$0xff]   ;;  %v7345_v7 = vld [vmem:[#allocation2 + $0x18c] ss:$28 sps:$4 sm:$0xff]   ;;  %v7351_v13 = vld [vmem:[#allocation2 + $0x1c4] ss:$28 sps:$4 sm:$0xff]  }
  0x74   :  { %v7374_v3 = vld [vmem:[#allocation5 + $0x1b4] ss:$8 sps:$4 sm:$0xff]   ;;  %v7372_v4 = vld [vmem:[#allocation5 + $0x1b0] ss:$8 sps:$4 sm:$0xff]   ;;  %v7392_v11 = vld [vmem:[#allocation5 + $0x1e4] ss:$8 sps:$4 sm:$0xff]  }
  0x75   :  { %v7341_v6 = vld [vmem:[#allocation2 + $0x150] ss:$28 sps:$4 sm:$0xff]   ;;  %v7386_v9 = vld [vmem:[#allocation5 + $0x1d4] ss:$8 sps:$4 sm:$0xff]   ;;  %v7347_v12 = vld [vmem:[#allocation2 + $0x188] ss:$28 sps:$4 sm:$0xff]  }
  0x76   :  { %1503 = vmatpush1.bf16.msra.mxu0 %v7275_v14  ;;  %v7384_v10 = vld [vmem:[#allocation5 + $0x1d0] ss:$8 sps:$4 sm:$0xff]   ;;  %v7390_v14 = vld [vmem:[#allocation5 + $0x1e0] ss:$8 sps:$4 sm:$0xff]  }
  0x77   :  { %1504 = vmatprep.subr.bf16.mxu0 %v7276_v15  ;;  %v7398_v15 = vld [vmem:[#allocation5 + $0x1f4] ss:$8 sps:$4 sm:$0xff]  }
  0x7a   :  { %1505 = vmatpush1.bf16.msra.mxu0 %v7278_v16  ;;  %v7396_v16 = vld [vmem:[#allocation5 + $0x1f0] ss:$8 sps:$4 sm:$0xff]  }
  0x7b   :  { %1506 = vmatprep.subr.bf16.mxu0 %v7279_v17  ;;  %v7404_v17 = vld [vmem:[#allocation5 + $0x204] ss:$8 sps:$4 sm:$0xff]  }
  0x7e   :  { %1507 = vmatpush1.bf16.msra.mxu0 %v7281_v18  ;;  %v7353_v18 = vld [vmem:[#allocation2 + $0x1c0] ss:$28 sps:$4 sm:$0xff]  }
  0x7f   :  { %1508 = vmatprep.subr.bf16.mxu0 %v7282_v19  ;;  %v7357_v19 = vld [vmem:[#allocation2 + $0x1fc] ss:$28 sps:$4 sm:$0xff]  }
  0x82   :  { %1509 = vmatpush1.bf16.msra.mxu0 %v7284_v20  ;;  %v7359_v20 = vld [vmem:[#allocation2 + $0x1f8] ss:$28 sps:$4 sm:$0xff]  }
  0x83   :  { %1510 = vmatprep.subr.bf16.mxu0 %v7285_v21  ;;  %v7363_v21 = vld [vmem:[#allocation2 + $0x234] ss:$28 sps:$4 sm:$0xff]  }
  0x86   :  { %1511 = vmatpush1.bf16.msra.mxu0 %v7287_v22  ;;  %v7365_v22 = vld [vmem:[#allocation2 + $0x230] ss:$28 sps:$4 sm:$0xff]  }
  0x87   :  { %1512 = vmatprep.subr.bf16.mxu0 %v7288_v23  ;;  %v7369_v23 = vld [vmem:[#allocation2 + $0x26c] ss:$28 sps:$4 sm:$0xff]  }
  0x8a   :  { %1513 = vmatpush1.bf16.msra.mxu0 %v7290_v24  ;;  %v7371_v24 = vld [vmem:[#allocation2 + $0x268] ss:$28 sps:$4 sm:$0xff]  }
  0x8b   :  { %1514 = vmatprep.subr.bf16.mxu0 %v7291_v25  ;;  %v7375_v25 = vld [vmem:[#allocation2 + $0x2a4] ss:$28 sps:$4 sm:$0xff]  }
  0x8e   :  { %1515 = vmatpush1.bf16.msra.mxu0 %v7293_v26  ;;  %v7377_v26 = vld [vmem:[#allocation2 + $0x2a0] ss:$28 sps:$4 sm:$0xff]  }
  0x8f   :  { %1516 = vmatprep.subr.bf16.mxu0 %v7294_v27  ;;  %v7381_v27 = vld [vmem:[#allocation2 + $0x2dc] ss:$28 sps:$4 sm:$0xff]  }
  0x92   :  { %1517 = vmatpush1.bf16.msra.mxu0 %v7296_v28  ;;  %v7383_v28 = vld [vmem:[#allocation2 + $0x2d8] ss:$28 sps:$4 sm:$0xff]  }
  0x93   :  { %1518 = vmatprep.subr.bf16.mxu0 %v7297_v29  ;;  %v7387_v29 = vld [vmem:[#allocation2 + $0x314] ss:$28 sps:$4 sm:$0xff]  }
  0x96   :  { %1519 = vmatpush1.bf16.msra.mxu0 %v7299_v30  ;;  %v7389_v30 = vld [vmem:[#allocation2 + $0x310] ss:$28 sps:$4 sm:$0xff]  }
  0x97   :  { %1520 = vmatprep.subr.bf16.mxu0 %v7300_v31  ;;  %v7393_v31 = vld [vmem:[#allocation2 + $0x34c] ss:$28 sps:$4 sm:$0xff]  }
  0x9a   :  { %1521 = vmatpush1.bf16.msra.mxu0 %v7302_v32  ;;  %v7395_v32 = vld [vmem:[#allocation2 + $0x348] ss:$28 sps:$4 sm:$0xff]  }
  0x9b   :  { %1683 = vmatprep.subr.bf16.mxu0 %v7308_v33  ;;  %v7401_v33 = vld [vmem:[#allocation2 + $0xc] ss:$28 sps:$4 sm:$0xff]  }
  0x9d   :  { %1523 = vmatmul.mubr.bf16.vlgmr.msra.gmra.mrb[0].mxu0 %v7303_v34  ;;  %v7399_v34 = vld [vmem:[#allocation2 + $0x8] ss:$28 sps:$4 sm:$0xff]  }
  0x9e   :  { %1684 = vmatpush1.bf16.msra.mxu0 %v7306_v35  ;;  %1532 = vmatprep.mubr.bf16.mxu0 %v7309_v36  ;;  %v7402_v35 = vld [vmem:[#allocation5 + $0x200] ss:$8 sps:$4 sm:$0xff]  }
  0x9f   :  { %1685 = vmatprep.subr.bf16.mxu0 %v7314_v37  ;;  %v7405_v36 = vld [vmem:[#allocation2 + $0x44] ss:$28 sps:$4 sm:$0xff]   ;;  %v7410_v37 = vld [vmem:[#allocation5 + $0x214] ss:$8 sps:$4 sm:$0xff]  }
  0xa2   :  { %1686 = vmatpush1.bf16.msra.mxu0 %v7312_v38  ;;  %v9087_v38 = vld [vmem:[#allocation5 + $0x300] ss:$8 sps:$4 sm:$0xff]  }
  0xa3   :  { %1687 = vmatprep.subr.bf16.mxu0 %v7320_v39  ;;  %v9089_v39 = vld [vmem:[#allocation5 + $0x304] ss:$8 sps:$4 sm:$0xff]  }
  0xa4   :  { %6840 = vmatprep.subr.bf16.mxu1 %v9089_v39 }
  0xa5   :  { %1533 = vmatmul.mubr.bf16.gmra.mrb[4].mxu0 %v7311_v40  ;;  %v7408_v40 = vld [vmem:[#allocation5 + $0x210] ss:$8 sps:$4 sm:$0xff]   ;;  %6848 = vmatpush1.bf16.msra.mxu1 %v9087_v38 }
  0xa6   :  { %1542 = vmatprep.mubr.bf16.mxu0 %v7315_v41  ;;  %1688 = vmatpush1.bf16.msra.mxu0 %v7318_v42  ;;  %v7416_v41 = vld [vmem:[#allocation5 + $0x224] ss:$8 sps:$4 sm:$0xff]   ;;  %v7407_v42 = vld [vmem:[#allocation2 + $0x40] ss:$28 sps:$4 sm:$0xff]  }
  0xa7   :  { %1689 = vmatprep.subr.bf16.mxu0 %v7326_v43  ;;  %v7411_v43 = vld [vmem:[#allocation2 + $0x7c] ss:$28 sps:$4 sm:$0xff]  }
  0xaa   :  { %1690 = vmatpush1.bf16.msra.mxu0 %v7324_v44  ;;  %v7414_v44 = vld [vmem:[#allocation5 + $0x220] ss:$8 sps:$4 sm:$0xff]  }
  0xab   :  { %1691 = vmatprep.subr.bf16.mxu0 %v7332_v45  ;;  %v7422_v45 = vld [vmem:[#allocation5 + $0x234] ss:$8 sps:$4 sm:$0xff]  }
  0xad   :  { %1543 = vmatmul.mubr.bf16.gmra.mrb[8].mxu0 %v7317_v46  ;;  %v7420_v46 = vld [vmem:[#allocation5 + $0x230] ss:$8 sps:$4 sm:$0xff]  }
  0xae   :  { %1552 = vmatprep.mubr.bf16.mxu0 %v7321_v47  ;;  %1692 = vmatpush1.bf16.msra.mxu0 %v7330_v48  ;;  %v7428_v47 = vld [vmem:[#allocation5 + $0x244] ss:$8 sps:$4 sm:$0xff]   ;;  %v7413_v48 = vld [vmem:[#allocation2 + $0x78] ss:$28 sps:$4 sm:$0xff]  }
  0xaf   :  { %1693 = vmatprep.subr.bf16.mxu0 %v7338_v49  ;;  %v7417_v49 = vld [vmem:[#allocation2 + $0xb4] ss:$28 sps:$4 sm:$0xff]  }
  0xb2   :  { %1694 = vmatpush1.bf16.msra.mxu0 %v7336_v50  ;;  %v7426_v50 = vld [vmem:[#allocation5 + $0x240] ss:$8 sps:$4 sm:$0xff]  }
  0xb3   :  { %1695 = vmatprep.subr.bf16.mxu0 %v7344_v51  ;;  %v7434_v51 = vld [vmem:[#allocation5 + $0x254] ss:$8 sps:$4 sm:$0xff]  }
  0xb5   :  { %1553 = vmatmul.mubr.bf16.gmra.mrb[12].mxu0 %v7323_v52  ;;  %v9093_v52 = vld [vmem:[#allocation5 + $0x310] ss:$8 sps:$4 sm:$0xff]  }
  0xb6   :  { %1562 = vmatprep.mubr.bf16.mxu0 %v7327_v53  ;;  %1696 = vmatpush1.bf16.msra.mxu0 %v7342_v54  ;;  %v9095_v53 = vld [vmem:[#allocation5 + $0x314] ss:$8 sps:$4 sm:$0xff]   ;;  %v7432_v54 = vld [vmem:[#allocation5 + $0x250] ss:$8 sps:$4 sm:$0xff]  }
  0xb7   :  { %1697 = vmatprep.subr.bf16.mxu0 %v7350_v55  ;;  %v7440_v55 = vld [vmem:[#allocation5 + $0x264] ss:$8 sps:$4 sm:$0xff]   ;;  %6841 = vmatprep.subr.bf16.mxu1 %v9095_v53 }
  0xb8   :  { %6849 = vmatpush1.bf16.msra.mxu1 %v9093_v52 }
  0xba   :  { %1698 = vmatpush1.bf16.msra.mxu0 %v7348_v56  ;;  %v7419_v56 = vld [vmem:[#allocation2 + $0xb0] ss:$28 sps:$4 sm:$0xff]  }
  0xbb   :  { %1699 = vmatprep.subr.bf16.mxu0 %v7356_v57  ;;  %v7423_v57 = vld [vmem:[#allocation2 + $0xec] ss:$28 sps:$4 sm:$0xff]  }
  0xbd   :  { %1563 = vmatmul.mubr.bf16.gmra.mrb[16].mxu0 %v7329_v58  ;;  %v7438_v58 = vld [vmem:[#allocation5 + $0x260] ss:$8 sps:$4 sm:$0xff]  }
  0xbe   :  { %1572 = vmatprep.mubr.bf16.mxu0 %v7333_v59  ;;  %1700 = vmatpush1.bf16.msra.mxu0 %v7354_v60  ;;  %v7446_v59 = vld [vmem:[#allocation5 + $0x274] ss:$8 sps:$4 sm:$0xff]   ;;  %v9099_v60 = vld [vmem:[#allocation5 + $0x324] ss:$8 sps:$4 sm:$0xff]  }
  0xbf   :  { %1701 = vmatprep.subr.bf16.mxu0 %v7362_v61  ;;  %v9101_v61 = vld [vmem:[#allocation5 + $0x320] ss:$8 sps:$4 sm:$0xff]   ;;  %6842 = vmatprep.subr.bf16.mxu1 %v9099_v60 }
  0xc0   :  { %6850 = vmatpush1.bf16.msra.mxu1 %v9101_v61 }
  0xc2   :  { %1702 = vmatpush1.bf16.msra.mxu0 %v7360_v62  ;;  %v9103_v62 = vld [vmem:[#allocation5 + $0x334] ss:$8 sps:$4 sm:$0xff]  }
  0xc3   :  { %1703 = vmatprep.subr.bf16.mxu0 %v7368_v63  ;;  %v7444_v63 = vld [vmem:[#allocation5 + $0x270] ss:$8 sps:$4 sm:$0xff]   ;;  %6843 = vmatprep.subr.bf16.mxu1 %v9103_v62 }
  0xc5   :  { %1573 = vmatmul.mubr.bf16.gmra.mrb[20].mxu0 %v7335_v0  ;;  %v7452_v0 = vld [vmem:[#allocation5 + $0x284] ss:$8 sps:$4 sm:$0xff]  }
  0xc6   :  { %1582 = vmatprep.mubr.bf16.mxu0 %v7339_v1  ;;  %1704 = vmatpush1.bf16.msra.mxu0 %v7366_v2  ;;  %v9107_v1 = vld [vmem:[#allocation5 + $0x330] ss:$8 sps:$4 sm:$0xff]   ;;  %v7425_v2 = vld [vmem:[#allocation2 + $0xe8] ss:$28 sps:$4 sm:$0xff]  }
  0xc7   :  { %1705 = vmatprep.subr.bf16.mxu0 %v7374_v3  ;;  %v7429_v3 = vld [vmem:[#allocation2 + $0x124] ss:$28 sps:$4 sm:$0xff]   ;;  %6851 = vmatpush1.bf16.msra.mxu1 %v9107_v1 }
  0xca   :  { %1706 = vmatpush1.bf16.msra.mxu0 %v7372_v4  ;;  %v7450_v4 = vld [vmem:[#allocation5 + $0x280] ss:$8 sps:$4 sm:$0xff]  }
  0xcb   :  { %1707 = vmatprep.subr.bf16.mxu0 %v7380_v5  ;;  %v7458_v5 = vld [vmem:[#allocation5 + $0x294] ss:$8 sps:$4 sm:$0xff]  }
  0xcd   :  { %1583 = vmatmul.mubr.bf16.gmra.mrb[24].mxu0 %v7341_v6  ;;  %v9111_v6 = vld [vmem:[#allocation5 + $0x344] ss:$8 sps:$4 sm:$0xff]  }
  0xce   :  { %1592 = vmatprep.mubr.bf16.mxu0 %v7345_v7  ;;  %1708 = vmatpush1.bf16.msra.mxu0 %v7378_v8  ;;  %v9113_v7 = vld [vmem:[#allocation5 + $0x340] ss:$8 sps:$4 sm:$0xff]   ;;  %v9115_v8 = vld [vmem:[#allocation5 + $0x354] ss:$8 sps:$4 sm:$0xff]  }
  0xcf   :  { %1709 = vmatprep.subr.bf16.mxu0 %v7386_v9  ;;  %v7456_v9 = vld [vmem:[#allocation5 + $0x290] ss:$8 sps:$4 sm:$0xff]   ;;  %6844 = vmatprep.subr.bf16.mxu1 %v9111_v6 }
  0xd0   :  { %6852 = vmatpush1.bf16.msra.mxu1 %v9113_v7 }
  0xd1   :  { %6845 = vmatprep.subr.bf16.mxu1 %v9115_v8 }
  0xd2   :  { %1710 = vmatpush1.bf16.msra.mxu0 %v7384_v10  ;;  %v7464_v10 = vld [vmem:[#allocation5 + $0x2a4] ss:$8 sps:$4 sm:$0xff]  }
  0xd3   :  { %1711 = vmatprep.subr.bf16.mxu0 %v7392_v11  ;;  %v9119_v11 = vld [vmem:[#allocation5 + $0x350] ss:$8 sps:$4 sm:$0xff]  }
  0xd4   :  { %6853 = vmatpush1.bf16.msra.mxu1 %v9119_v11 }
  0xd5   :  { %1593 = vmatmul.mubr.bf16.gmra.mrb[28].mxu0 %v7347_v12  ;;  %v7431_v12 = vld [vmem:[#allocation2 + $0x120] ss:$28 sps:$4 sm:$0xff]  }
  0xd6   :  { %1602 = vmatprep.mubr.bf16.mxu0 %v7351_v13  ;;  %1712 = vmatpush1.bf16.msra.mxu0 %v7390_v14  ;;  %v7435_v13 = vld [vmem:[#allocation2 + $0x15c] ss:$28 sps:$4 sm:$0xff]   ;;  %v7462_v14 = vld [vmem:[#allocation5 + $0x2a0] ss:$8 sps:$4 sm:$0xff]  }
  0xd7   :  { %1713 = vmatprep.subr.bf16.mxu0 %v7398_v15  ;;  %v7470_v15 = vld [vmem:[#allocation5 + $0x2b4] ss:$8 sps:$4 sm:$0xff]  }
  0xda   :  { %1714 = vmatpush1.bf16.msra.mxu0 %v7396_v16  ;;  %v9123_v16 = vld [vmem:[#allocation5 + $0x364] ss:$8 sps:$4 sm:$0xff]  }
  0xdb   :  { %1876 = vmatprep.subr.bf16.mxu0 %v7404_v17  ;;  %v9125_v17 = vld [vmem:[#allocation5 + $0x360] ss:$8 sps:$4 sm:$0xff]   ;;  %6846 = vmatprep.subr.bf16.mxu1 %v9123_v16 }
  0xdc   :  { %6854 = vmatpush1.bf16.msra.mxu1 %v9125_v17 }
  0xdd   :  { %1603 = vmatmul.mubr.bf16.gmra.mrb[32].mxu0 %v7353_v18  ;;  %v9127_v18 = vld [vmem:[#allocation5 + $0x374] ss:$8 sps:$4 sm:$0xff]  }
  0xde   :  { %1612 = vmatprep.mubr.bf16.mxu0 %v7357_v19  ;;  %v7468_v19 = vld [vmem:[#allocation5 + $0x2b0] ss:$8 sps:$4 sm:$0xff]   ;;  %6847 = vmatprep.subr.bf16.mxu1 %v9127_v18 }
  0xe5   :  { %1613 = vmatmul.mubr.bf16.gmra.mrb[36].mxu0 %v7359_v20  ;;  %v7476_v20 = vld [vmem:[#allocation5 + $0x2c4] ss:$8 sps:$4 sm:$0xff]  }
  0xe6   :  { %1622 = vmatprep.mubr.bf16.mxu0 %v7363_v21  ;;  %v9131_v21 = vld [vmem:[#allocation5 + $0x370] ss:$8 sps:$4 sm:$0xff]  }
  0xe7   :  { %6855 = vmatpush1.bf16.msra.mxu1 %v9131_v21 }
  0xed   :  { %1623 = vmatmul.mubr.bf16.gmra.mrb[40].mxu0 %v7365_v22  ;;  %v7437_v22 = vld [vmem:[#allocation2 + $0x158] ss:$28 sps:$4 sm:$0xff]  }
  0xee   :  { %1632 = vmatprep.mubr.bf16.mxu0 %v7369_v23  ;;  %v7441_v23 = vld [vmem:[#allocation2 + $0x194] ss:$28 sps:$4 sm:$0xff]  }
  0xf5   :  { %1633 = vmatmul.mubr.bf16.gmra.mrb[44].mxu0 %v7371_v24  ;;  %v7474_v24 = vld [vmem:[#allocation5 + $0x2c0] ss:$8 sps:$4 sm:$0xff]  }
  0xf6   :  { %1642 = vmatprep.mubr.bf16.mxu0 %v7375_v25  ;;  %v7482_v25 = vld [vmem:[#allocation5 + $0x2d4] ss:$8 sps:$4 sm:$0xff]  }
  0xfd   :  { %1643 = vmatmul.mubr.bf16.gmra.mrb[48].mxu0 %v7377_v26  ;;  %v7540_v26 = vld [vmem:[#allocation2 + $0x168] ss:$28 sps:$4 sm:$0xff]  }
  0xfe   :  { %1652 = vmatprep.mubr.bf16.mxu0 %v7381_v27  ;;  %v7480_v27 = vld [vmem:[#allocation5 + $0x2d0] ss:$8 sps:$4 sm:$0xff]  }
 0x105   :  { %1653 = vmatmul.mubr.bf16.gmra.mrb[52].mxu0 %v7383_v28  ;;  %v7488_v28 = vld [vmem:[#allocation5 + $0x2e4] ss:$8 sps:$4 sm:$0xff]  }
 0x106   :  { %1662 = vmatprep.mubr.bf16.mxu0 %v7387_v29  ;;  %v8969_v29 = vmov 0  }
 0x107   :  { %2161 = vmatprep.mubr.bf16.mxu1 %v8969_v29 }
 0x108   :  { %2162 = vmatmul.mubr.bf16.vlgmr.msra.gmra.mrb[0].mxu1 %v7540_v26  ;;  %v7575_v26 = vld [vmem:[#allocation2 + $0x358] ss:$28 sps:$4 sm:$0xff]  }
 0x109   :  { %2171 = vmatprep.mubr.bf16.mxu1 %v8969_v29 }
 0x10d   :  { %1663 = vmatmul.mubr.bf16.gmra.mrb[56].mxu0 %v7389_v30  ;;  %v7443_v30 = vld [vmem:[#allocation2 + $0x190] ss:$28 sps:$4 sm:$0xff]  }
 0x10e   :  { %1672 = vmatprep.mubr.bf16.mxu0 %v7393_v31  ;;  %v7447_v31 = vld [vmem:[#allocation2 + $0x1cc] ss:$28 sps:$4 sm:$0xff]  }
 0x115   :  { %1673 = vmatmul.mubr.bf16.gmra.mrb[60].mxu0 %v7395_v32  ;;  %v7486_v32 = vld [vmem:[#allocation5 + $0x2e0] ss:$8 sps:$4 sm:$0xff]  }
 0x116   :  { %1715 = vmatprep.mubr.bf16.mxu0 %v7401_v33  ;;  %v7494_v33 = vld [vmem:[#allocation5 + $0x2f4] ss:$8 sps:$4 sm:$0xff]  }
 0x11d   :  { %1716 = vmatmul.mubr.bf16.vlgmr.msra.gmra.mrb[0].mxu0 %v7399_v34  ;;  %v7544_v34 = vld [vmem:[#allocation2 + $0x1a0] ss:$28 sps:$4 sm:$0xff]  }
 0x11e   :  { %1877 = vmatpush1.bf16.msra.mxu0 %v7402_v35  ;;  %1725 = vmatprep.mubr.bf16.mxu0 %v7405_v36  ;;  %v7492_v35 = vld [vmem:[#allocation5 + $0x2f0] ss:$8 sps:$4 sm:$0xff]   ;;  %v7449_v36 = vld [vmem:[#allocation2 + $0x1c8] ss:$28 sps:$4 sm:$0xff]  }
 0x11f   :  { %1878 = vmatprep.subr.bf16.mxu0 %v7410_v37  ;;  %2172 = vmatmul.mubr.bf16.gmra.mrb[4].mxu1 %v7544_v34  ;;  %v7453_v37 = vld [vmem:[#allocation2 + $0x204] ss:$28 sps:$4 sm:$0xff]  }
 0x120   :  { %2181 = vmatprep.mubr.bf16.mxu1 %v8969_v29  ;;  %v7579_v34 = vld [vmem:[#allocation2 + $0x88] ss:$28 sps:$4 sm:$0xff]  }
 0x122   :  { %1879 = vmatpush1.bf16.msra.mxu0 %v7408_v40  ;;  %v7548_v40 = vld [vmem:[#allocation2 + $0x1d8] ss:$28 sps:$4 sm:$0xff]  }
 0x123   :  { %1880 = vmatprep.subr.bf16.mxu0 %v7416_v41  ;;  %v7455_v41 = vld [vmem:[#allocation2 + $0x200] ss:$28 sps:$4 sm:$0xff]  }
 0x125   :  { %1726 = vmatmul.mubr.bf16.gmra.mrb[4].mxu0 %v7407_v42  ;;  %v7459_v42 = vld [vmem:[#allocation2 + $0x23c] ss:$28 sps:$4 sm:$0xff]  }
 0x126   :  { %1735 = vmatprep.mubr.bf16.mxu0 %v7411_v43  ;;  %1881 = vmatpush1.bf16.msra.mxu0 %v7414_v44  ;;  %v7552_v43 = vld [vmem:[#allocation2 + $0x210] ss:$28 sps:$4 sm:$0xff]   ;;  %v7461_v44 = vld [vmem:[#allocation2 + $0x238] ss:$28 sps:$4 sm:$0xff]  }
 0x127   :  { %1882 = vmatprep.subr.bf16.mxu0 %v7422_v45  ;;  %2182 = vmatmul.mubr.bf16.gmra.mrb[8].mxu1 %v7548_v40  ;;  %v7465_v45 = vld [vmem:[#allocation2 + $0x274] ss:$28 sps:$4 sm:$0xff]  }
 0x128   :  { %2191 = vmatprep.mubr.bf16.mxu1 %v8969_v29 }
 0x12a   :  { %1883 = vmatpush1.bf16.msra.mxu0 %v7420_v46  ;;  %v7556_v46 = vld [vmem:[#allocation2 + $0x248] ss:$28 sps:$4 sm:$0xff]  }
 0x12b   :  { %1884 = vmatprep.subr.bf16.mxu0 %v7428_v47  ;;  %v7471_v47 = vld [vmem:[#allocation2 + $0x2ac] ss:$28 sps:$4 sm:$0xff]  }
 0x12d   :  { %1736 = vmatmul.mubr.bf16.gmra.mrb[8].mxu0 %v7413_v48  ;;  %v7560_v48 = vld [vmem:[#allocation2 + $0x280] ss:$28 sps:$4 sm:$0xff]  }
 0x12e   :  { %1745 = vmatprep.mubr.bf16.mxu0 %v7417_v49  ;;  %1885 = vmatpush1.bf16.msra.mxu0 %v7426_v50  ;;  %v7473_v49 = vld [vmem:[#allocation2 + $0x2a8] ss:$28 sps:$4 sm:$0xff]  }
 0x12f   :  { %1886 = vmatprep.subr.bf16.mxu0 %v7434_v51  ;;  %2192 = vmatmul.mubr.bf16.gmra.mrb[12].mxu1 %v7552_v43  ;;  %v7477_v50 = vld [vmem:[#allocation2 + $0x2e4] ss:$28 sps:$4 sm:$0xff]   ;;  %v7564_v51 = vld [vmem:[#allocation2 + $0x2b8] ss:$28 sps:$4 sm:$0xff]  }
 0x130   :  { %2201 = vmatprep.mubr.bf16.mxu1 %v8969_v29 }
 0x132   :  { %1887 = vmatpush1.bf16.msra.mxu0 %v7432_v54  ;;  %v7479_v54 = vld [vmem:[#allocation2 + $0x2e0] ss:$28 sps:$4 sm:$0xff]  }
 0x133   :  { %1888 = vmatprep.subr.bf16.mxu0 %v7440_v55  ;;  %v7483_v55 = vld [vmem:[#allocation2 + $0x31c] ss:$28 sps:$4 sm:$0xff]  }
 0x135   :  { %1746 = vmatmul.mubr.bf16.gmra.mrb[12].mxu0 %v7419_v56  ;;  %v7568_v56 = vld [vmem:[#allocation2 + $0x2f0] ss:$28 sps:$4 sm:$0xff]  }
 0x136   :  { %1755 = vmatprep.mubr.bf16.mxu0 %v7423_v57  ;;  %1889 = vmatpush1.bf16.msra.mxu0 %v7438_v58  ;;  %v7485_v57 = vld [vmem:[#allocation2 + $0x318] ss:$28 sps:$4 sm:$0xff]  }
 0x137   :  { %1890 = vmatprep.subr.bf16.mxu0 %v7446_v59  ;;  %2202 = vmatmul.mubr.bf16.gmra.mrb[16].mxu1 %v7556_v46  ;;  %v7489_v58 = vld [vmem:[#allocation2 + $0x354] ss:$28 sps:$4 sm:$0xff]   ;;  %v7572_v59 = vld [vmem:[#allocation2 + $0x328] ss:$28 sps:$4 sm:$0xff]  }
 0x138   :  { %2211 = vmatprep.mubr.bf16.mxu1 %v8969_v29  ;;  %v7581_v46 = vld [vmem:[#allocation2 + $0xf8] ss:$28 sps:$4 sm:$0xff]  }
 0x13a   :  { %1891 = vmatpush1.bf16.msra.mxu0 %v7444_v63  ;;  %v7491_v63 = vld [vmem:[#allocation2 + $0x350] ss:$28 sps:$4 sm:$0xff]  }
 0x13b   :  { %1892 = vmatprep.subr.bf16.mxu0 %v7452_v0  ;;  %v7497_v0 = vld [vmem:[#allocation2 + $0x14] ss:$28 sps:$4 sm:$0xff]  }
 0x13d   :  { %1756 = vmatmul.mubr.bf16.gmra.mrb[16].mxu0 %v7425_v2  ;;  %v7576_v2 = vld [vmem:[#allocation2 + $0x360] ss:$28 sps:$4 sm:$0xff]  }
 0x13e   :  { %1765 = vmatprep.mubr.bf16.mxu0 %v7429_v3  ;;  %1893 = vmatpush1.bf16.msra.mxu0 %v7450_v4  ;;  %v7495_v3 = vld [vmem:[#allocation2 + $0x10] ss:$28 sps:$4 sm:$0xff]  }
 0x13f   :  { %1894 = vmatprep.subr.bf16.mxu0 %v7458_v5  ;;  %2212 = vmatmul.mubr.bf16.gmra.mrb[20].mxu1 %v7560_v48  ;;  %v7501_v4 = vld [vmem:[#allocation2 + $0x4c] ss:$28 sps:$4 sm:$0xff]  }
 0x140   :  { %2221 = vmatprep.mubr.bf16.mxu1 %v8969_v29  ;;  %v7503_v5 = vld [vmem:[#allocation2 + $0x48] ss:$28 sps:$4 sm:$0xff]  }
 0x142   :  { %1895 = vmatpush1.bf16.msra.mxu0 %v7456_v9  ;;  %v7504_v9 = vld [vmem:[#allocation2 + $0x84] ss:$28 sps:$4 sm:$0xff]  }
 0x143   :  { %1896 = vmatprep.subr.bf16.mxu0 %v7464_v10  ;;  %v7506_v10 = vld [vmem:[#allocation2 + $0x80] ss:$28 sps:$4 sm:$0xff]  }
 0x145   :  { %1766 = vmatmul.mubr.bf16.gmra.mrb[20].mxu0 %v7431_v12  ;;  %v7510_v12 = vld [vmem:[#allocation2 + $0xbc] ss:$28 sps:$4 sm:$0xff]  }
 0x146   :  { %1775 = vmatprep.mubr.bf16.mxu0 %v7435_v13  ;;  %1897 = vmatpush1.bf16.msra.mxu0 %v7462_v14  ;;  %v7549_v13 = vld [vmem:[#allocation2 + $0x20c] ss:$28 sps:$4 sm:$0xff]  }
 0x147   :  { %1898 = vmatprep.subr.bf16.mxu0 %v7470_v15  ;;  %2222 = vmatmul.mubr.bf16.gmra.mrb[24].mxu1 %v7564_v51  ;;  %v7551_v14 = vld [vmem:[#allocation2 + $0x208] ss:$28 sps:$4 sm:$0xff]  }
 0x148   :  { %2231 = vmatprep.mubr.bf16.mxu1 %v8969_v29  ;;  %v7553_v15 = vld [vmem:[#allocation2 + $0x244] ss:$28 sps:$4 sm:$0xff]  }
 0x14a   :  { %1899 = vmatpush1.bf16.msra.mxu0 %v7468_v19  ;;  %v7561_v19 = vld [vmem:[#allocation2 + $0x2b4] ss:$28 sps:$4 sm:$0xff]  }
 0x14b   :  { %1900 = vmatprep.subr.bf16.mxu0 %v7476_v20  ;;  %v7563_v20 = vld [vmem:[#allocation2 + $0x2b0] ss:$28 sps:$4 sm:$0xff]  }
 0x14d   :  { %1776 = vmatmul.mubr.bf16.gmra.mrb[24].mxu0 %v7437_v22  ;;  %v7567_v22 = vld [vmem:[#allocation2 + $0x2e8] ss:$28 sps:$4 sm:$0xff]  }
 0x14e   :  { %1785 = vmatprep.mubr.bf16.mxu0 %v7441_v23  ;;  %1901 = vmatpush1.bf16.msra.mxu0 %v7474_v24  ;;  %v7569_v23 = vld [vmem:[#allocation2 + $0x324] ss:$28 sps:$4 sm:$0xff]  }
 0x14f   :  { %1902 = vmatprep.subr.bf16.mxu0 %v7482_v25  ;;  %2232 = vmatmul.mubr.bf16.gmra.mrb[28].mxu1 %v7568_v56  ;;  %v7571_v24 = vld [vmem:[#allocation2 + $0x320] ss:$28 sps:$4 sm:$0xff]  }
 0x150   :  { %2241 = vmatprep.mubr.bf16.mxu1 %v8969_v29  ;;  %v7573_v25 = vld [vmem:[#allocation2 + $0x35c] ss:$28 sps:$4 sm:$0xff]  }
 0x152   :  { %1903 = vmatpush1.bf16.msra.mxu0 %v7480_v27  ;;  %v7577_v27 = vld [vmem:[#allocation2 + $0x18] ss:$28 sps:$4 sm:$0xff]  }
 0x153   :  { %1904 = vmatprep.subr.bf16.mxu0 %v7488_v28  ;;  %v7578_v28 = vld [vmem:[#allocation2 + $0x50] ss:$28 sps:$4 sm:$0xff]  }
 0x155   :  { %1786 = vmatmul.mubr.bf16.gmra.mrb[28].mxu0 %v7443_v30 }
 0x156   :  { %1795 = vmatprep.mubr.bf16.mxu0 %v7447_v31  ;;  %1905 = vmatpush1.bf16.msra.mxu0 %v7486_v32 }
 0x157   :  { %1906 = vmatprep.subr.bf16.mxu0 %v7494_v33  ;;  %2242 = vmatmul.mubr.bf16.gmra.mrb[32].mxu1 %v7572_v59 }
 0x158   :  { %2251 = vmatprep.mubr.bf16.mxu1 %v8969_v29 }
 0x15a   :  { %1907 = vmatpush1.bf16.msra.mxu0 %v7492_v35 }
 0x15b   :  { %2069 = vmatprep.subr.bf16.mxu0 %v9089_v39  ;;  %v7467_v39 = vld [vmem:[#allocation2 + $0x270] ss:$28 sps:$4 sm:$0xff]  }
 0x15d   :  { %1796 = vmatmul.mubr.bf16.gmra.mrb[32].mxu0 %v7449_v36 }
 0x15e   :  { %1805 = vmatprep.mubr.bf16.mxu0 %v7453_v37 }
 0x15f   :  { %2252 = vmatmul.mubr.bf16.gmra.mrb[36].mxu1 %v7576_v2  ;;  %v7583_v2 = vld [vmem:[#allocation7] ss:$16 sps:$4 sm:$0xff]  }
 0x165   :  { %1806 = vmatmul.mubr.bf16.gmra.mrb[36].mxu0 %v7455_v41  ;;  %v7580_v41 = vld [vmem:[#allocation2 + $0xc0] ss:$28 sps:$4 sm:$0xff]  }
 0x166   :  { %1815 = vmatprep.mubr.bf16.mxu0 %v7459_v42 }
 0x16d   :  { %1816 = vmatmul.mubr.bf16.gmra.mrb[40].mxu0 %v7461_v44 }
 0x16e   :  { %1825 = vmatprep.mubr.bf16.mxu0 %v7465_v45 }
 0x175   :  { %1826 = vmatmul.mubr.bf16.gmra.mrb[44].mxu0 %v7467_v39 }
 0x176   :  { %1835 = vmatprep.mubr.bf16.mxu0 %v7471_v47 }
 0x17d   :  { %1836 = vmatmul.mubr.bf16.gmra.mrb[48].mxu0 %v7473_v49 }
 0x17e   :  { %1845 = vmatprep.mubr.bf16.mxu0 %v7477_v50  ;;  %v7582_v50 = vld [vmem:[#allocation2 + $0x130] ss:$28 sps:$4 sm:$0xff]  }
 0x185   :  { %1846 = vmatmul.mubr.bf16.gmra.mrb[52].mxu0 %v7479_v54 }
 0x186   :  { %1855 = vmatprep.mubr.bf16.mxu0 %v7483_v55 }
 0x18d   :  { %1856 = vmatmul.mubr.bf16.gmra.mrb[56].mxu0 %v7485_v57 }
 0x18e   :  { %1865 = vmatprep.mubr.bf16.mxu0 %v7489_v58 }
 0x195   :  { %1866 = vmatmul.mubr.bf16.gmra.mrb[60].mxu0 %v7491_v63 }
 0x196   :  { %1908 = vmatprep.mubr.bf16.mxu0 %v7497_v0  ;;  %v7585_v0 = vld [vmem:[#allocation7 + $0x4] ss:$16 sps:$4 sm:$0xff]  }
 0x197   :  { %3148 = vmatprep.subr.bf16.mxu1 %v7585_v0  ;;  %v7621_v0 = vld [vmem:[#allocation7 + $0x184] ss:$16 sps:$4 sm:$0xff]  }
 0x198   :  { %3149 = vmatpush1.bf16.msra.mxu1 %v7583_v2  ;;  %v7619_v2 = vld [vmem:[#allocation7 + $0x180] ss:$16 sps:$4 sm:$0xff]  }
 0x19d   :  { %1909 = vmatmul.mubr.bf16.vlgmr.msra.gmra.mrb[0].mxu0 %v7495_v3 }
 0x19e   :  { %2070 = vmatpush1.bf16.msra.mxu0 %v9087_v38  ;;  %1918 = vmatprep.mubr.bf16.mxu0 %v7501_v4  ;;  %v7512_v38 = vld [vmem:[#allocation2 + $0xb8] ss:$28 sps:$4 sm:$0xff]  }
 0x19f   :  { %2071 = vmatprep.subr.bf16.mxu0 %v9095_v53  ;;  %v7521_v53 = vld [vmem:[#allocation2 + $0xf0] ss:$28 sps:$4 sm:$0xff]  }
 0x1a2   :  { %2072 = vmatpush1.bf16.msra.mxu0 %v9093_v52  ;;  %v7518_v52 = vld [vmem:[#allocation2 + $0xf4] ss:$28 sps:$4 sm:$0xff]  }
 0x1a3   :  { %2073 = vmatprep.subr.bf16.mxu0 %v9099_v60  ;;  %v7527_v60 = vld [vmem:[#allocation2 + $0x12c] ss:$28 sps:$4 sm:$0xff]  }
 0x1a5   :  { %1919 = vmatmul.mubr.bf16.gmra.mrb[4].mxu0 %v7503_v5 }
 0x1a6   :  { %1928 = vmatprep.mubr.bf16.mxu0 %v7504_v9  ;;  %2074 = vmatpush1.bf16.msra.mxu0 %v9101_v61  ;;  %v7530_v61 = vld [vmem:[#allocation2 + $0x128] ss:$28 sps:$4 sm:$0xff]  }
 0x1a7   :  { %2075 = vmatprep.subr.bf16.mxu0 %v9103_v62  ;;  %v7536_v62 = vld [vmem:[#allocation2 + $0x164] ss:$28 sps:$4 sm:$0xff]  }
 0x1a8   :  { %v7588_v9 = vld [vmem:[#allocation7 + $0x24] ss:$16 sps:$4 sm:$0xff]  }
 0x1a9   :  { %3150 = vmatprep.subr.bf16.mxu1 %v7588_v9  ;;  %v7624_v9 = vld [vmem:[#allocation7 + $0x1a4] ss:$16 sps:$4 sm:$0xff]  }
 0x1aa   :  { %2076 = vmatpush1.bf16.msra.mxu0 %v9107_v1  ;;  %v7539_v1 = vld [vmem:[#allocation2 + $0x160] ss:$28 sps:$4 sm:$0xff]  }
 0x1ab   :  { %2077 = vmatprep.subr.bf16.mxu0 %v9111_v6  ;;  %v7541_v6 = vld [vmem:[#allocation2 + $0x19c] ss:$28 sps:$4 sm:$0xff]  }
 0x1ad   :  { %1929 = vmatmul.mubr.bf16.gmra.mrb[8].mxu0 %v7506_v10  ;;  %v7586_v10 = vld [vmem:[#allocation7 + $0x20] ss:$16 sps:$4 sm:$0xff]  }
 0x1ae   :  { %1938 = vmatprep.mubr.bf16.mxu0 %v7510_v12  ;;  %2078 = vmatpush1.bf16.msra.mxu0 %v9113_v7  ;;  %v7543_v7 = vld [vmem:[#allocation2 + $0x198] ss:$28 sps:$4 sm:$0xff]  }
 0x1af   :  { %2079 = vmatprep.subr.bf16.mxu0 %v9115_v8  ;;  %v7545_v8 = vld [vmem:[#allocation2 + $0x1d4] ss:$28 sps:$4 sm:$0xff]   ;;  %3151 = vmatpush1.bf16.msra.mxu1 %v7586_v10 }
 0x1b0   :  { %v7591_v12 = vld [vmem:[#allocation7 + $0x44] ss:$16 sps:$4 sm:$0xff]   ;;  %v7622_v10 = vld [vmem:[#allocation7 + $0x1a0] ss:$16 sps:$4 sm:$0xff]  }
 0x1b1   :  { %3152 = vmatprep.subr.bf16.mxu1 %v7591_v12  ;;  %v344_v12 = vlaneseq }
 0x1b2   :  { %2080 = vmatpush1.bf16.msra.mxu0 %v9119_v11  ;;  %v7547_v11 = vld [vmem:[#allocation2 + $0x1d0] ss:$28 sps:$4 sm:$0xff]  }
 0x1b3   :  { %2081 = vmatprep.subr.bf16.mxu0 %v9123_v16  ;;  %v7555_v16 = vld [vmem:[#allocation2 + $0x240] ss:$28 sps:$4 sm:$0xff]  }
 0x1b5   :  { %1939 = vmatmul.mubr.bf16.gmra.mrb[12].mxu0 %v7512_v38 }
 0x1b6   :  { %1948 = vmatprep.mubr.bf16.mxu0 %v7518_v52  ;;  %2082 = vmatpush1.bf16.msra.mxu0 %v9125_v17  ;;  %v7557_v17 = vld [vmem:[#allocation2 + $0x27c] ss:$28 sps:$4 sm:$0xff]   ;;  %v7589_v52 = vld [vmem:[#allocation7 + $0x40] ss:$16 sps:$4 sm:$0xff]  }
 0x1b7   :  { %2083 = vmatprep.subr.bf16.mxu0 %v9127_v18  ;;  %v7559_v18 = vld [vmem:[#allocation2 + $0x278] ss:$28 sps:$4 sm:$0xff]   ;;  %3153 = vmatpush1.bf16.msra.mxu1 %v7589_v52 }
 0x1b8   :  { %v7627_v52 = vld [vmem:[#allocation7 + $0x1c4] ss:$16 sps:$4 sm:$0xff]  }
 0x1ba   :  { %2084 = vmatpush1.bf16.msra.mxu0 %v9131_v21  ;;  %v7565_v21 = vld [vmem:[#allocation2 + $0x2ec] ss:$28 sps:$4 sm:$0xff]  }
 0x1bd   :  { %1949 = vmatmul.mubr.bf16.gmra.mrb[16].mxu0 %v7521_v53 }
 0x1be   :  { %1958 = vmatprep.mubr.bf16.mxu0 %v7527_v60 }
 0x1c5   :  { %1959 = vmatmul.mubr.bf16.gmra.mrb[20].mxu0 %v7530_v61 }
 0x1c6   :  { %1968 = vmatprep.mubr.bf16.mxu0 %v7536_v62  ;;  %v7594_v62 = vld [vmem:[#allocation7 + $0x64] ss:$16 sps:$4 sm:$0xff]  }
 0x1c7   :  { %3154 = vmatprep.subr.bf16.mxu1 %v7594_v62  ;;  %v7625_v62 = vld [vmem:[#allocation7 + $0x1c0] ss:$16 sps:$4 sm:$0xff]  }
 0x1cd   :  { %1969 = vmatmul.mubr.bf16.gmra.mrb[24].mxu0 %v7539_v1  ;;  %v7592_v1 = vld [vmem:[#allocation7 + $0x60] ss:$16 sps:$4 sm:$0xff]  }
 0x1ce   :  { %1978 = vmatprep.mubr.bf16.mxu0 %v7541_v6  ;;  %3155 = vmatpush1.bf16.msra.mxu1 %v7592_v1  ;;  %v9247_v1 = vshrl.u32 %v344_v12, 7 }
 0x1d0   :  { %10880 = vst [vmem:[#allocation16_spill] sm:$0xff] %v9247_v1 }
 0x1d5   :  { %1979 = vmatmul.mubr.bf16.gmra.mrb[28].mxu0 %v7543_v7  ;;  %v7597_v7 = vld [vmem:[#allocation7 + $0x84] ss:$16 sps:$4 sm:$0xff]  }
 0x1d6   :  { %1988 = vmatprep.mubr.bf16.mxu0 %v7545_v8  ;;  %v7595_v8 = vld [vmem:[#allocation7 + $0x80] ss:$16 sps:$4 sm:$0xff]   ;;  %3156 = vmatprep.subr.bf16.mxu1 %v7597_v7  ;;  %v7630_v7 = vld [vmem:[#allocation7 + $0x1e4] ss:$16 sps:$4 sm:$0xff]  }
 0x1d7   :  { %3157 = vmatpush1.bf16.msra.mxu1 %v7595_v8  ;;  %v7628_v8 = vld [vmem:[#allocation7 + $0x1e0] ss:$16 sps:$4 sm:$0xff]  }
 0x1db   :  { %v9163_v30 = vpop.f32.mrb[0].mxu1 }
 0x1dc   :  { %v9165_v31 = vpop.f32.mrb[1].mxu1 }
 0x1dd   :  { %1989 = vmatmul.mubr.bf16.gmra.mrb[32].mxu0 %v7547_v11  ;;  %v9167_v32 = vpop.f32.mrb[2].mxu1 }
 0x1de   :  { %1998 = vmatprep.mubr.bf16.mxu0 %v7549_v13  ;;  %v9170_v33 = vpop.f32.mrb[3].mxu1 }
 0x1e5   :  { %1999 = vmatmul.mubr.bf16.gmra.mrb[36].mxu0 %v7551_v14 }
 0x1e6   :  { %2008 = vmatprep.mubr.bf16.mxu0 %v7553_v15  ;;  %v7600_v15 = vld [vmem:[#allocation7 + $0xa4] ss:$16 sps:$4 sm:$0xff]  }
 0x1e7   :  { %3158 = vmatprep.subr.bf16.mxu1 %v7600_v15  ;;  %v9250_v15 = vsub.s32 0, %v9247_v1 }
 0x1ed   :  { %2009 = vmatmul.mubr.bf16.gmra.mrb[40].mxu0 %v7555_v16  ;;  %v7598_v16 = vld [vmem:[#allocation7 + $0xa0] ss:$16 sps:$4 sm:$0xff]  }
 0x1ee   :  { %2018 = vmatprep.mubr.bf16.mxu0 %v7557_v17  ;;  %3159 = vmatpush1.bf16.msra.mxu1 %v7598_v16  ;;  %v342_v16 = vld [vmem:[%s10868_s2] sm:$0x3] }
 0x1f2   :  { %v9172_v35 = vpop.f32.mrb[4].mxu1 }
 0x1f3   :  { %v9174_v36 = vpop.f32.mrb[5].mxu1 }
 0x1f4   :  { %v9176_v37 = vpop.f32.mrb[6].mxu1 }
 0x1f5   :  { %2019 = vmatmul.mubr.bf16.gmra.mrb[44].mxu0 %v7559_v18  ;;  %v9179_v40 = vpop.f32.mrb[7].mxu1  ;;  %v7603_v18 = vld [vmem:[#allocation7 + $0xc4] ss:$16 sps:$4 sm:$0xff]  }
 0x1f6   :  { %2028 = vmatprep.mubr.bf16.mxu0 %v7561_v19  ;;  %3160 = vmatprep.subr.bf16.mxu1 %v7603_v18  ;;  %v9256_v18 = vsub.s32 1, %v9247_v1 }
 0x1f8   :  { %10881 = vst [vmem:[#allocation17_spill] sm:$0xff] %v9256_v18 }
 0x1fa   :  { %v9181_v42 = vpop.f32.mrb[8].mxu1 }
 0x1fb   :  { %v9183_v43 = vpop.f32.mrb[9].mxu1 }
 0x1fc   :  { %v9185_v44 = vpop.f32.mrb[10].mxu1 }
 0x1fd   :  { %2029 = vmatmul.mubr.bf16.gmra.mrb[48].mxu0 %v7563_v20  ;;  %v9188_v45 = vpop.f32.mrb[11].mxu1  ;;  %v7601_v20 = vld [vmem:[#allocation7 + $0xc0] ss:$16 sps:$4 sm:$0xff]  }
 0x1fe   :  { %2038 = vmatprep.mubr.bf16.mxu0 %v7565_v21  ;;  %3161 = vmatpush1.bf16.msra.mxu1 %v7601_v20  ;;  %v9259_v20 = vrot.slane %v342_v16, %v9250_v15 }
 0x202   :  { %v9190_v39 = vpop.f32.mrb[12].mxu1 }
 0x203   :  { %v9192_v47 = vpop.f32.mrb[13].mxu1 }
 0x204   :  { %v9194_v48 = vpop.f32.mrb[14].mxu1 }
 0x205   :  { %2039 = vmatmul.mubr.bf16.gmra.mrb[52].mxu0 %v7567_v22  ;;  %v9197_v49 = vpop.f32.mrb[15].mxu1 }
 0x206   :  { %2048 = vmatprep.mubr.bf16.mxu0 %v7569_v23  ;;  %v7606_v23 = vld [vmem:[#allocation7 + $0xe4] ss:$16 sps:$4 sm:$0xff]  }
 0x207   :  { %3162 = vmatprep.subr.bf16.mxu1 %v7606_v23  ;;  %v9262_v23 = vrot.slane %v342_v16, %v9256_v18 }
 0x20a   :  { %v9199_v51 = vpop.f32.mrb[16].mxu1 }
 0x20b   :  { %v9201_v54 = vpop.f32.mrb[17].mxu1 }
 0x20c   :  { %v9203_v55 = vpop.f32.mrb[18].mxu1 }
 0x20d   :  { %2049 = vmatmul.mubr.bf16.gmra.mrb[56].mxu0 %v7571_v24  ;;  %v9205_v56 = vpop.f32.mrb[19].mxu1  ;;  %v7604_v24 = vld [vmem:[#allocation7 + $0xe0] ss:$16 sps:$4 sm:$0xff]  }
 0x20e   :  { %2058 = vmatprep.mubr.bf16.mxu0 %v7573_v25  ;;  %3163 = vmatpush1.bf16.msra.mxu1 %v7604_v24  ;;  %v7609_v25 = vld [vmem:[#allocation7 + $0x104] ss:$16 sps:$4 sm:$0xff]  }
 0x20f   :  { %3164 = vmatprep.subr.bf16.mxu1 %v7609_v25 }
 0x212   :  { %v9207_v57 = vpop.f32.mrb[20].mxu1 }
 0x213   :  { %v9209_v58 = vpop.f32.mrb[21].mxu1 }
 0x214   :  { %v9211_v59 = vpop.f32.mrb[22].mxu1 }
 0x215   :  { %2059 = vmatmul.mubr.bf16.gmra.mrb[60].mxu0 %v7575_v26  ;;  %v9213_v63 = vpop.f32.mrb[23].mxu1  ;;  %v7607_v26 = vld [vmem:[#allocation7 + $0x100] ss:$16 sps:$4 sm:$0xff]  }
 0x216   :  { %2101 = vmatprep.mubr.bf16.mxu0 %v8969_v29  ;;  %3165 = vmatpush1.bf16.msra.mxu1 %v7607_v26 }
 0x21d   :  { %2102 = vmatmul.mubr.bf16.vlgmr.msra.gmra.mrb[0].mxu0 %v7577_v27  ;;  %v7612_v27 = vld [vmem:[#allocation7 + $0x124] ss:$16 sps:$4 sm:$0xff]  }
 0x21e   :  { %2111 = vmatprep.mubr.bf16.mxu0 %v8969_v29  ;;  %3166 = vmatprep.subr.bf16.mxu1 %v7612_v27 }
 0x225   :  { %2112 = vmatmul.mubr.bf16.gmra.mrb[4].mxu0 %v7578_v28  ;;  %v7610_v28 = vld [vmem:[#allocation7 + $0x120] ss:$16 sps:$4 sm:$0xff]  }
 0x226   :  { %2121 = vmatprep.mubr.bf16.mxu0 %v8969_v29  ;;  %3167 = vmatpush1.bf16.msra.mxu1 %v7610_v28 }
 0x22d   :  { %2122 = vmatmul.mubr.bf16.gmra.mrb[8].mxu0 %v7579_v34  ;;  %v7615_v34 = vld [vmem:[#allocation7 + $0x144] ss:$16 sps:$4 sm:$0xff]  }
 0x22e   :  { %2131 = vmatprep.mubr.bf16.mxu0 %v8969_v29  ;;  %3168 = vmatprep.subr.bf16.mxu1 %v7615_v34 }
 0x235   :  { %2132 = vmatmul.mubr.bf16.gmra.mrb[12].mxu0 %v7580_v41  ;;  %v7613_v41 = vld [vmem:[#allocation7 + $0x140] ss:$16 sps:$4 sm:$0xff]  }
 0x236   :  { %2141 = vmatprep.mubr.bf16.mxu0 %v8969_v29  ;;  %3169 = vmatpush1.bf16.msra.mxu1 %v7613_v41 }
 0x23d   :  { %2142 = vmatmul.mubr.bf16.gmra.mrb[16].mxu0 %v7581_v46  ;;  %v7618_v46 = vld [vmem:[#allocation7 + $0x164] ss:$16 sps:$4 sm:$0xff]  }
 0x23e   :  { %2151 = vmatprep.mubr.bf16.mxu0 %v8969_v29  ;;  %v9215_v29 = vpop.f32.mrb[24].mxu1  ;;  %3170 = vmatprep.subr.bf16.mxu1 %v7618_v46 }
 0x23f   :  { %v9217_v3 = vpop.f32.mrb[25].mxu1 }
 0x240   :  { %v9219_v4 = vpop.f32.mrb[26].mxu1 }
 0x241   :  { %v9221_v5 = vpop.f32.mrb[27].mxu1 }
 0x242   :  { %v9223_v38 = vpop.f32.mrb[28].mxu1 }
 0x243   :  { %v9225_v53 = vpop.f32.mrb[29].mxu1 }
 0x244   :  { %v9227_v60 = vpop.f32.mrb[30].mxu1 }
 0x245   :  { %2152 = vmatmul.mubr.bf16.gmra.mrb[20].mxu0 %v7582_v50  ;;  %v9229_v61 = vpop.f32.mrb[31].mxu1  ;;  %v7616_v50 = vld [vmem:[#allocation7 + $0x160] ss:$16 sps:$4 sm:$0xff]  }
 0x246   :  { %v9231_v6 = vpop.f32.mrb[32].mxu1  ;;  %3171 = vmatpush1.bf16.msra.mxu1 %v7616_v50 }
 0x247   :  { %v9233_v11 = vpop.f32.mrb[33].mxu1  ;;  %3172 = vmatprep.subr.bf16.mxu1 %v7621_v0 }
 0x248   :  { %v9235_v13 = vpop.f32.mrb[34].mxu1 }
 0x249   :  { %v9237_v14 = vpop.f32.mrb[35].mxu1 }
 0x24a   :  { %v9239_v17 = vpop.f32.mrb[36].mxu1  ;;  %3173 = vmatpush1.bf16.msra.mxu1 %v7619_v2 }
 0x24b   :  { %v9241_v19 = vpop.f32.mrb[37].mxu1  ;;  %3174 = vmatprep.subr.bf16.mxu1 %v7624_v9 }
 0x24c   :  { %v9243_v21 = vpop.f32.mrb[38].mxu1 }
 0x24d   :  { %v9245_v22 = vpop.f32.mrb[39].mxu1 }
 0x24e   :  { %3175 = vmatpush1.bf16.msra.mxu1 %v7622_v10 }
 0x24f   :  { %3176 = vmatprep.subr.bf16.mxu1 %v7627_v52 }
 0x252   :  { %3177 = vmatpush1.bf16.msra.mxu1 %v7625_v62 }
 0x253   :  { %3178 = vmatprep.subr.bf16.mxu1 %v7630_v7 }
 0x256   :  { %3179 = vmatpush1.bf16.msra.mxu1 %v7628_v8 }
 0x2a0   :  { %v1970_v24 = vpop.f32.mrb[24].mxu0 }
 0x2a1   :  { %v6880_v25 = vadd.f32 %v1970_v24, %v9259_v20  ;;  %v1972_v26 = vpop.f32.mrb[25].mxu0 }
 0x2a2   :  { %v6882_v27 = vadd.f32 %v1972_v26, %v9262_v23  ;;  %v1974_v28 = vpop.f32.mrb[26].mxu0 }
 0x2a3   :  { %v6884_v34 = vadd.f32 %v1974_v28, %v9259_v20  ;;  %v9268_v41 = vadd.f32 %v6880_v25, %v9163_v30  ;;  %v1976_v46 = vpop.f32.mrb[27].mxu0 }
 0x2a4   :  { %v6886_v50 = vadd.f32 %v1976_v46, %v9262_v23  ;;  %v9272_v0 = vadd.f32 %v6882_v27, %v9165_v31 }
 0x2a5   :  { %v6351_v2 = vmul.f32 -1.442695, %v9268_v41  ;;  %v9276_v9 = vadd.f32 %v6884_v34, %v9167_v32 }
 0x2a6   :  { %v6352_v10 = vmul.f32 -1.442695, %v9272_v0  ;;  %v9280_v12 = vadd.f32 %v6886_v50, %v9170_v33 }
 0x2a7   :  { %7791 = vpow2.f32 %v6351_v2  ;;  %v6353_v30 = vmul.f32 -1.442695, %v9276_v9 }
 0x2a8   :  { %7793 = vpow2.f32 %v6352_v10  ;;  %v6354_v52 = vmul.f32 -1.442695, %v9280_v12  ;;  %v1980_v62 = vpop.f32.mrb[28].mxu0 }
 0x2a9   :  { %7795 = vpow2.f32 %v6353_v30  ;;  %v6888_v31 = vadd.f32 %v1980_v62, %v9259_v20  ;;  %v1982_v7 = vpop.f32.mrb[29].mxu0 }
 0x2aa   :  { %7797 = vpow2.f32 %v6354_v52  ;;  %v6890_v32 = vadd.f32 %v1982_v7, %v9262_v23  ;;  %v1984_v8 = vpop.f32.mrb[30].mxu0 }
 0x2ab   :  { %v6892_v16 = vadd.f32 %v1984_v8, %v9259_v20  ;;  %v9288_v33 = vadd.f32 %v6888_v31, %v9172_v35  ;;  %v1986_v24 = vpop.f32.mrb[31].mxu0 }
 0x2ac   :  { %v6894_v25 = vadd.f32 %v1986_v24, %v9262_v23  ;;  %v9292_v26 = vadd.f32 %v6890_v32, %v9174_v36 }
 0x2ad   :  { %v6355_v27 = vmul.f32 -1.442695, %v9288_v33  ;;  %v9296_v28 = vadd.f32 %v6892_v16, %v9176_v37 }
 0x2ae   :  { %v6356_v34 = vmul.f32 -1.442695, %v9292_v26  ;;  %v9300_v46 = vadd.f32 %v6894_v25, %v9179_v40 }
 0x2af   :  { %7799 = vpow2.f32 %v6355_v27  ;;  %v6357_v35 = vmul.f32 -1.442695, %v9296_v28 }
 0x2b0   :  { %7801 = vpow2.f32 %v6356_v34  ;;  %v6358_v50 = vmul.f32 -1.442695, %v9300_v46  ;;  %v1990_v2 = vpop.f32.mrb[32].mxu0 }
 0x2b1   :  { %v7792_v10 = vpop.eup %7791  ;;  %7803 = vpow2.f32 %v6357_v35  ;;  %v6896_v36 = vadd.f32 %v1990_v2, %v9259_v20  ;;  %v1992_v30 = vpop.f32.mrb[33].mxu0 }
 0x2b2   :  { %v7794_v52 = vpop.eup %7793  ;;  %v2478_v37 = vadd.f32 1.0, %v7792_v10  ;;  %7805 = vpow2.f32 %v6358_v50  ;;  %v6898_v62 = vadd.f32 %v1992_v30, %v9262_v23  ;;  %v1994_v31 = vpop.f32.mrb[34].mxu0 }
 0x2b3   :  { %v7796_v40 = vpop.eup %7795  ;;  %v2479_v7 = vadd.f32 1.0, %v7794_v52  ;;  %v6900_v32 = vadd.f32 %v1994_v31, %v9259_v20  ;;  %v9308_v8 = vadd.f32 %v6896_v36, %v9181_v42  ;;  %v1996_v16 = vpop.f32.mrb[35].mxu0 }
 0x2b4   :  { %v7798_v24 = vpop.eup %7797  ;;  %7807 = vrcp.f32 %v2478_v37  ;;  %v2480_v25 = vadd.f32 1.0, %v7796_v40  ;;  %v6902_v27 = vadd.f32 %v1996_v16, %v9262_v23  ;;  %v9312_v34 = vadd.f32 %v6898_v62, %v9183_v43 }
 0x2b5   :  { %7809 = vrcp.f32 %v2479_v7  ;;  %v2481_v35 = vadd.f32 1.0, %v7798_v24  ;;  %v6359_v50 = vmul.f32 -1.442695, %v9308_v8  ;;  %v9316_v2 = vadd.f32 %v6900_v32, %v9185_v44  ;;  %v7633_v44 = vld [vmem:[#allocation7 + $0xc] ss:$16 sps:$4 sm:$0xff]  }
 0x2b6   :  { %7811 = vrcp.f32 %v2480_v25  ;;  %v6360_v42 = vmul.f32 -1.442695, %v9312_v34  ;;  %v9320_v10 = vadd.f32 %v6902_v27, %v9188_v45  ;;  %3341 = vmatprep.subr.bf16.mxu1 %v7633_v44 }
 0x2b7   :  { %7813 = vrcp.f32 %v2481_v35  ;;  %v6361_v36 = vmul.f32 -1.442695, %v9316_v2 }
 0x2b8   :  { %7815 = vpow2.f32 %v6359_v50  ;;  %v6362_v43 = vmul.f32 -1.442695, %v9320_v10  ;;  %v2000_v30 = vpop.f32.mrb[36].mxu0 }
 0x2b9   :  { %v7800_v52 = vpop.eup %7799  ;;  %7817 = vpow2.f32 %v6360_v42  ;;  %v6904_v37 = vadd.f32 %v2000_v30, %v9259_v20  ;;  %v2002_v62 = vpop.f32.mrb[37].mxu0 }
 0x2ba   :  { %v7802_v31 = vpop.eup %7801  ;;  %v2482_v40 = vadd.f32 1.0, %v7800_v52  ;;  %7819 = vpow2.f32 %v6361_v36  ;;  %v6906_v7 = vadd.f32 %v2002_v62, %v9262_v23  ;;  %v2004_v45 = vpop.f32.mrb[38].mxu0 }
 0x2bb   :  { %v7804_v32 = vpop.eup %7803  ;;  %v2483_v16 = vadd.f32 1.0, %v7802_v31  ;;  %7821 = vpow2.f32 %v6362_v43  ;;  %v6908_v24 = vadd.f32 %v2004_v45, %v9259_v20  ;;  %v9328_v25 = vadd.f32 %v6904_v37, %v9190_v39  ;;  %v2006_v27 = vpop.f32.mrb[39].mxu0 }
 0x2bc   :  { %v7806_v35 = vpop.eup %7805  ;;  %7823 = vrcp.f32 %v2482_v40  ;;  %v2484_v50 = vadd.f32 1.0, %v7804_v32  ;;  %v6910_v42 = vadd.f32 %v2006_v27, %v9262_v23  ;;  %v9332_v36 = vadd.f32 %v6906_v7, %v9192_v47 }
 0x2bd   :  { %7825 = vrcp.f32 %v2483_v16  ;;  %v2485_v30 = vadd.f32 1.0, %v7806_v35  ;;  %v6363_v52 = vmul.f32 -1.442695, %v9328_v25  ;;  %v9336_v43 = vadd.f32 %v6908_v24, %v9194_v48 }
 0x2be   :  { %v7808_v62 = vpop.eup %7807  ;;  %7827 = vrcp.f32 %v2484_v50  ;;  %v6364_v39 = vmul.f32 -1.442695, %v9332_v36  ;;  %v9340_v37 = vadd.f32 %v6910_v42, %v9197_v49 }
 0x2bf   :  { %v7810_v44 = vpop.eup %7809  ;;  %7829 = vrcp.f32 %v2485_v30  ;;  %v6365_v31 = vmul.f32 -1.442695, %v9336_v43  ;;  %v2670_v48 = vmul.f32 %v7808_v62, %v9268_v41 }
 0x2c0   :  { %v7812_v47 = vpop.eup %7811  ;;  %7831 = vpow2.f32 %v6363_v52  ;;  %v6366_v40 = vmul.f32 -1.442695, %v9340_v37  ;;  %v2010_v7 = vpop.f32.mrb[40].mxu0  ;;  %v2671_v32 = vmul.f32 %v7810_v44, %v9272_v0 }
 0x2c1   :  { %v7814_v45 = vpop.eup %7813  ;;  %7833 = vpow2.f32 %v6364_v39  ;;  %v6912_v16 = vadd.f32 %v2010_v7, %v9259_v20  ;;  %v2012_v24 = vpop.f32.mrb[41].mxu0  ;;  %v2672_v27 = vmul.f32 %v7812_v47, %v9276_v9 }
 0x2c2   :  { %v7816_v49 = vpop.eup %7815  ;;  %v2673_v35 = vmul.f32 %v7814_v45, %v9280_v12  ;;  %7835 = vpow2.f32 %v6365_v31  ;;  %v6914_v50 = vadd.f32 %v2012_v24, %v9262_v23  ;;  %v2014_v42 = vpop.f32.mrb[42].mxu0 }
 0x2c3   :  { %v7818_v30 = vpop.eup %7817  ;;  %v2486_v52 = vadd.f32 1.0, %v7816_v49  ;;  %7837 = vpow2.f32 %v6366_v40  ;;  %v6916_v41 = vadd.f32 %v2014_v42, %v9259_v20  ;;  %v9352_v0 = vadd.f32 %v6912_v16, %v9199_v51  ;;  %v2016_v62 = vpop.f32.mrb[43].mxu0 }
 0x2c4   :  { %v7820_v39 = vpop.eup %7819  ;;  %v2487_v44 = vadd.f32 1.0, %v7818_v30  ;;  %v6918_v7 = vadd.f32 %v2016_v62, %v9262_v23  ;;  %v9356_v9 = vadd.f32 %v6914_v50, %v9201_v54  ;;  %v9358_v12 = vpack.c.bf16 %v2673_v35, %v2671_v32 }
 0x2c5   :  { %v7822_v31 = vpop.eup %7821  ;;  %7839 = vrcp.f32 %v2486_v52  ;;  %v2488_v47 = vadd.f32 1.0, %v7820_v39  ;;  %v6367_v40 = vmul.f32 -1.442695, %v9352_v0  ;;  %v9362_v45 = vadd.f32 %v6916_v41, %v9203_v55 }
 0x2c6   :  { %v7824_v51 = vpop.eup %7823  ;;  %7841 = vrcp.f32 %v2487_v44  ;;  %v2489_v16 = vadd.f32 1.0, %v7822_v31  ;;  %v6368_v24 = vmul.f32 -1.442695, %v9356_v9  ;;  %v9366_v49 = vadd.f32 %v6918_v7, %v9205_v56 }
 0x2c7   :  { %v7826_v54 = vpop.eup %7825  ;;  %7843 = vrcp.f32 %v2488_v47  ;;  %v6369_v32 = vmul.f32 -1.442695, %v9362_v45  ;;  %v9369_v35 = vpack.c.bf16 %v2672_v27, %v2670_v48  ;;  %v2674_v52 = vmul.f32 %v7824_v51, %v9288_v33 }
 0x2c8   :  { %v7828_v50 = vpop.eup %7827  ;;  %7845 = vrcp.f32 %v2489_v16  ;;  %v6370_v42 = vmul.f32 -1.442695, %v9366_v49  ;;  %v2020_v55 = vpop.f32.mrb[44].mxu0  ;;  %v2675_v41 = vmul.f32 %v7826_v54, %v9292_v26 }
 0x2c9   :  { %v7830_v30 = vpop.eup %7829  ;;  %7847 = vpow2.f32 %v6367_v40  ;;  %v6920_v56 = vadd.f32 %v2020_v55, %v9259_v20  ;;  %v2022_v62 = vpop.f32.mrb[45].mxu0  ;;  %v2676_v44 = vmul.f32 %v7828_v50, %v9296_v28 }
 0x2ca   :  { %v7832_v39 = vpop.eup %7831  ;;  %v2677_v48 = vmul.f32 %v7830_v30, %v9300_v46  ;;  %7849 = vpow2.f32 %v6368_v24  ;;  %v6922_v27 = vadd.f32 %v2022_v62, %v9262_v23  ;;  %v2024_v7 = vpop.f32.mrb[46].mxu0 }
 0x2cb   :  { %v7834_v31 = vpop.eup %7833  ;;  %v2490_v47 = vadd.f32 1.0, %v7832_v39  ;;  %7851 = vpow2.f32 %v6369_v32  ;;  %v6924_v33 = vadd.f32 %v2024_v7, %v9259_v20  ;;  %v9380_v26 = vadd.f32 %v6920_v56, %v9207_v57  ;;  %v2026_v40 = vpop.f32.mrb[47].mxu0 }
 0x2cc   :  { %v7836_v51 = vpop.eup %7835  ;;  %v2491_v16 = vadd.f32 1.0, %v7834_v31  ;;  %7853 = vpow2.f32 %v6370_v42  ;;  %v6926_v28 = vadd.f32 %v2026_v40, %v9262_v23  ;;  %v9384_v46 = vadd.f32 %v6922_v27, %v9209_v58 }
 0x2cd   :  { %v7838_v24 = vpop.eup %7837  ;;  %7855 = vrcp.f32 %v2490_v47  ;;  %v2492_v54 = vadd.f32 1.0, %v7836_v51  ;;  %v6371_v50 = vmul.f32 -1.442695, %v9380_v26  ;;  %v9388_v32 = vadd.f32 %v6924_v33, %v9211_v59 }
 0x2ce   :  { %7857 = vrcp.f32 %v2491_v16  ;;  %v2493_v57 = vadd.f32 1.0, %v7838_v24  ;;  %v6372_v55 = vmul.f32 -1.442695, %v9384_v46  ;;  %v9392_v30 = vadd.f32 %v6926_v28, %v9213_v63 }
 0x2cf   :  { %v7840_v42 = vpop.eup %7839  ;;  %7859 = vrcp.f32 %v2492_v54  ;;  %v6373_v58 = vmul.f32 -1.442695, %v9388_v32  ;;  %v9395_v56 = vpack.c.bf16 %v2677_v48, %v2675_v41  ;;  %v9397_v62 = vpack.c.bf16 %v2676_v44, %v2674_v52 }
 0x2d0   :  { %v7842_v39 = vpop.eup %7841  ;;  %7861 = vrcp.f32 %v2493_v57  ;;  %v6374_v59 = vmul.f32 -1.442695, %v9392_v30  ;;  %v2030_v27 = vpop.f32.mrb[48].mxu0  ;;  %v2678_v57 = vmul.f32 %v7840_v42, %v9308_v8 }
 0x2d1   :  { %v7844_v7 = vpop.eup %7843  ;;  %7863 = vpow2.f32 %v6371_v50  ;;  %v6928_v31 = vadd.f32 %v2030_v27, %v9259_v20  ;;  %v2032_v47 = vpop.f32.mrb[49].mxu0  ;;  %v2679_v33 = vmul.f32 %v7842_v39, %v9312_v34 }
 0x2d2   :  { %v7846_v63 = vpop.eup %7845  ;;  %v2680_v40 = vmul.f32 %v7844_v7, %v9316_v2  ;;  %7865 = vpow2.f32 %v6372_v55  ;;  %v6930_v41 = vadd.f32 %v2032_v47, %v9262_v23  ;;  %v2034_v52 = vpop.f32.mrb[50].mxu0 }
 0x2d3   :  { %v7848_v44 = vpop.eup %7847  ;;  %v2681_v48 = vmul.f32 %v7846_v63, %v9320_v10  ;;  %7867 = vpow2.f32 %v6373_v58  ;;  %v6932_v51 = vadd.f32 %v2034_v52, %v9259_v20  ;;  %v9407_v16 = vadd.f32 %v6928_v31, %v9215_v29  ;;  %v2036_v28 = vpop.f32.mrb[51].mxu0 }
 0x2d4   :  { %v7850_v24 = vpop.eup %7849  ;;  %v2494_v54 = vadd.f32 1.0, %v7848_v44  ;;  %7869 = vpow2.f32 %v6374_v59  ;;  %v6934_v34 = vadd.f32 %v2036_v28, %v9262_v23  ;;  %v9411_v2 = vadd.f32 %v6930_v41, %v9217_v3 }
 0x2d5   :  { %v7852_v50 = vpop.eup %7851  ;;  %v2495_v55 = vadd.f32 1.0, %v7850_v24  ;;  %v9415_v10 = vadd.f32 %v6932_v51, %v9219_v4  ;;  %v9417_v58 = vpack.c.bf16 %v2681_v48, %v2679_v33  ;;  %v6375_v27 = vmul.f32 -1.442695, %v9407_v16 }
 0x2d6   :  { %v7854_v29 = vpop.eup %7853  ;;  %7871 = vrcp.f32 %v2494_v54  ;;  %v2496_v39 = vadd.f32 1.0, %v7852_v50  ;;  %v9421_v59 = vadd.f32 %v6934_v34, %v9221_v5  ;;  %v6376_v31 = vmul.f32 -1.442695, %v9411_v2 }
 0x2d7   :  { %v7856_v7 = vpop.eup %7855  ;;  %7873 = vrcp.f32 %v2495_v55  ;;  %v2497_v3 = vadd.f32 1.0, %v7854_v29  ;;  %v9424_v8 = vpack.c.bf16 %v2680_v40, %v2678_v57  ;;  %v6377_v4 = vmul.f32 -1.442695, %v9415_v10 }
 0x2d8   :  { %v7858_v42 = vpop.eup %7857  ;;  %7875 = vrcp.f32 %v2496_v39  ;;  %v2040_v47 = vpop.f32.mrb[52].mxu0  ;;  %v6378_v33 = vmul.f32 -1.442695, %v9421_v59  ;;  %v2682_v44 = vmul.f32 %v7856_v7, %v9328_v25 }
 0x2d9   :  { %v7860_v63 = vpop.eup %7859  ;;  %7877 = vrcp.f32 %v2497_v3  ;;  %v6936_v41 = vadd.f32 %v2040_v47, %v9259_v20  ;;  %v2042_v5 = vpop.f32.mrb[53].mxu0  ;;  %v2683_v39 = vmul.f32 %v7858_v42, %v9332_v36 }
 0x2da   :  { %v7862_v52 = vpop.eup %7861  ;;  %v2684_v48 = vmul.f32 %v7860_v63, %v9336_v43  ;;  %7879 = vpow2.f32 %v6375_v27  ;;  %v6938_v40 = vadd.f32 %v2042_v5, %v9262_v23  ;;  %v2044_v51 = vpop.f32.mrb[54].mxu0 }
 0x2db   :  { %v7864_v28 = vpop.eup %7863  ;;  %v2685_v24 = vmul.f32 %v7862_v52, %v9340_v37  ;;  %7881 = vpow2.f32 %v6376_v31  ;;  %v6940_v54 = vadd.f32 %v2044_v51, %v9259_v20  ;;  %v9435_v34 = vadd.f32 %v6936_v41, %v9223_v38  ;;  %v2046_v50 = vpop.f32.mrb[55].mxu0 }
 0x2dc   :  { %v7866_v57 = vpop.eup %7865  ;;  %v2498_v55 = vadd.f32 1.0, %v7864_v28  ;;  %7883 = vpow2.f32 %v6377_v4  ;;  %v6942_v25 = vadd.f32 %v2046_v50, %v9262_v23  ;;  %v9439_v43 = vadd.f32 %v6938_v40, %v9225_v53 }
 0x2dd   :  { %v7868_v29 = vpop.eup %7867  ;;  %v2499_v27 = vadd.f32 1.0, %v7866_v57  ;;  %7885 = vpow2.f32 %v6378_v33  ;;  %v9443_v37 = vadd.f32 %v6940_v54, %v9227_v60  ;;  %v6379_v3 = vmul.f32 -1.442695, %v9435_v34 }
 0x2de   :  { %v7870_v7 = vpop.eup %7869  ;;  %7887 = vrcp.f32 %v2498_v55  ;;  %v2500_v38 = vadd.f32 1.0, %v7868_v29  ;;  %v9447_v31 = vadd.f32 %v6942_v25, %v9229_v61  ;;  %v6380_v53 = vmul.f32 -1.442695, %v9439_v43 }
 0x2df   :  { %7889 = vrcp.f32 %v2499_v27  ;;  %v2501_v4 = vadd.f32 1.0, %v7870_v7  ;;  %v9450_v47 = vpack.c.bf16 %v2685_v24, %v2683_v39  ;;  %v6381_v42 = vmul.f32 -1.442695, %v9443_v37 }
 0x2e0   :  { %v7872_v36 = vpop.eup %7871  ;;  %7891 = vrcp.f32 %v2500_v38  ;;  %v2050_v60 = vpop.f32.mrb[56].mxu0  ;;  %v9453_v63 = vpack.c.bf16 %v2684_v48, %v2682_v44  ;;  %v6382_v41 = vmul.f32 -1.442695, %v9447_v31 }
 0x2e1   :  { %v7874_v33 = vpop.eup %7873  ;;  %7893 = vrcp.f32 %v2501_v4  ;;  %v6944_v61 = vadd.f32 %v2050_v60, %v9259_v20  ;;  %v2052_v5 = vpop.f32.mrb[57].mxu0  ;;  %v2686_v39 = vmul.f32 %v7872_v36, %v9352_v0 }
 0x2e2   :  { %v7876_v52 = vpop.eup %7875  ;;  %v2687_v40 = vmul.f32 %v7874_v33, %v9356_v9  ;;  %7895 = vpow2.f32 %v6379_v3  ;;  %v6946_v51 = vadd.f32 %v2052_v5, %v9262_v23  ;;  %v2054_v28 = vpop.f32.mrb[58].mxu0 }
 0x2e3   :  { %v7878_v24 = vpop.eup %7877  ;;  %v2688_v54 = vmul.f32 %v7876_v52, %v9362_v45  ;;  %7897 = vpow2.f32 %v6380_v53  ;;  %v6948_v44 = vadd.f32 %v2054_v28, %v9259_v20  ;;  %v9462_v48 = vadd.f32 %v6944_v61, %v9231_v6  ;;  %v2056_v50 = vpop.f32.mrb[59].mxu0 }
 0x2e4   :  { %v7880_v57 = vpop.eup %7879  ;;  %v2689_v55 = vmul.f32 %v7878_v24, %v9366_v49  ;;  %7899 = vpow2.f32 %v6381_v42  ;;  %v6950_v9 = vadd.f32 %v2056_v50, %v9262_v23  ;;  %v9467_v25 = vadd.f32 %v6946_v51, %v9233_v11 }
 0x2e5   :  { %v7882_v29 = vpop.eup %7881  ;;  %v2502_v45 = vadd.f32 1.0, %v7880_v57  ;;  %7901 = vpow2.f32 %v6382_v41  ;;  %v9471_v27 = vadd.f32 %v6948_v44, %v9235_v13  ;;  %v6383_v11 = vmul.f32 -1.442695, %v9462_v48 }
 0x2e6   :  { %v7884_v6 = vpop.eup %7883  ;;  %v2503_v7 = vadd.f32 1.0, %v7882_v29  ;;  %v9474_v38 = vadd.f32 %v6950_v9, %v9237_v14  ;;  %v9476_v49 = vpack.c.bf16 %v2689_v55, %v2687_v40  ;;  %v9479_v53 = vpack.c.bf16 %v2688_v54, %v2686_v39 }
 0x2e7   :  { %v7886_v3 = vpop.eup %7885  ;;  %7903 = vrcp.f32 %v2502_v45  ;;  %v2504_v4 = vadd.f32 1.0, %v7884_v6  ;;  %v6384_v13 = vmul.f32 -1.442695, %v9467_v25  ;;  %v6385_v14 = vmul.f32 -1.442695, %v9471_v27 }
 0x2e8   :  { %v7888_v0 = vpop.eup %7887  ;;  %7905 = vrcp.f32 %v2503_v7  ;;  %v2505_v36 = vadd.f32 1.0, %v7886_v3  ;;  %v2060_v42 = vpop.f32.mrb[60].mxu0  ;;  %v6386_v5 = vmul.f32 -1.442695, %v9474_v38 }
 0x2e9   :  { %v7890_v60 = vpop.eup %7889  ;;  %7907 = vrcp.f32 %v2504_v4  ;;  %v6952_v33 = vadd.f32 %v2060_v42, %v9259_v20  ;;  %v2062_v41 = vpop.f32.mrb[61].mxu0  ;;  %v2690_v6 = vmul.f32 %v7888_v0, %v9380_v26 }
 0x2ea   :  { %v7892_v61 = vpop.eup %7891  ;;  %7909 = vrcp.f32 %v2505_v36  ;;  %v6954_v52 = vadd.f32 %v2062_v41, %v9262_v23  ;;  %v2064_v40 = vpop.f32.mrb[62].mxu0  ;;  %v2691_v39 = vmul.f32 %v7890_v60, %v9384_v46 }
 0x2eb   :  { %v7894_v51 = vpop.eup %7893  ;;  %v2692_v28 = vmul.f32 %v7892_v61, %v9388_v32  ;;  %7911 = vpow2.f32 %v6383_v11  ;;  %v6956_v24 = vadd.f32 %v2064_v40, %v9259_v20  ;;  %v9489_v54 = vadd.f32 %v6952_v33, %v9239_v17  ;;  %v2066_v44 = vpop.f32.mrb[63].mxu0 }
 0x2ec   :  { %v7896_v50 = vpop.eup %7895  ;;  %v2693_v57 = vmul.f32 %v7894_v51, %v9392_v30  ;;  %7913 = vpow2.f32 %v6384_v13  ;;  %v6958_v55 = vadd.f32 %v2066_v44, %v9262_v23  ;;  %v9494_v9 = vadd.f32 %v6954_v52, %v9241_v19 }
 0x2ed   :  { %v7898_v29 = vpop.eup %7897  ;;  %v2506_v32 = vadd.f32 1.0, %v7896_v50  ;;  %7915 = vpow2.f32 %v6385_v14  ;;  %v9498_v45 = vadd.f32 %v6956_v24, %v9243_v21  ;;  %v6387_v4 = vmul.f32 -1.442695, %v9489_v54 }
 0x2ee   :  { %v7900_v17 = vpop.eup %7899  ;;  %v2507_v7 = vadd.f32 1.0, %v7898_v29  ;;  %7917 = vpow2.f32 %v6386_v5  ;;  %v9502_v30 = vadd.f32 %v6958_v55, %v9245_v22  ;;  %v9505_v11 = vpack.c.bf16 %v2693_v57, %v2691_v39 }
 0x2ef   :  { %v7902_v3 = vpop.eup %7901  ;;  %7919 = vrcp.f32 %v2506_v32  ;;  %v2508_v19 = vadd.f32 1.0, %v7900_v17  ;;  %v6388_v21 = vmul.f32 -1.442695, %v9494_v9  ;;  %v9508_v13 = vpack.c.bf16 %v2692_v28, %v2690_v6 }
 0x2f0   :  { %7921 = vrcp.f32 %v2507_v7  ;;  %v2509_v46 = vadd.f32 1.0, %v7902_v3  ;;  %v2103_v36 = vpop.f32.mrb[0].mxu0  ;;  %v6389_v0 = vmul.f32 -1.442695, %v9498_v45  ;;  %v6390_v14 = vmul.f32 -1.442695, %v9502_v30 }
 0x2f1   :  { %v7904_v26 = vpop.eup %7903  ;;  %7923 = vrcp.f32 %v2508_v19  ;;  %v9512_v22 = vadd.f32 %v2103_v36, %v9259_v20  ;;  %v2105_v42 = vpop.f32.mrb[1].mxu0 }
 0x2f2   :  { %v7906_v60 = vpop.eup %7905  ;;  %7925 = vrcp.f32 %v2509_v46  ;;  %v2107_v33 = vpop.f32.mrb[2].mxu0  ;;  %v2694_v40 = vmul.f32 %v7904_v26, %v9407_v16  ;;  %v9519_v28 = vadd.f32 %v2105_v42, %v9262_v23 }
 0x2f3   :  { %v7908_v41 = vpop.eup %7907  ;;  %7927 = vpow2.f32 %v6387_v4  ;;  %v6327_v61 = vmul.f32 -1.442695, %v9512_v22  ;;  %v2109_v5 = vpop.f32.mrb[3].mxu0  ;;  %v2695_v44 = vmul.f32 %v7906_v60, %v9411_v2  ;;  %v9524_v57 = vadd.f32 %v2107_v33, %v9259_v20 }
 0x2f4   :  { %v7910_v52 = vpop.eup %7909  ;;  %v2696_v51 = vmul.f32 %v7908_v41, %v9415_v10  ;;  %7929 = vpow2.f32 %v6388_v21  ;;  %v9527_v16 = vadd.f32 %v2109_v5, %v9262_v23  ;;  %v6328_v6 = vmul.f32 -1.442695, %v9519_v28 }
 0x2f5   :  { %v7912_v24 = vpop.eup %7911  ;;  %v2697_v50 = vmul.f32 %v7910_v52, %v9421_v59  ;;  %7931 = vpow2.f32 %v6389_v0  ;;  %v6329_v4 = vmul.f32 -1.442695, %v9524_v57 }
 0x2f6   :  { %v7914_v55 = vpop.eup %7913  ;;  %v2510_v29 = vadd.f32 1.0, %v7912_v24  ;;  %7933 = vpow2.f32 %v6390_v14  ;;  %v9529_v10 = vpack.c.bf16 %v2696_v51, %v2694_v40  ;;  %v6330_v26 = vmul.f32 -1.442695, %v9527_v16 }
 0x2f7   :  { %v7916_v39 = vpop.eup %7915  ;;  %v2511_v32 = vadd.f32 1.0, %v7914_v55  ;;  %7935 = vpow2.f32 %v6327_v61  ;;  %v9531_v17 = vpack.c.bf16 %v2697_v50, %v2695_v44 }
 0x2f8   :  { %v7918_v2 = vpop.eup %7917  ;;  %7937 = vrcp.f32 %v2510_v29  ;;  %v2512_v59 = vadd.f32 1.0, %v7916_v39  ;;  %v2113_v7 = vpop.f32.mrb[4].mxu0 }
 0x2f9   :  { %v7920_v3 = vpop.eup %7919  ;;  %7939 = vrcp.f32 %v2511_v32  ;;  %v2513_v19 = vadd.f32 1.0, %v7918_v2  ;;  %v9536_v46 = vadd.f32 %v2113_v7, %v9259_v20  ;;  %v2115_v21 = vpop.f32.mrb[5].mxu0 }
 0x2fa   :  { %v7922_v36 = vpop.eup %7921  ;;  %7941 = vrcp.f32 %v2512_v59  ;;  %v2117_v0 = vpop.f32.mrb[6].mxu0  ;;  %v2698_v41 = vmul.f32 %v7920_v3, %v9435_v34  ;;  %v9545_v51 = vadd.f32 %v2115_v21, %v9262_v23 }
 0x2fb   :  { %v7924_v42 = vpop.eup %7923  ;;  %7943 = vrcp.f32 %v2513_v19  ;;  %v6331_v60 = vmul.f32 -1.442695, %v9536_v46  ;;  %v2119_v14 = vpop.f32.mrb[7].mxu0  ;;  %v2699_v52 = vmul.f32 %v7922_v36, %v9439_v43  ;;  %v9548_v50 = vadd.f32 %v2117_v0, %v9259_v20 }
 0x2fc   :  { %v7926_v33 = vpop.eup %7925  ;;  %v2700_v61 = vmul.f32 %v7924_v42, %v9443_v37  ;;  %7945 = vpow2.f32 %v6328_v6  ;;  %v9553_v29 = vadd.f32 %v2119_v14, %v9262_v23  ;;  %v6332_v6 = vmul.f32 -1.442695, %v9545_v51 }
 0x2fd   :  { %v7928_v5 = vpop.eup %7927  ;;  %v2701_v40 = vmul.f32 %v7926_v33, %v9447_v31  ;;  %7947 = vpow2.f32 %v6329_v4  ;;  %v6333_v21 = vmul.f32 -1.442695, %v9548_v50 }
 0x2fe   :  { %v7930_v24 = vpop.eup %7929  ;;  %v2514_v44 = vadd.f32 1.0, %v7928_v5  ;;  %7949 = vpow2.f32 %v6330_v26  ;;  %v9550_v55 = vpack.c.bf16 %v2700_v61, %v2698_v41  ;;  %v6334_v0 = vmul.f32 -1.442695, %v9553_v29 }
 0x2ff   :  { %v7932_v34 = vpop.eup %7931  ;;  %v2515_v37 = vadd.f32 1.0, %v7930_v24  ;;  %7951 = vpow2.f32 %v6331_v60  ;;  %v9555_v43 = vpack.c.bf16 %v2701_v40, %v2699_v52 }
 0x300   :  { %v7934_v31 = vpop.eup %7933  ;;  %7953 = vrcp.f32 %v2514_v44  ;;  %v2516_v39 = vadd.f32 1.0, %v7932_v34  ;;  %v2123_v32 = vpop.f32.mrb[8].mxu0 }
 0x301   :  { %v7936_v2 = vpop.eup %7935  ;;  %7955 = vrcp.f32 %v2515_v37  ;;  %v2517_v59 = vadd.f32 1.0, %v7934_v31  ;;  %v9559_v7 = vadd.f32 %v2123_v32, %v9259_v20  ;;  %v2125_v3 = vpop.f32.mrb[9].mxu0 }
 0x302   :  { %v7938_v19 = vpop.eup %7937  ;;  %7957 = vrcp.f32 %v2516_v39  ;;  %v2454_v4 = vadd.f32 1.0, %v7936_v2  ;;  %v2127_v36 = vpop.f32.mrb[10].mxu0  ;;  %v9567_v5 = vadd.f32 %v2125_v3, %v9262_v23 }
 0x303   :  { %v7940_v26 = vpop.eup %7939  ;;  %7959 = vrcp.f32 %v2517_v59  ;;  %v2129_v42 = vpop.f32.mrb[11].mxu0  ;;  %v6335_v14 = vmul.f32 -1.442695, %v9559_v7  ;;  %v2702_v41 = vmul.f32 %v7938_v19, %v9462_v48  ;;  %v9572_v44 = vadd.f32 %v2127_v36, %v9259_v20 }
 0x304   :  { %v7942_v60 = vpop.eup %7941  ;;  %7961 = vrcp.f32 %v2454_v4  ;;  %v2703_v40 = vmul.f32 %v7940_v26, %v9467_v25  ;;  %v9575_v48 = vadd.f32 %v2129_v42, %v9262_v23  ;;  %v6336_v59 = vmul.f32 -1.442695, %v9567_v5 }
 0x305   :  { %v7944_v33 = vpop.eup %7943  ;;  %v2704_v61 = vmul.f32 %v7942_v60, %v9471_v27  ;;  %7963 = vpow2.f32 %v6332_v6 }
 0x306   :  { %v7946_v52 = vpop.eup %7945  ;;  %v2705_v24 = vmul.f32 %v7944_v33, %v9474_v38  ;;  %7965 = vpow2.f32 %v6333_v21  ;;  %v6337_v21 = vmul.f32 -1.442695, %v9572_v44  ;;  %v6338_v42 = vmul.f32 -1.442695, %v9575_v48 }
 0x307   :  { %v7948_v34 = vpop.eup %7947  ;;  %v2455_v37 = vadd.f32 1.0, %v7946_v52  ;;  %7967 = vpow2.f32 %v6334_v0  ;;  %v9577_v27 = vpack.c.bf16 %v2704_v61, %v2702_v41 }
 0x308   :  { %v7950_v31 = vpop.eup %7949  ;;  %v2456_v39 = vadd.f32 1.0, %v7948_v34  ;;  %7969 = vpow2.f32 %v6335_v14  ;;  %v2133_v32 = vpop.f32.mrb[12].mxu0  ;;  %v9579_v2 = vpack.c.bf16 %v2705_v24, %v2703_v40 }
 0x309   :  { %v7952_v25 = vpop.eup %7951  ;;  %7971 = vrcp.f32 %v2455_v37  ;;  %v2457_v38 = vadd.f32 1.0, %v7950_v31  ;;  %v9583_v6 = vadd.f32 %v2133_v32, %v9259_v20  ;;  %v2135_v3 = vpop.f32.mrb[13].mxu0 }
 0x30a   :  { %v7954_v19 = vpop.eup %7953  ;;  %7973 = vrcp.f32 %v2456_v39  ;;  %v2458_v4 = vadd.f32 1.0, %v7952_v25  ;;  %v9587_v36 = vadd.f32 %v2135_v3, %v9262_v23  ;;  %v2137_v26 = vpop.f32.mrb[14].mxu0 }
 0x30b   :  { %v7956_v0 = vpop.eup %7955  ;;  %7975 = vrcp.f32 %v2457_v38  ;;  %v2139_v60 = vpop.f32.mrb[15].mxu0  ;;  %v6339_v33 = vmul.f32 -1.442695, %v9583_v6  ;;  %v2706_v61 = vmul.f32 %v7954_v19, %v9489_v54  ;;  %v9597_v31 = vadd.f32 %v2137_v26, %v9259_v20 }
 0x30c   :  { %v7958_v14 = vpop.eup %7957  ;;  %7977 = vrcp.f32 %v2458_v4  ;;  %v6340_v40 = vmul.f32 -1.442695, %v9587_v36  ;;  %v2707_v34 = vmul.f32 %v7956_v0, %v9494_v9  ;;  %v9600_v32 = vadd.f32 %v2139_v60, %v9262_v23 }
 0x30d   :  { %v7960_v41 = vpop.eup %7959  ;;  %v2708_v52 = vmul.f32 %v7958_v14, %v9498_v45  ;;  %7979 = vpow2.f32 %v6336_v59  ;;  %v6341_v26 = vmul.f32 -1.442695, %v9597_v31 }
 0x30e   :  { %v7962_v24 = vpop.eup %7961  ;;  %v2709_v37 = vmul.f32 %v7960_v41, %v9502_v30  ;;  %7981 = vpow2.f32 %v6337_v21 }
 0x30f   :  { %v7964_v39 = vpop.eup %7963  ;;  %7983 = vpow2.f32 %v6338_v42  ;;  %v9602_v54 = vpack.c.bf16 %v2708_v52, %v2706_v61 }
 0x310   :  { %v7966_v45 = vpop.eup %7965  ;;  %v2459_v25 = vadd.f32 1.0, %v7964_v39  ;;  %7985 = vpow2.f32 %v6339_v33  ;;  %v2143_v38 = vpop.f32.mrb[16].mxu0  ;;  %v9604_v59 = vpack.c.bf16 %v2709_v37, %v2707_v34  ;;  %v6342_v33 = vmul.f32 -1.442695, %v9600_v32 }
 0x311   :  { %v7968_v9 = vpop.eup %7967  ;;  %v2460_v3 = vadd.f32 1.0, %v7966_v45  ;;  %7987 = vpow2.f32 %v6340_v40  ;;  %v9607_v30 = vadd.f32 %v2143_v38, %v9259_v20  ;;  %v2145_v19 = vpop.f32.mrb[17].mxu0  ;;  %v2646_v34 = vmul.f32 %v7962_v24, %v9512_v22 }
 0x312   :  { %v7970_v4 = vpop.eup %7969  ;;  %7989 = vrcp.f32 %v2459_v25  ;;  %v2461_v21 = vadd.f32 1.0, %v7968_v9  ;;  %v9611_v0 = vadd.f32 %v2145_v19, %v9262_v23  ;;  %v2147_v42 = vpop.f32.mrb[18].mxu0 }
 0x313   :  { %v7972_v60 = vpop.eup %7971  ;;  %7991 = vrcp.f32 %v2460_v3  ;;  %v2462_v14 = vadd.f32 1.0, %v7970_v4  ;;  %v2149_v41 = vpop.f32.mrb[19].mxu0  ;;  %v6343_v52 = vmul.f32 -1.442695, %v9607_v30  ;;  %v9623_v19 = vadd.f32 %v2147_v42, %v9259_v20 }
 0x314   :  { %v7974_v61 = vpop.eup %7973  ;;  %7993 = vrcp.f32 %v2461_v21  ;;  %v6344_v39 = vmul.f32 -1.442695, %v9611_v0  ;;  %v2647_v25 = vmul.f32 %v7972_v60, %v9519_v28  ;;  %v7631_v21 = vld [vmem:[#allocation7 + $0x8] ss:$16 sps:$4 sm:$0xff]  }
 0x315   :  { %v7976_v40 = vpop.eup %7975  ;;  %v2648_v37 = vmul.f32 %v7974_v61, %v9524_v57  ;;  %7995 = vrcp.f32 %v2462_v14  ;;  %v9626_v57 = vadd.f32 %v2149_v41, %v9262_v23 }
 0x316   :  { %v7978_v45 = vpop.eup %7977  ;;  %v2649_v38 = vmul.f32 %v7976_v40, %v9527_v16  ;;  %7997 = vpow2.f32 %v6341_v26 }
 0x317   :  { %v7980_v9 = vpop.eup %7979  ;;  %v9620_v3 = vpack.c.bf16 %v2648_v37, %v2646_v34  ;;  %7999 = vpow2.f32 %v6342_v33  ;;  %v7636_v33 = vld [vmem:[#allocation7 + $0x2c] ss:$16 sps:$4 sm:$0xff]   ;;  %v6345_v37 = vmul.f32 -1.442695, %v9623_v19 }
 0x318   :  { %v7982_v4 = vpop.eup %7981  ;;  %v2463_v22 = vadd.f32 1.0, %v7980_v9  ;;  %8001 = vpow2.f32 %v6343_v52  ;;  %v9628_v24 = vpack.c.bf16 %v2649_v38, %v2647_v25  ;;  %v2153_v28 = vpop.f32.mrb[20].mxu0  ;;  %v6346_v9 = vmul.f32 -1.442695, %v9626_v57 }
 0x319   :  { %v7984_v60 = vpop.eup %7983  ;;  %v2464_v16 = vadd.f32 1.0, %v7982_v4  ;;  %8003 = vpow2.f32 %v6344_v39  ;;  %v9631_v26 = vadd.f32 %v2153_v28, %v9259_v20  ;;  %v2155_v14 = vpop.f32.mrb[21].mxu0  ;;  %v7634_v4 = vld [vmem:[#allocation7 + $0x28] ss:$16 sps:$4 sm:$0xff]  }
 0x31a   :  { %v7986_v42 = vpop.eup %7985  ;;  %8005 = vrcp.f32 %v2463_v22  ;;  %v2465_v61 = vadd.f32 1.0, %v7984_v60  ;;  %3180 = vmatprep.mubr.bf16.mxu1 %v9628_v24  ;;  %v9635_v41 = vadd.f32 %v2155_v14, %v9262_v23  ;;  %v2157_v52 = vpop.f32.mrb[22].mxu0  ;;  %v7639_v60 = vld [vmem:[#allocation7 + $0x4c] ss:$16 sps:$4 sm:$0xff]   ;;  %v2650_v14 = vmul.f32 %v7978_v45, %v9536_v46 }
 0x31b   :  { %v7988_v40 = vpop.eup %7987  ;;  %8007 = vrcp.f32 %v2464_v16  ;;  %v2466_v34 = vadd.f32 1.0, %v7986_v42  ;;  %3181 = vmatmul.mubr.bf16.vlgmr.msra.gmra.mrb[40].mxu1 %v9620_v3  ;;  %v2159_v39 = vpop.f32.mrb[23].mxu0  ;;  %v6347_v28 = vmul.f32 -1.442695, %v9631_v26 }
 0x31c   :  { %v7990_v25 = vpop.eup %7989  ;;  %8009 = vrcp.f32 %v2465_v61  ;;  %v2467_v38 = vadd.f32 1.0, %v7988_v40  ;;  %3342 = vmatpush1.bf16.msra.mxu1 %v7631_v21  ;;  %v6348_v1 = vmul.f32 -1.442695, %v9635_v41 }
 0x31d   :  { %v7992_v22 = vpop.eup %7991  ;;  %8011 = vrcp.f32 %v2466_v34  ;;  %3343 = vmatprep.subr.bf16.mxu1 %v7636_v33  ;;  %v2651_v40 = vmul.f32 %v7990_v25, %v9545_v51  ;;  %v9647_v34 = vadd.f32 %v2157_v52, %v9259_v20  ;;  %v9650_v33 = vadd.f32 %v2159_v39, %v9262_v23  ;;  %v7637_v51 = vld [vmem:[#allocation7 + $0x48] ss:$16 sps:$4 sm:$0xff]   ;;  %v7642_v20 = vld [vmem:[#allocation7 + $0x6c] ss:$16 sps:$4 sm:$0xff]  }
 0x31e   :  { %v7994_v16 = vpop.eup %7993  ;;  %v2652_v42 = vmul.f32 %v7992_v22, %v9548_v50  ;;  %8013 = vrcp.f32 %v2467_v38 }
 0x31f   :  { %v7996_v61 = vpop.eup %7995  ;;  %v2653_v21 = vmul.f32 %v7994_v16, %v9553_v29  ;;  %8015 = vpow2.f32 %v6345_v37  ;;  %v6349_v25 = vmul.f32 -1.442695, %v9647_v34  ;;  %v6350_v39 = vmul.f32 -1.442695, %v9650_v33 }
 0x320   :  { %v7998_v18 = vpop.eup %7997  ;;  %8017 = vpow2.f32 %v6346_v9  ;;  %v9652_v46 = vpack.c.bf16 %v2652_v42, %v2650_v14  ;;  %3344 = vmatpush1.bf16.msra.mxu1 %v7634_v4  ;;  %v7640_v9 = vld [vmem:[#allocation7 + $0x68] ss:$16 sps:$4 sm:$0xff]   ;;  %v2654_v22 = vmul.f32 %v7996_v61, %v9559_v7 }
 0x321   :  { %v8000_v50 = vpop.eup %7999  ;;  %v2468_v45 = vadd.f32 1.0, %v7998_v18  ;;  %8019 = vpow2.f32 %v6347_v28  ;;  %v9654_v38 = vpack.c.bf16 %v2653_v21, %v2651_v40  ;;  %3345 = vmatprep.subr.bf16.mxu1 %v7639_v60  ;;  %v7645_v60 = vld [vmem:[#allocation7 + $0x8c] ss:$16 sps:$4 sm:$0xff]   ;;  %v7643_v7 = vld [vmem:[#allocation7 + $0x88] ss:$16 sps:$4 sm:$0xff]  }
 0x322   :  { %v8002_v29 = vpop.eup %8001  ;;  %v2469_v37 = vadd.f32 1.0, %v8000_v50  ;;  %8021 = vpow2.f32 %v6348_v1 }
 0x323   :  { %v8004_v52 = vpop.eup %8003  ;;  %8023 = vrcp.f32 %v2468_v45  ;;  %3190 = vmatprep.mubr.bf16.mxu1 %v9654_v38  ;;  %v2470_v28 = vadd.f32 1.0, %v8002_v29  ;;  %v7648_v29 = vld [vmem:[#allocation7 + $0xac] ss:$16 sps:$4 sm:$0xff]  }
 0x324   :  { %v8006_v23 = vpop.eup %8005  ;;  %8025 = vrcp.f32 %v2469_v37  ;;  %3191 = vmatmul.mubr.bf16.gmra.mrb[44].mxu1 %v9652_v46  ;;  %v2471_v40 = vadd.f32 1.0, %v8004_v52  ;;  %v7646_v52 = vld [vmem:[#allocation7 + $0xa8] ss:$16 sps:$4 sm:$0xff]  }
 0x325   :  { %v8008_v18 = vpop.eup %8007  ;;  %3346 = vmatpush1.bf16.msra.mxu1 %v7637_v51  ;;  %v2655_v14 = vmul.f32 %v8006_v23, %v9567_v5  ;;  %8027 = vpow2.f32 %v6349_v25 }
 0x326   :  { %v8010_v4 = vpop.eup %8009  ;;  %v2656_v1 = vmul.f32 %v8008_v18, %v9572_v44  ;;  %3347 = vmatprep.subr.bf16.mxu1 %v7642_v20  ;;  %8029 = vpow2.f32 %v6350_v39 }
 0x327   :  { %v8012_v16 = vpop.eup %8011  ;;  %v2657_v42 = vmul.f32 %v8010_v4, %v9575_v48  ;;  %8031 = vrcp.f32 %v2470_v28 }
 0x328   :  { %v8014_v21 = vpop.eup %8013  ;;  %v9664_v50 = vpack.c.bf16 %v2656_v1, %v2654_v22  ;;  %8033 = vrcp.f32 %v2471_v40  ;;  %v2658_v23 = vmul.f32 %v8012_v16, %v9583_v6 }
 0x329   :  { %v8016_v45 = vpop.eup %8015  ;;  %v9666_v51 = vpack.c.bf16 %v2657_v42, %v2655_v14  ;;  %3348 = vmatpush1.bf16.msra.mxu1 %v7640_v9  ;;  %v7651_v9 = vld [vmem:[#allocation7 + $0xcc] ss:$16 sps:$4 sm:$0xff]   ;;  %v2659_v4 = vmul.f32 %v8014_v21, %v9587_v36  ;;  %v7649_v42 = vld [vmem:[#allocation7 + $0xc8] ss:$16 sps:$4 sm:$0xff]  }
 0x32a   :  { %v8018_v44 = vpop.eup %8017  ;;  %v2472_v61 = vadd.f32 1.0, %v8016_v45  ;;  %3349 = vmatprep.subr.bf16.mxu1 %v7645_v60  ;;  %v7652_v21 = vld [vmem:[#allocation7 + $0xe8] ss:$16 sps:$4 sm:$0xff]  }
 0x32b   :  { %v8020_v37 = vpop.eup %8019  ;;  %v2473_v5 = vadd.f32 1.0, %v8018_v44  ;;  %3200 = vmatprep.mubr.bf16.mxu1 %v9666_v51 }
 0x32c   :  { %v8022_v48 = vpop.eup %8021  ;;  %8035 = vrcp.f32 %v2472_v61  ;;  %3201 = vmatmul.mubr.bf16.gmra.mrb[48].mxu1 %v9664_v50  ;;  %v2474_v18 = vadd.f32 1.0, %v8020_v37 }
 0x32d   :  { %v8024_v20 = vpop.eup %8023  ;;  %8037 = vrcp.f32 %v2473_v5  ;;  %3350 = vmatpush1.bf16.msra.mxu1 %v7643_v7  ;;  %v2475_v1 = vadd.f32 1.0, %v8022_v48  ;;  %v7657_v7 = vld [vmem:[#allocation7 + $0x10c] ss:$16 sps:$4 sm:$0xff]  }
 0x32e   :  { %v8026_v25 = vpop.eup %8025  ;;  %v2660_v39 = vmul.f32 %v8024_v20, %v9597_v31  ;;  %3351 = vmatprep.subr.bf16.mxu1 %v7648_v29  ;;  %8039 = vrcp.f32 %v2474_v18  ;;  %v7654_v31 = vld [vmem:[#allocation7 + $0xec] ss:$16 sps:$4 sm:$0xff]  }
 0x32f   :  { %v2661_v22 = vmul.f32 %v8026_v25, %v9600_v32  ;;  %v8028_v60 = vpop.eup %8027  ;;  %8041 = vrcp.f32 %v2475_v1  ;;  %v7660_v25 = vld [vmem:[#allocation7 + $0x12c] ss:$16 sps:$4 sm:$0xff]  }
 0x330   :  { %v9674_v28 = vpack.c.bf16 %v2660_v39, %v2658_v23  ;;  %v8030_v40 = vpop.eup %8029  ;;  %v2476_v6 = vadd.f32 1.0, %v8028_v60 }
 0x331   :  { %v9676_v14 = vpack.c.bf16 %v2661_v22, %v2659_v4  ;;  %3352 = vmatpush1.bf16.msra.mxu1 %v7646_v52  ;;  %v2477_v16 = vadd.f32 1.0, %v8030_v40  ;;  %v8032_v36 = vpop.eup %8031  ;;  %v7655_v52 = vld [vmem:[#allocation7 + $0x108] ss:$16 sps:$4 sm:$0xff]   ;;  %v7666_v40 = vld [vmem:[#allocation7 + $0x16c] ss:$16 sps:$4 sm:$0xff]  }
 0x332   :  { %3353 = vmatprep.subr.bf16.mxu1 %v7651_v9  ;;  %8043 = vrcp.f32 %v2476_v6  ;;  %v8034_v32 = vpop.eup %8033  ;;  %v2662_v61 = vmul.f32 %v8032_v36, %v9607_v30  ;;  %v7663_v9 = vld [vmem:[#allocation7 + $0x14c] ss:$16 sps:$4 sm:$0xff]   ;;  %v7670_v6 = vld [vmem:[#allocation7 + $0x1a8] ss:$16 sps:$4 sm:$0xff]  }
 0x333   :  { %3210 = vmatprep.mubr.bf16.mxu1 %v9676_v14  ;;  %8045 = vrcp.f32 %v2477_v16  ;;  %v2663_v37 = vmul.f32 %v8034_v32, %v9611_v0  ;;  %v7673_v16 = vld [vmem:[#allocation7 + $0x1c8] ss:$16 sps:$4 sm:$0xff]   ;;  %v7678_v36 = vld [vmem:[#allocation7 + $0x1ec] ss:$16 sps:$4 sm:$0xff]  }
 0x334   :  { %3211 = vmatmul.mubr.bf16.gmra.mrb[52].mxu1 %v9674_v28  ;;  %v7676_v32 = vld [vmem:[#allocation7 + $0x1e8] ss:$16 sps:$4 sm:$0xff]  }
 0x335   :  { %3354 = vmatpush1.bf16.msra.mxu1 %v7649_v42  ;;  %v7661_v42 = vld [vmem:[#allocation7 + $0x148] ss:$16 sps:$4 sm:$0xff]  }
 0x336   :  { %v8036_v45 = vpop.eup %8035  ;;  %3355 = vmatprep.subr.bf16.mxu1 %v7654_v31  ;;  %v7675_v31 = vld [vmem:[#allocation7 + $0x1cc] ss:$16 sps:$4 sm:$0xff]  }
 0x337   :  { %v8038_v44 = vpop.eup %8037  ;;  %v2664_v29 = vmul.f32 %v8036_v45, %v9623_v19  ;;  %v7658_v19 = vld [vmem:[#allocation7 + $0x128] ss:$16 sps:$4 sm:$0xff]  }
 0x338   :  { %v2665_v5 = vmul.f32 %v8038_v44, %v9626_v57  ;;  %v8040_v23 = vpop.eup %8039  ;;  %v7679_v45 = vld [vmem:[#allocation8] ss:$8 sps:$4 sm:$0xff]   ;;  %v7682_v44 = vld [vmem:[#allocation8 + $0x10] ss:$8 sps:$4 sm:$0xff]  }
 0x339   :  { %v9684_v48 = vpack.c.bf16 %v2664_v29, %v2662_v61  ;;  %3356 = vmatpush1.bf16.msra.mxu1 %v7652_v21  ;;  %v8042_v39 = vpop.eup %8041  ;;  %v2666_v57 = vmul.f32 %v8040_v23, %v9631_v26  ;;  %v7664_v26 = vld [vmem:[#allocation7 + $0x168] ss:$16 sps:$4 sm:$0xff]   ;;  %v7681_v21 = vld [vmem:[#allocation8 + $0x4] ss:$8 sps:$4 sm:$0xff]  }
 0x33a   :  { %v9686_v20 = vpack.c.bf16 %v2665_v5, %v2663_v37  ;;  %3357 = vmatprep.subr.bf16.mxu1 %v7657_v7  ;;  %v2667_v4 = vmul.f32 %v8042_v39, %v9635_v41  ;;  %v7669_v41 = vld [vmem:[#allocation7 + $0x18c] ss:$16 sps:$4 sm:$0xff]   ;;  %v7685_v29 = vld [vmem:[#allocation8 + $0x20] ss:$8 sps:$4 sm:$0xff]   ;;  %v7700_v23 = vld [vmem:[#allocation8 + $0x70] ss:$8 sps:$4 sm:$0xff]  }
 0x33b   :  { %v7684_v7 = vld [vmem:[#allocation8 + $0x14] ss:$8 sps:$4 sm:$0xff]   ;;  %v7687_v61 = vld [vmem:[#allocation8 + $0x24] ss:$8 sps:$4 sm:$0xff]  }
 0x33c   :  { %3220 = vmatprep.mubr.bf16.mxu1 %v9686_v20  ;;  %v8044_v30 = vpop.eup %8043  ;;  %v7690_v37 = vld [vmem:[#allocation8 + $0x34] ss:$8 sps:$4 sm:$0xff]   ;;  %v7693_v5 = vld [vmem:[#allocation8 + $0x44] ss:$8 sps:$4 sm:$0xff]  }
 0x33d   :  { %3221 = vmatmul.mubr.bf16.gmra.mrb[56].mxu1 %v9684_v48  ;;  %v8046_v0 = vpop.eup %8045  ;;  %v2668_v18 = vmul.f32 %v8044_v30, %v9647_v34  ;;  %v7667_v34 = vld [vmem:[#allocation7 + $0x188] ss:$16 sps:$4 sm:$0xff]   ;;  %v7705_v39 = vld [vmem:[#allocation8 + $0x84] ss:$8 sps:$4 sm:$0xff]  }
 0x33e   :  { %3358 = vmatpush1.bf16.msra.mxu1 %v7655_v52  ;;  %v2669_v22 = vmul.f32 %v8046_v0, %v9650_v33  ;;  %v7672_v33 = vld [vmem:[#allocation7 + $0x1ac] ss:$16 sps:$4 sm:$0xff]   ;;  %v7694_v52 = vld [vmem:[#allocation8 + $0x50] ss:$8 sps:$4 sm:$0xff]  }
 0x33f   :  { %3359 = vmatprep.subr.bf16.mxu1 %v7660_v25  ;;  %v9694_v1 = vpack.c.bf16 %v2668_v18, %v2666_v57  ;;  %v7699_v25 = vld [vmem:[#allocation8 + $0x64] ss:$8 sps:$4 sm:$0xff]   ;;  %v7706_v30 = vld [vmem:[#allocation8 + $0x90] ss:$8 sps:$4 sm:$0xff]   ;;  %v7720_v18 = vld [vmem:[#allocation8 + $0xd4] ss:$8 sps:$4 sm:$0xff]  }
 0x340   :  { %v9696_v60 = vpack.c.bf16 %v2669_v22, %v2667_v4  ;;  %v7712_v0 = vld [vmem:[#allocation8 + $0xb0] ss:$8 sps:$4 sm:$0xff]   ;;  %v7717_v57 = vld [vmem:[#allocation8 + $0xc4] ss:$8 sps:$4 sm:$0xff]   ;;  %v7721_v22 = vld [vmem:[#allocation8 + $0xe0] ss:$8 sps:$4 sm:$0xff]  }
 0x341   :  { %v7723_v4 = vld [vmem:[#allocation8 + $0xe4] ss:$8 sps:$4 sm:$0xff]  }
 0x342   :  { %3360 = vmatpush1.bf16.msra.mxu1 %v7658_v19  ;;  %3230 = vmatprep.mubr.bf16.mxu1 %v9696_v60  ;;  %v7711_v19 = vld [vmem:[#allocation8 + $0xa4] ss:$8 sps:$4 sm:$0xff]  }
 0x343   :  { %3361 = vmatprep.subr.bf16.mxu1 %v7663_v9  ;;  %v7718_v9 = vld [vmem:[#allocation8 + $0xd0] ss:$8 sps:$4 sm:$0xff]  }
 0x345   :  { %3231 = vmatmul.mubr.bf16.gmra.mrb[60].mxu1 %v9694_v1 }
 0x346   :  { %3240 = vmatprep.mubr.bf16.mxu1 %v9358_v12  ;;  %3362 = vmatpush1.bf16.msra.mxu1 %v7661_v42 }
 0x347   :  { %3363 = vmatprep.subr.bf16.mxu1 %v7666_v40 }
 0x34a   :  { %3364 = vmatpush1.bf16.msra.mxu1 %v7664_v26 }
 0x34b   :  { %3365 = vmatprep.subr.bf16.mxu1 %v7669_v41 }
 0x34d   :  { %3241 = vmatmul.mubr.bf16.gmra.mrb[64].mxu1 %v9369_v35 }
 0x34e   :  { %3250 = vmatprep.mubr.bf16.mxu1 %v9395_v56  ;;  %3366 = vmatpush1.bf16.msra.mxu1 %v7667_v34 }
 0x34f   :  { %3367 = vmatprep.subr.bf16.mxu1 %v7672_v33 }
 0x352   :  { %3368 = vmatpush1.bf16.msra.mxu1 %v7670_v6 }
 0x353   :  { %3369 = vmatprep.subr.bf16.mxu1 %v7675_v31 }
 0x355   :  { %3251 = vmatmul.mubr.bf16.gmra.mrb[68].mxu1 %v9397_v62 }
 0x356   :  { %3260 = vmatprep.mubr.bf16.mxu1 %v9417_v58  ;;  %3370 = vmatpush1.bf16.msra.mxu1 %v7673_v16 }
 0x357   :  { %3371 = vmatprep.subr.bf16.mxu1 %v7678_v36 }
 0x35a   :  { %3372 = vmatpush1.bf16.msra.mxu1 %v7676_v32 }
 0x35b   :  { %4890 = vmatprep.subr.bf16.mxu1 %v7681_v21 }
 0x35d   :  { %3261 = vmatmul.mubr.bf16.gmra.mrb[72].mxu1 %v9424_v8 }
 0x35e   :  { %3270 = vmatprep.mubr.bf16.mxu1 %v9450_v47 }
 0x365   :  { %3271 = vmatmul.mubr.bf16.gmra.mrb[76].mxu1 %v9453_v63 }
 0x366   :  { %3280 = vmatprep.mubr.bf16.mxu1 %v9476_v49 }
 0x36d   :  { %3281 = vmatmul.mubr.bf16.gmra.mrb[80].mxu1 %v9479_v53 }
 0x36e   :  { %3290 = vmatprep.mubr.bf16.mxu1 %v9505_v11 }
 0x375   :  { %3291 = vmatmul.mubr.bf16.gmra.mrb[84].mxu1 %v9508_v13 }
 0x376   :  { %3300 = vmatprep.mubr.bf16.mxu1 %v9531_v17 }
 0x37d   :  { %3301 = vmatmul.mubr.bf16.gmra.mrb[88].mxu1 %v9529_v10 }
 0x37e   :  { %3310 = vmatprep.mubr.bf16.mxu1 %v9555_v43 }
 0x385   :  { %3311 = vmatmul.mubr.bf16.gmra.mrb[92].mxu1 %v9550_v55 }
 0x386   :  { %3320 = vmatprep.mubr.bf16.mxu1 %v9579_v2 }
 0x38d   :  { %3321 = vmatmul.mubr.bf16.gmra.mrb[96].mxu1 %v9577_v27 }
 0x38e   :  { %3330 = vmatprep.mubr.bf16.mxu1 %v9604_v59 }
 0x395   :  { %3331 = vmatmul.mubr.bf16.gmra.mrb[100].mxu1 %v9602_v54 }
 0x396   :  { %3373 = vmatprep.mubr.bf16.mxu1 %v9628_v24  ;;  %v7688_v24 = vld [vmem:[#allocation8 + $0x30] ss:$8 sps:$4 sm:$0xff]  }
 0x39d   :  { %3374 = vmatmul.mubr.bf16.vlgmr.msra.gmra.mrb[104].mxu1 %v9620_v3  ;;  %v7691_v3 = vld [vmem:[#allocation8 + $0x40] ss:$8 sps:$4 sm:$0xff]  }
 0x39e   :  { %3383 = vmatprep.mubr.bf16.mxu1 %v9654_v38  ;;  %4891 = vmatpush1.bf16.msra.mxu1 %v7679_v45  ;;  %v7696_v38 = vld [vmem:[#allocation8 + $0x54] ss:$8 sps:$4 sm:$0xff]  }
 0x39f   :  { %4892 = vmatprep.subr.bf16.mxu1 %v7684_v7 }
 0x3a2   :  { %4893 = vmatpush1.bf16.msra.mxu1 %v7682_v44 }
 0x3a3   :  { %4894 = vmatprep.subr.bf16.mxu1 %v7687_v61 }
 0x3a5   :  { %3384 = vmatmul.mubr.bf16.gmra.mrb[108].mxu1 %v9652_v46  ;;  %v7697_v46 = vld [vmem:[#allocation8 + $0x60] ss:$8 sps:$4 sm:$0xff]  }
 0x3a6   :  { %3393 = vmatprep.mubr.bf16.mxu1 %v9666_v51  ;;  %4895 = vmatpush1.bf16.msra.mxu1 %v7685_v29  ;;  %v7702_v51 = vld [vmem:[#allocation8 + $0x74] ss:$8 sps:$4 sm:$0xff]  }
 0x3a7   :  { %4896 = vmatprep.subr.bf16.mxu1 %v7690_v37 }
 0x3aa   :  { %4897 = vmatpush1.bf16.msra.mxu1 %v7688_v24 }
 0x3ab   :  { %4898 = vmatprep.subr.bf16.mxu1 %v7693_v5 }
 0x3ad   :  { %3394 = vmatmul.mubr.bf16.gmra.mrb[112].mxu1 %v9664_v50  ;;  %v7703_v50 = vld [vmem:[#allocation8 + $0x80] ss:$8 sps:$4 sm:$0xff]  }
 0x3ae   :  { %3403 = vmatprep.mubr.bf16.mxu1 %v9676_v14  ;;  %4899 = vmatpush1.bf16.msra.mxu1 %v7691_v3  ;;  %v7708_v14 = vld [vmem:[#allocation8 + $0x94] ss:$8 sps:$4 sm:$0xff]  }
 0x3af   :  { %4900 = vmatprep.subr.bf16.mxu1 %v7696_v38 }
 0x3b2   :  { %4901 = vmatpush1.bf16.msra.mxu1 %v7694_v52 }
 0x3b3   :  { %4902 = vmatprep.subr.bf16.mxu1 %v7699_v25 }
 0x3b5   :  { %3404 = vmatmul.mubr.bf16.gmra.mrb[116].mxu1 %v9674_v28  ;;  %v7709_v28 = vld [vmem:[#allocation8 + $0xa0] ss:$8 sps:$4 sm:$0xff]  }
 0x3b6   :  { %3413 = vmatprep.mubr.bf16.mxu1 %v9686_v20  ;;  %4903 = vmatpush1.bf16.msra.mxu1 %v7697_v46  ;;  %v7714_v20 = vld [vmem:[#allocation8 + $0xb4] ss:$8 sps:$4 sm:$0xff]  }
 0x3b7   :  { %4904 = vmatprep.subr.bf16.mxu1 %v7702_v51 }
 0x3ba   :  { %4905 = vmatpush1.bf16.msra.mxu1 %v7700_v23 }
 0x3bb   :  { %4906 = vmatprep.subr.bf16.mxu1 %v7705_v39 }
 0x3bd   :  { %3414 = vmatmul.mubr.bf16.gmra.mrb[120].mxu1 %v9684_v48  ;;  %v7715_v48 = vld [vmem:[#allocation8 + $0xc0] ss:$8 sps:$4 sm:$0xff]  }
 0x3be   :  { %3423 = vmatprep.mubr.bf16.mxu1 %v9696_v60  ;;  %4907 = vmatpush1.bf16.msra.mxu1 %v7703_v50  ;;  %v7729_v60 = vld [vmem:[#allocation8 + $0x104] ss:$8 sps:$4 sm:$0xff]  }
 0x3bf   :  { %4908 = vmatprep.subr.bf16.mxu1 %v7708_v14 }
 0x3c2   :  { %4909 = vmatpush1.bf16.msra.mxu1 %v7706_v30 }
 0x3c3   :  { %4910 = vmatprep.subr.bf16.mxu1 %v7711_v19 }
 0x3c5   :  { %3424 = vmatmul.mubr.bf16.gmra.mrb[124].mxu1 %v9694_v1  ;;  %v7724_v1 = vld [vmem:[#allocation8 + $0xf0] ss:$8 sps:$4 sm:$0xff]  }
 0x3c6   :  { %3433 = vmatprep.mubr.bf16.mxu1 %v9358_v12  ;;  %4911 = vmatpush1.bf16.msra.mxu1 %v7709_v28  ;;  %v7726_v12 = vld [vmem:[#allocation8 + $0xf4] ss:$8 sps:$4 sm:$0xff]  }
 0x3c7   :  { %4912 = vmatprep.subr.bf16.mxu1 %v7714_v20 }
 0x3ca   :  { %4913 = vmatpush1.bf16.msra.mxu1 %v7712_v0 }
 0x3cb   :  { %4914 = vmatprep.subr.bf16.mxu1 %v7717_v57 }
 0x3cd   :  { %3434 = vmatmul.mubr.bf16.gmra.mrb[128].mxu1 %v9369_v35  ;;  %v2806_v35 = vld [vmem:[%s10870_s4] sm:$0xf] }
 0x3ce   :  { %3443 = vmatprep.mubr.bf16.mxu1 %v9395_v56  ;;  %4915 = vmatpush1.bf16.msra.mxu1 %v7715_v48  ;;  %v9745_v56 = vrot.slane %v2806_v35, %v9250_v15 }
 0x3cf   :  { %4916 = vmatprep.subr.bf16.mxu1 %v7720_v18 }
 0x3d2   :  { %4917 = vmatpush1.bf16.msra.mxu1 %v7718_v9 }
 0x3d3   :  { %4918 = vmatprep.subr.bf16.mxu1 %v7723_v4 }
 0x3d5   :  { %3444 = vmatmul.mubr.bf16.gmra.mrb[132].mxu1 %v9397_v62  ;;  %v10882_v62 = vld [vmem:[#allocation17_spill] sm:$0xff] }
 0x3d6   :  { %3453 = vmatprep.mubr.bf16.mxu1 %v9417_v58  ;;  %4919 = vmatpush1.bf16.msra.mxu1 %v7721_v22  ;;  %v9748_v58 = vrot.slane %v2806_v35, %v10882_v62 }
 0x3d7   :  { %4920 = vmatprep.subr.bf16.mxu1 %v7726_v12 }
 0x3da   :  { %4921 = vmatpush1.bf16.msra.mxu1 %v7724_v1 }
 0x3db   :  { %5083 = vmatprep.subr.bf16.mxu1 %v7729_v60 }
 0x3dd   :  { %3454 = vmatmul.mubr.bf16.gmra.mrb[136].mxu1 %v9424_v8 }
 0x3de   :  { %3463 = vmatprep.mubr.bf16.mxu1 %v9450_v47 }
 0x3e5   :  { %3464 = vmatmul.mubr.bf16.gmra.mrb[140].mxu1 %v9453_v63 }
 0x3e6   :  { %3473 = vmatprep.mubr.bf16.mxu1 %v9476_v49 }
 0x3ed   :  { %3474 = vmatmul.mubr.bf16.gmra.mrb[144].mxu1 %v9479_v53 }
 0x3ee   :  { %3483 = vmatprep.mubr.bf16.mxu1 %v9505_v11  ;;  %v3182_v8 = vpop.f32.mrb[40].mxu1 }
 0x3ef   :  { %v9753_v47 = vadd.f32 %v3182_v8, %v9745_v56  ;;  %v3184_v63 = vpop.f32.mrb[41].mxu1 }
 0x3f0   :  { %v9756_v49 = vadd.f32 %v3184_v63, %v9748_v58  ;;  %v3186_v42 = vpop.f32.mrb[42].mxu1 }
 0x3f1   :  { %v6455_v40 = vmul.f32 -1.442695, %v9753_v47  ;;  %v9760_v26 = vadd.f32 %v3186_v42, %v9745_v56  ;;  %v3188_v41 = vpop.f32.mrb[43].mxu1 }
 0x3f2   :  { %v6456_v34 = vmul.f32 -1.442695, %v9756_v49  ;;  %v9764_v53 = vadd.f32 %v3188_v41, %v9748_v58 }
 0x3f3   :  { %8047 = vpow2.f32 %v6455_v40  ;;  %v6459_v11 = vmul.f32 -1.442695, %v9760_v26 }
 0x3f4   :  { %8049 = vpow2.f32 %v6456_v34  ;;  %v6460_v33 = vmul.f32 -1.442695, %v9764_v53 }
 0x3f5   :  { %8051 = vpow2.f32 %v6459_v11  ;;  %3484 = vmatmul.mubr.bf16.gmra.mrb[148].mxu1 %v9508_v13 }
 0x3f6   :  { %8053 = vpow2.f32 %v6460_v33  ;;  %3493 = vmatprep.mubr.bf16.mxu1 %v9531_v17 }
 0x3f7   :  { %v3192_v6 = vpop.f32.mrb[44].mxu1 }
 0x3f8   :  { %v9771_v31 = vadd.f32 %v3192_v6, %v9745_v56  ;;  %v3194_v16 = vpop.f32.mrb[45].mxu1 }
 0x3f9   :  { %v9774_v36 = vadd.f32 %v3194_v16, %v9748_v58  ;;  %v3196_v32 = vpop.f32.mrb[46].mxu1 }
 0x3fa   :  { %v6463_v21 = vmul.f32 -1.442695, %v9771_v31  ;;  %v9778_v45 = vadd.f32 %v3196_v32, %v9745_v56  ;;  %v3198_v7 = vpop.f32.mrb[47].mxu1 }
 0x3fb   :  { %v6464_v13 = vmul.f32 -1.442695, %v9774_v36  ;;  %v9782_v44 = vadd.f32 %v3198_v7, %v9748_v58 }
 0x3fc   :  { %8055 = vpow2.f32 %v6463_v21  ;;  %v6467_v17 = vmul.f32 -1.442695, %v9778_v45 }
 0x3fd   :  { %v8048_v61 = vpop.eup %8047  ;;  %8057 = vpow2.f32 %v6464_v13  ;;  %v6468_v29 = vmul.f32 -1.442695, %v9782_v44  ;;  %3494 = vmatmul.mubr.bf16.gmra.mrb[152].mxu1 %v9529_v10 }
 0x3fe   :  { %v8050_v37 = vpop.eup %8049  ;;  %v3918_v24 = vadd.f32 1.0, %v8048_v61  ;;  %8059 = vpow2.f32 %v6467_v17  ;;  %3503 = vmatprep.mubr.bf16.mxu1 %v9555_v43 }
 0x3ff   :  { %v8052_v5 = vpop.eup %8051  ;;  %v3919_v3 = vadd.f32 1.0, %v8050_v37  ;;  %8061 = vpow2.f32 %v6468_v29  ;;  %v3202_v38 = vpop.f32.mrb[48].mxu1 }
 0x400   :  { %v8054_v52 = vpop.eup %8053  ;;  %8063 = vrcp.f32 %v3918_v24  ;;  %v3922_v25 = vadd.f32 1.0, %v8052_v5  ;;  %v9789_v46 = vadd.f32 %v3202_v38, %v9745_v56  ;;  %v3204_v51 = vpop.f32.mrb[49].mxu1 }
 0x401   :  { %8065 = vrcp.f32 %v3919_v3  ;;  %v3923_v23 = vadd.f32 1.0, %v8054_v52  ;;  %v9792_v10 = vadd.f32 %v3204_v51, %v9748_v58  ;;  %v3206_v39 = vpop.f32.mrb[50].mxu1 }
 0x402   :  { %8067 = vrcp.f32 %v3922_v25  ;;  %v6471_v43 = vmul.f32 -1.442695, %v9789_v46  ;;  %v9796_v50 = vadd.f32 %v3206_v39, %v9745_v56  ;;  %v3208_v14 = vpop.f32.mrb[51].mxu1 }
 0x403   :  { %8069 = vrcp.f32 %v3923_v23  ;;  %v6472_v30 = vmul.f32 -1.442695, %v9792_v10  ;;  %v9800_v19 = vadd.f32 %v3208_v14, %v9748_v58 }
 0x404   :  { %8071 = vpow2.f32 %v6471_v43  ;;  %v6475_v28 = vmul.f32 -1.442695, %v9796_v50 }
 0x405   :  { %8073 = vpow2.f32 %v6472_v30  ;;  %v6476_v20 = vmul.f32 -1.442695, %v9800_v19  ;;  %3504 = vmatmul.mubr.bf16.gmra.mrb[156].mxu1 %v9550_v55 }
 0x406   :  { %v8056_v0 = vpop.eup %8055  ;;  %8075 = vpow2.f32 %v6475_v28  ;;  %3513 = vmatprep.mubr.bf16.mxu1 %v9579_v2 }
 0x407   :  { %v8058_v57 = vpop.eup %8057  ;;  %v3926_v48 = vadd.f32 1.0, %v8056_v0  ;;  %8077 = vpow2.f32 %v6476_v20  ;;  %v3212_v18 = vpop.f32.mrb[52].mxu1 }
 0x408   :  { %v8060_v9 = vpop.eup %8059  ;;  %v3927_v4 = vadd.f32 1.0, %v8058_v57  ;;  %v9807_v22 = vadd.f32 %v3212_v18, %v9745_v56  ;;  %v3214_v12 = vpop.f32.mrb[53].mxu1 }
 0x409   :  { %v8062_v1 = vpop.eup %8061  ;;  %8079 = vrcp.f32 %v3926_v48  ;;  %v3930_v60 = vadd.f32 1.0, %v8060_v9  ;;  %v9810_v35 = vadd.f32 %v3214_v12, %v9748_v58  ;;  %v3216_v55 = vpop.f32.mrb[54].mxu1 }
 0x40a   :  { %v8064_v8 = vpop.eup %8063  ;;  %8081 = vrcp.f32 %v3927_v4  ;;  %v3931_v2 = vadd.f32 1.0, %v8062_v1  ;;  %v6479_v63 = vmul.f32 -1.442695, %v9807_v22  ;;  %v9814_v42 = vadd.f32 %v3216_v55, %v9745_v56  ;;  %v3218_v40 = vpop.f32.mrb[55].mxu1 }
 0x40b   :  { %v8066_v41 = vpop.eup %8065  ;;  %8083 = vrcp.f32 %v3930_v60  ;;  %v6480_v34 = vmul.f32 -1.442695, %v9810_v35  ;;  %v9818_v11 = vadd.f32 %v3218_v40, %v9748_v58  ;;  %v9822_v32 = vmul.f32 %v8064_v8, %v9753_v47 }
 0x40c   :  { %v8068_v33 = vpop.eup %8067  ;;  %8085 = vrcp.f32 %v3931_v2  ;;  %v6483_v6 = vmul.f32 -1.442695, %v9814_v42  ;;  %v4303_v17 = vmul.f32 %v8066_v41, %v9756_v49 }
 0x40d   :  { %v8070_v16 = vpop.eup %8069  ;;  %v9825_v21 = vmul.f32 %v8068_v33, %v9760_v26  ;;  %8087 = vpow2.f32 %v6479_v63  ;;  %v6484_v7 = vmul.f32 -1.442695, %v9818_v11  ;;  %3514 = vmatmul.mubr.bf16.gmra.mrb[160].mxu1 %v9577_v27  ;;  %v7727_v33 = vld [vmem:[#allocation8 + $0x100] ss:$8 sps:$4 sm:$0xff]  }
 0x40e   :  { %v8072_v13 = vpop.eup %8071  ;;  %v4307_v61 = vmul.f32 %v8070_v16, %v9764_v53  ;;  %8089 = vpow2.f32 %v6480_v34  ;;  %3523 = vmatprep.mubr.bf16.mxu1 %v9604_v59 }
 0x40f   :  { %v8074_v29 = vpop.eup %8073  ;;  %v4430_v47 = vpack.c.bf16 %v9825_v21, %v9822_v32  ;;  %v3934_v37 = vadd.f32 1.0, %v8072_v13  ;;  %8091 = vpow2.f32 %v6483_v6  ;;  %v7735_v32 = vld [vmem:[#allocation8 + $0x124] ss:$8 sps:$4 sm:$0xff]  }
 0x410   :  { %v8076_v26 = vpop.eup %8075  ;;  %v3935_v24 = vadd.f32 1.0, %v8074_v29  ;;  %8093 = vpow2.f32 %v6484_v7  ;;  %v3222_v5 = vpop.f32.mrb[56].mxu1  ;;  %v4431_v3 = vpack.c.bf16 %v4307_v61, %v4303_v17  ;;  %v7732_v61 = vld [vmem:[#allocation8 + $0x114] ss:$8 sps:$4 sm:$0xff]  }
 0x411   :  { %v8078_v27 = vpop.eup %8077  ;;  %8095 = vrcp.f32 %v3934_v37  ;;  %v3938_v38 = vadd.f32 1.0, %v8076_v26  ;;  %v9835_v49 = vadd.f32 %v3222_v5, %v9745_v56  ;;  %v3224_v53 = vpop.f32.mrb[57].mxu1 }
 0x412   :  { %8097 = vrcp.f32 %v3935_v24  ;;  %v3939_v59 = vadd.f32 1.0, %v8078_v27  ;;  %v9838_v52 = vadd.f32 %v3224_v53, %v9748_v58  ;;  %v3226_v25 = vpop.f32.mrb[58].mxu1 }
 0x413   :  { %v8080_v51 = vpop.eup %8079  ;;  %8099 = vrcp.f32 %v3938_v38  ;;  %v6487_v23 = vmul.f32 -1.442695, %v9835_v49  ;;  %v9842_v39 = vadd.f32 %v3226_v25, %v9745_v56  ;;  %v3228_v43 = vpop.f32.mrb[59].mxu1 }
 0x414   :  { %v8082_v14 = vpop.eup %8081  ;;  %8101 = vrcp.f32 %v3939_v59  ;;  %v6488_v30 = vmul.f32 -1.442695, %v9838_v52  ;;  %v9846_v28 = vadd.f32 %v3228_v43, %v9748_v58  ;;  %v9851_v48 = vmul.f32 %v8080_v51, %v9771_v31  ;;  %v7730_v59 = vld [vmem:[#allocation8 + $0x110] ss:$8 sps:$4 sm:$0xff]  }
 0x415   :  { %v8084_v20 = vpop.eup %8083  ;;  %8103 = vpow2.f32 %v6487_v23  ;;  %v6491_v0 = vmul.f32 -1.442695, %v9842_v39  ;;  %3524 = vmatmul.mubr.bf16.gmra.mrb[164].mxu1 %v9602_v54  ;;  %v4311_v12 = vmul.f32 %v8082_v14, %v9774_v36 }
 0x416   :  { %v8086_v57 = vpop.eup %8085  ;;  %v9854_v18 = vmul.f32 %v8084_v20, %v9778_v45  ;;  %8105 = vpow2.f32 %v6488_v30  ;;  %v6492_v9 = vmul.f32 -1.442695, %v9846_v28  ;;  %4922 = vmatprep.mubr.bf16.mxu1 %v4431_v3 }
 0x417   :  { %v8088_v4 = vpop.eup %8087  ;;  %v4315_v1 = vmul.f32 %v8086_v57, %v9782_v44  ;;  %8107 = vpow2.f32 %v6491_v0 }
 0x418   :  { %v8090_v60 = vpop.eup %8089  ;;  %v3942_v55 = vadd.f32 1.0, %v8088_v4  ;;  %8109 = vpow2.f32 %v6492_v9  ;;  %v3232_v54 = vpop.f32.mrb[60].mxu1  ;;  %v4434_v31 = vpack.c.bf16 %v9854_v18, %v9851_v48  ;;  %v7733_v4 = vld [vmem:[#allocation8 + $0x120] ss:$8 sps:$4 sm:$0xff]  }
 0x419   :  { %v8092_v8 = vpop.eup %8091  ;;  %v3943_v45 = vadd.f32 1.0, %v8090_v60  ;;  %v9862_v2 = vadd.f32 %v3232_v54, %v9745_v56  ;;  %v3234_v63 = vpop.f32.mrb[61].mxu1  ;;  %v4435_v40 = vpack.c.bf16 %v4315_v1, %v4311_v12  ;;  %v7738_v54 = vld [vmem:[#allocation8 + $0x134] ss:$8 sps:$4 sm:$0xff]  }
 0x41a   :  { %v8094_v41 = vpop.eup %8093  ;;  %8111 = vrcp.f32 %v3942_v55  ;;  %v3946_v36 = vadd.f32 1.0, %v8092_v8  ;;  %v9865_v44 = vadd.f32 %v3234_v63, %v9748_v58  ;;  %v3236_v34 = vpop.f32.mrb[62].mxu1 }
 0x41b   :  { %v8096_v6 = vpop.eup %8095  ;;  %8113 = vrcp.f32 %v3943_v45  ;;  %v3947_v16 = vadd.f32 1.0, %v8094_v41  ;;  %v6495_v7 = vmul.f32 -1.442695, %v9862_v2  ;;  %v9869_v13 = vadd.f32 %v3236_v34, %v9745_v56  ;;  %v3238_v17 = vpop.f32.mrb[63].mxu1 }
 0x41c   :  { %v8098_v29 = vpop.eup %8097  ;;  %8115 = vrcp.f32 %v3946_v36  ;;  %v6496_v37 = vmul.f32 -1.442695, %v9865_v44  ;;  %v9873_v26 = vadd.f32 %v3238_v17, %v9748_v58  ;;  %v9880_v27 = vmul.f32 %v8096_v6, %v9789_v46  ;;  %v7741_v17 = vld [vmem:[#allocation8 + $0x144] ss:$8 sps:$4 sm:$0xff]  }
 0x41d   :  { %v8100_v24 = vpop.eup %8099  ;;  %8117 = vrcp.f32 %v3947_v16  ;;  %v6499_v5 = vmul.f32 -1.442695, %v9869_v13  ;;  %4923 = vmatmul.mubr.bf16.vlgmr.msra.gmra.mrb[168].mxu1 %v4430_v47  ;;  %v4319_v51 = vmul.f32 %v8098_v29, %v9792_v10 }
 0x41e   :  { %v8102_v3 = vpop.eup %8101  ;;  %v9883_v38 = vmul.f32 %v8100_v24, %v9796_v50  ;;  %8119 = vpow2.f32 %v6495_v7  ;;  %v6500_v53 = vmul.f32 -1.442695, %v9873_v26  ;;  %4932 = vmatprep.mubr.bf16.mxu1 %v4435_v40  ;;  %5084 = vmatpush1.bf16.msra.mxu1 %v7727_v33  ;;  %v7736_v33 = vld [vmem:[#allocation8 + $0x130] ss:$8 sps:$4 sm:$0xff]  }
 0x41f   :  { %v8104_v25 = vpop.eup %8103  ;;  %v4323_v23 = vmul.f32 %v8102_v3, %v9800_v19  ;;  %8121 = vpow2.f32 %v6496_v37  ;;  %5085 = vmatprep.subr.bf16.mxu1 %v7732_v61 }
 0x420   :  { %v8106_v21 = vpop.eup %8105  ;;  %v3950_v46 = vadd.f32 1.0, %v8104_v25  ;;  %8123 = vpow2.f32 %v6499_v5  ;;  %v3242_v47 = vpop.f32.mrb[64].mxu1  ;;  %v4438_v50 = vpack.c.bf16 %v9883_v38, %v9880_v27 }
 0x421   :  { %v8108_v43 = vpop.eup %8107  ;;  %v3951_v14 = vadd.f32 1.0, %v8106_v21  ;;  %8125 = vpow2.f32 %v6500_v53  ;;  %v9891_v30 = vadd.f32 %v3242_v47, %v9745_v56  ;;  %v3244_v20 = vpop.f32.mrb[65].mxu1  ;;  %v4439_v10 = vpack.c.bf16 %v4323_v23, %v4319_v51 }
 0x422   :  { %v8110_v0 = vpop.eup %8109  ;;  %8127 = vrcp.f32 %v3950_v46  ;;  %v3954_v19 = vadd.f32 1.0, %v8108_v43  ;;  %v9894_v57 = vadd.f32 %v3244_v20, %v9748_v58  ;;  %v3246_v9 = vpop.f32.mrb[66].mxu1  ;;  %5086 = vmatpush1.bf16.msra.mxu1 %v7730_v59  ;;  %v7744_v46 = vld [vmem:[#allocation8 + $0x154] ss:$8 sps:$4 sm:$0xff]  }
 0x423   :  { %8129 = vrcp.f32 %v3951_v14  ;;  %v3955_v12 = vadd.f32 1.0, %v8110_v0  ;;  %v6503_v1 = vmul.f32 -1.442695, %v9891_v30  ;;  %v9898_v60 = vadd.f32 %v3246_v9, %v9745_v56  ;;  %v3248_v55 = vpop.f32.mrb[67].mxu1  ;;  %5087 = vmatprep.subr.bf16.mxu1 %v7735_v32 }
 0x424   :  { %v8112_v8 = vpop.eup %8111  ;;  %8131 = vrcp.f32 %v3954_v19  ;;  %v6504_v45 = vmul.f32 -1.442695, %v9894_v57  ;;  %v9902_v63 = vadd.f32 %v3248_v55, %v9748_v58 }
 0x425   :  { %v8114_v40 = vpop.eup %8113  ;;  %8133 = vrcp.f32 %v3955_v12  ;;  %v6507_v41 = vmul.f32 -1.442695, %v9898_v60  ;;  %4933 = vmatmul.mubr.bf16.gmra.mrb[172].mxu1 %v4434_v31  ;;  %v9910_v16 = vmul.f32 %v8112_v8, %v9807_v22 }
 0x426   :  { %v8116_v36 = vpop.eup %8115  ;;  %8135 = vpow2.f32 %v6503_v1  ;;  %v6508_v34 = vmul.f32 -1.442695, %v9902_v63  ;;  %4942 = vmatprep.mubr.bf16.mxu1 %v4439_v10  ;;  %5088 = vmatpush1.bf16.msra.mxu1 %v7733_v4  ;;  %v4327_v48 = vmul.f32 %v8114_v40, %v9810_v35  ;;  %v7742_v4 = vld [vmem:[#allocation8 + $0x150] ss:$8 sps:$4 sm:$0xff]  }
 0x427   :  { %v8118_v6 = vpop.eup %8117  ;;  %v9913_v7 = vmul.f32 %v8116_v36, %v9814_v42  ;;  %8137 = vpow2.f32 %v6504_v45  ;;  %5089 = vmatprep.subr.bf16.mxu1 %v7738_v54  ;;  %v7747_v54 = vld [vmem:[#allocation8 + $0x164] ss:$8 sps:$4 sm:$0xff]  }
 0x428   :  { %v8120_v61 = vpop.eup %8119  ;;  %v4331_v18 = vmul.f32 %v8118_v6, %v9818_v11  ;;  %8139 = vpow2.f32 %v6507_v41  ;;  %v3252_v31 = vpop.f32.mrb[68].mxu1  ;;  %v7739_v11 = vld [vmem:[#allocation8 + $0x140] ss:$8 sps:$4 sm:$0xff]  }
 0x429   :  { %v8122_v29 = vpop.eup %8121  ;;  %v3958_v37 = vadd.f32 1.0, %v8120_v61  ;;  %8141 = vpow2.f32 %v6508_v34  ;;  %v9918_v24 = vadd.f32 %v3252_v31, %v9745_v56  ;;  %v3254_v22 = vpop.f32.mrb[69].mxu1  ;;  %v4442_v42 = vpack.c.bf16 %v9913_v7, %v9910_v16  ;;  %v7745_v6 = vld [vmem:[#allocation8 + $0x160] ss:$8 sps:$4 sm:$0xff]  }
 0x42a   :  { %v8124_v5 = vpop.eup %8123  ;;  %v3959_v3 = vadd.f32 1.0, %v8122_v29  ;;  %v9923_v53 = vadd.f32 %v3254_v22, %v9748_v58  ;;  %v3256_v35 = vpop.f32.mrb[70].mxu1  ;;  %v4443_v59 = vpack.c.bf16 %v4331_v18, %v4327_v48  ;;  %5090 = vmatpush1.bf16.msra.mxu1 %v7736_v33  ;;  %v7750_v29 = vld [vmem:[#allocation8 + $0x174] ss:$8 sps:$4 sm:$0xff]  }
 0x42b   :  { %v8126_v25 = vpop.eup %8125  ;;  %8143 = vrcp.f32 %v3958_v37  ;;  %v3962_v51 = vadd.f32 1.0, %v8124_v5  ;;  %v6511_v23 = vmul.f32 -1.442695, %v9918_v24  ;;  %v9927_v32 = vadd.f32 %v3256_v35, %v9745_v56  ;;  %v3258_v21 = vpop.f32.mrb[71].mxu1  ;;  %5091 = vmatprep.subr.bf16.mxu1 %v7741_v17 }
 0x42c   :  { %v8128_v47 = vpop.eup %8127  ;;  %8145 = vrcp.f32 %v3959_v3  ;;  %v3963_v43 = vadd.f32 1.0, %v8126_v25  ;;  %v6512_v14 = vmul.f32 -1.442695, %v9923_v53  ;;  %v9931_v20 = vadd.f32 %v3258_v21, %v9748_v58  ;;  %v7748_v25 = vld [vmem:[#allocation8 + $0x170] ss:$8 sps:$4 sm:$0xff]  }
 0x42d   :  { %v8130_v10 = vpop.eup %8129  ;;  %8147 = vrcp.f32 %v3962_v51  ;;  %v6515_v0 = vmul.f32 -1.442695, %v9927_v32  ;;  %4943 = vmatmul.mubr.bf16.gmra.mrb[176].mxu1 %v4438_v50  ;;  %v9939_v1 = vmul.f32 %v8128_v47, %v9835_v49 }
 0x42e   :  { %v8132_v19 = vpop.eup %8131  ;;  %8149 = vrcp.f32 %v3963_v43  ;;  %v6516_v9 = vmul.f32 -1.442695, %v9931_v20  ;;  %4952 = vmatprep.mubr.bf16.mxu1 %v4443_v59  ;;  %5092 = vmatpush1.bf16.msra.mxu1 %v7739_v11  ;;  %v4335_v27 = vmul.f32 %v8130_v10, %v9838_v52 }
 0x42f   :  { %v8134_v12 = vpop.eup %8133  ;;  %v9942_v55 = vmul.f32 %v8132_v19, %v9842_v39  ;;  %8151 = vpow2.f32 %v6511_v23  ;;  %5093 = vmatprep.subr.bf16.mxu1 %v7744_v46  ;;  %v7753_v23 = vld [vmem:[#allocation8 + $0x184] ss:$8 sps:$4 sm:$0xff]  }
 0x430   :  { %v8136_v8 = vpop.eup %8135  ;;  %v4339_v38 = vmul.f32 %v8134_v12, %v9846_v28  ;;  %8153 = vpow2.f32 %v6512_v14  ;;  %v3262_v50 = vpop.f32.mrb[72].mxu1 }
 0x431   :  { %v8138_v45 = vpop.eup %8137  ;;  %v3966_v40 = vadd.f32 1.0, %v8136_v8  ;;  %8155 = vpow2.f32 %v6515_v0  ;;  %v9947_v41 = vadd.f32 %v3262_v50, %v9745_v56  ;;  %v3264_v49 = vpop.f32.mrb[73].mxu1  ;;  %v4446_v39 = vpack.c.bf16 %v9942_v55, %v9939_v1 }
 0x432   :  { %v8140_v36 = vpop.eup %8139  ;;  %v3967_v34 = vadd.f32 1.0, %v8138_v45  ;;  %8157 = vpow2.f32 %v6516_v9  ;;  %v9952_v33 = vadd.f32 %v3264_v49, %v9748_v58  ;;  %v3266_v52 = vpop.f32.mrb[74].mxu1  ;;  %v4447_v28 = vpack.c.bf16 %v4339_v38, %v4335_v27  ;;  %5094 = vmatpush1.bf16.msra.mxu1 %v7742_v4  ;;  %v7751_v4 = vld [vmem:[#allocation8 + $0x180] ss:$8 sps:$4 sm:$0xff]   ;;  %v7756_v27 = vld [vmem:[#allocation8 + $0x194] ss:$8 sps:$4 sm:$0xff]  }
 0x433   :  { %v8142_v17 = vpop.eup %8141  ;;  %8159 = vrcp.f32 %v3966_v40  ;;  %v3970_v61 = vadd.f32 1.0, %v8140_v36  ;;  %v6519_v48 = vmul.f32 -1.442695, %v9947_v41  ;;  %v9956_v18 = vadd.f32 %v3266_v52, %v9745_v56  ;;  %v3268_v31 = vpop.f32.mrb[75].mxu1  ;;  %5095 = vmatprep.subr.bf16.mxu1 %v7747_v54 }
 0x434   :  { %8161 = vrcp.f32 %v3967_v34  ;;  %v3971_v37 = vadd.f32 1.0, %v8142_v17  ;;  %v6520_v22 = vmul.f32 -1.442695, %v9952_v33  ;;  %v9960_v5 = vadd.f32 %v3268_v31, %v9748_v58 }
 0x435   :  { %v8144_v3 = vpop.eup %8143  ;;  %8163 = vrcp.f32 %v3970_v61  ;;  %v6523_v35 = vmul.f32 -1.442695, %v9956_v18  ;;  %4953 = vmatmul.mubr.bf16.gmra.mrb[180].mxu1 %v4442_v42 }
 0x436   :  { %v8146_v59 = vpop.eup %8145  ;;  %8165 = vrcp.f32 %v3971_v37  ;;  %v6524_v11 = vmul.f32 -1.442695, %v9960_v5  ;;  %4962 = vmatprep.mubr.bf16.mxu1 %v4447_v28  ;;  %5096 = vmatpush1.bf16.msra.mxu1 %v7745_v6  ;;  %v9968_v46 = vmul.f32 %v8144_v3, %v9862_v2  ;;  %v7754_v6 = vld [vmem:[#allocation8 + $0x190] ss:$8 sps:$4 sm:$0xff]  }
 0x437   :  { %v8148_v51 = vpop.eup %8147  ;;  %8167 = vpow2.f32 %v6519_v48  ;;  %5097 = vmatprep.subr.bf16.mxu1 %v7750_v29  ;;  %v4343_v42 = vmul.f32 %v8146_v59, %v9865_v44  ;;  %v7759_v48 = vld [vmem:[#allocation8 + $0x1a4] ss:$8 sps:$4 sm:$0xff]  }
 0x438   :  { %v8150_v21 = vpop.eup %8149  ;;  %v9971_v47 = vmul.f32 %v8148_v51, %v9869_v13  ;;  %8169 = vpow2.f32 %v6520_v22  ;;  %v3272_v16 = vpop.f32.mrb[76].mxu1 }
 0x439   :  { %v8152_v7 = vpop.eup %8151  ;;  %v4347_v43 = vmul.f32 %v8150_v21, %v9873_v26  ;;  %8171 = vpow2.f32 %v6523_v35  ;;  %v9976_v14 = vadd.f32 %v3272_v16, %v9745_v56  ;;  %v3274_v10 = vpop.f32.mrb[77].mxu1 }
 0x43a   :  { %v8154_v0 = vpop.eup %8153  ;;  %v3974_v19 = vadd.f32 1.0, %v8152_v7  ;;  %8173 = vpow2.f32 %v6524_v11  ;;  %v9979_v2 = vadd.f32 %v3274_v10, %v9748_v58  ;;  %v3276_v13 = vpop.f32.mrb[78].mxu1  ;;  %v4450_v9 = vpack.c.bf16 %v9971_v47, %v9968_v46  ;;  %5098 = vmatpush1.bf16.msra.mxu1 %v7748_v25  ;;  %v7757_v25 = vld [vmem:[#allocation8 + $0x1a0] ss:$8 sps:$4 sm:$0xff]   ;;  %v7762_v7 = vld [vmem:[#allocation8 + $0x1b4] ss:$8 sps:$4 sm:$0xff]  }
 0x43b   :  { %v8156_v44 = vpop.eup %8155  ;;  %v3975_v12 = vadd.f32 1.0, %v8154_v0  ;;  %v9984_v26 = vadd.f32 %v3276_v13, %v9745_v56  ;;  %v3278_v54 = vpop.f32.mrb[79].mxu1  ;;  %v4451_v8 = vpack.c.bf16 %v4347_v43, %v4343_v42  ;;  %5099 = vmatprep.subr.bf16.mxu1 %v7753_v23  ;;  %v6527_v45 = vmul.f32 -1.442695, %v9976_v14 }
 0x43c   :  { %v8158_v38 = vpop.eup %8157  ;;  %8175 = vrcp.f32 %v3974_v19  ;;  %v3978_v50 = vadd.f32 1.0, %v8156_v44  ;;  %v9988_v40 = vadd.f32 %v3278_v54, %v9748_v58  ;;  %v6528_v34 = vmul.f32 -1.442695, %v9979_v2 }
 0x43d   :  { %v8160_v49 = vpop.eup %8159  ;;  %8177 = vrcp.f32 %v3975_v12  ;;  %v3979_v36 = vadd.f32 1.0, %v8158_v38  ;;  %4963 = vmatmul.mubr.bf16.gmra.mrb[184].mxu1 %v4446_v39  ;;  %v6531_v28 = vmul.f32 -1.442695, %v9984_v26  ;;  %v7760_v12 = vld [vmem:[#allocation8 + $0x1b0] ss:$8 sps:$4 sm:$0xff]  }
 0x43e   :  { %v8162_v52 = vpop.eup %8161  ;;  %8179 = vrcp.f32 %v3978_v50  ;;  %4972 = vmatprep.mubr.bf16.mxu1 %v4451_v8  ;;  %5100 = vmatpush1.bf16.msra.mxu1 %v7751_v4  ;;  %v6532_v61 = vmul.f32 -1.442695, %v9988_v40  ;;  %v9997_v29 = vmul.f32 %v8160_v49, %v9891_v30 }
 0x43f   :  { %v8164_v17 = vpop.eup %8163  ;;  %8181 = vrcp.f32 %v3979_v36  ;;  %5101 = vmatprep.subr.bf16.mxu1 %v7756_v27  ;;  %v7765_v27 = vld [vmem:[#allocation8 + $0x1c4] ss:$8 sps:$4 sm:$0xff]  }
 0x440   :  { %v8166_v31 = vpop.eup %8165  ;;  %v10000_v1 = vmul.f32 %v8164_v17, %v9898_v60  ;;  %8183 = vpow2.f32 %v6527_v45  ;;  %v3282_v55 = vpop.f32.mrb[80].mxu1 }
 0x441   :  { %v8168_v39 = vpop.eup %8167  ;;  %v4355_v37 = vmul.f32 %v8166_v31, %v9902_v63  ;;  %8185 = vpow2.f32 %v6528_v34  ;;  %v10004_v22 = vadd.f32 %v3282_v55, %v9745_v56  ;;  %v3284_v3 = vpop.f32.mrb[81].mxu1  ;;  %v4351_v63 = vmul.f32 %v8162_v52, %v9894_v57 }
 0x442   :  { %v8170_v35 = vpop.eup %8169  ;;  %v3982_v59 = vadd.f32 1.0, %v8168_v39  ;;  %8187 = vpow2.f32 %v6531_v28  ;;  %v10007_v11 = vadd.f32 %v3284_v3, %v9748_v58  ;;  %v3286_v30 = vpop.f32.mrb[82].mxu1  ;;  %v4454_v60 = vpack.c.bf16 %v10000_v1, %v9997_v29  ;;  %5102 = vmatpush1.bf16.msra.mxu1 %v7754_v6  ;;  %v7763_v6 = vld [vmem:[#allocation8 + $0x1c0] ss:$8 sps:$4 sm:$0xff]  }
 0x443   :  { %v8172_v51 = vpop.eup %8171  ;;  %v3983_v23 = vadd.f32 1.0, %v8170_v35  ;;  %8189 = vpow2.f32 %v6532_v61  ;;  %v10013_v21 = vadd.f32 %v3286_v30, %v9745_v56  ;;  %v3288_v16 = vpop.f32.mrb[83].mxu1  ;;  %5103 = vmatprep.subr.bf16.mxu1 %v7759_v48  ;;  %v6535_v10 = vmul.f32 -1.442695, %v10004_v22 }
 0x444   :  { %v8174_v42 = vpop.eup %8173  ;;  %8191 = vrcp.f32 %v3982_v59  ;;  %v3986_v43 = vadd.f32 1.0, %v8172_v51  ;;  %v10017_v0 = vadd.f32 %v3288_v16, %v9748_v58  ;;  %v6536_v57 = vmul.f32 -1.442695, %v10007_v11 }
 0x445   :  { %8193 = vrcp.f32 %v3983_v23  ;;  %v3987_v19 = vadd.f32 1.0, %v8174_v42  ;;  %4973 = vmatmul.mubr.bf16.gmra.mrb[188].mxu1 %v4450_v9  ;;  %v4455_v13 = vpack.c.bf16 %v4355_v37, %v4351_v63  ;;  %v6539_v44 = vmul.f32 -1.442695, %v10013_v21  ;;  %v7766_v63 = vld [vmem:[#allocation8 + $0x1d0] ss:$8 sps:$4 sm:$0xff]  }
 0x446   :  { %v8176_v4 = vpop.eup %8175  ;;  %8195 = vrcp.f32 %v3986_v43  ;;  %5104 = vmatpush1.bf16.msra.mxu1 %v7757_v25  ;;  %v6540_v8 = vmul.f32 -1.442695, %v10017_v0 }
 0x447   :  { %v8178_v54 = vpop.eup %8177  ;;  %8197 = vrcp.f32 %v3987_v19  ;;  %4982 = vmatprep.mubr.bf16.mxu1 %v4455_v13  ;;  %5105 = vmatprep.subr.bf16.mxu1 %v7762_v7  ;;  %v7771_v7 = vld [vmem:[#allocation8 + $0x1e4] ss:$8 sps:$4 sm:$0xff]  }
 0x448   :  { %v8180_v38 = vpop.eup %8179  ;;  %8199 = vpow2.f32 %v6535_v10  ;;  %v3292_v50 = vpop.f32.mrb[84].mxu1  ;;  %v4359_v36 = vmul.f32 %v8178_v54, %v9923_v53  ;;  %v7768_v53 = vld [vmem:[#allocation8 + $0x1d4] ss:$8 sps:$4 sm:$0xff]  }
 0x449   :  { %v8182_v45 = vpop.eup %8181  ;;  %v10026_v46 = vmul.f32 %v8180_v38, %v9927_v32  ;;  %8201 = vpow2.f32 %v6536_v57  ;;  %v10029_v47 = vadd.f32 %v3292_v50, %v9745_v56  ;;  %v3294_v9 = vpop.f32.mrb[85].mxu1  ;;  %v4358_v32 = vmul.f32 %v8176_v4, %v9918_v24 }
 0x44a   :  { %v8184_v49 = vpop.eup %8183  ;;  %v4363_v34 = vmul.f32 %v8182_v45, %v9931_v20  ;;  %8203 = vpow2.f32 %v6539_v44  ;;  %v10034_v52 = vadd.f32 %v3294_v9, %v9748_v58  ;;  %v3296_v28 = vpop.f32.mrb[86].mxu1  ;;  %5106 = vmatpush1.bf16.msra.mxu1 %v7760_v12  ;;  %v7769_v12 = vld [vmem:[#allocation8 + $0x1e0] ss:$8 sps:$4 sm:$0xff]  }
 0x44b   :  { %v8186_v17 = vpop.eup %8185  ;;  %v3990_v61 = vadd.f32 1.0, %v8184_v49  ;;  %8205 = vpow2.f32 %v6540_v8  ;;  %v10038_v48 = vadd.f32 %v3296_v28, %v9745_v56  ;;  %v3298_v31 = vpop.f32.mrb[87].mxu1  ;;  %5107 = vmatprep.subr.bf16.mxu1 %v7765_v27  ;;  %v6543_v59 = vmul.f32 -1.442695, %v10029_v47 }
 0x44c   :  { %v8188_v55 = vpop.eup %8187  ;;  %v3991_v20 = vadd.f32 1.0, %v8186_v17  ;;  %v10041_v39 = vadd.f32 %v3298_v31, %v9748_v58  ;;  %v4459_v37 = vpack.c.bf16 %v4363_v34, %v4359_v36  ;;  %v4458_v24 = vpack.c.bf16 %v10026_v46, %v4358_v32 }
 0x44d   :  { %v8190_v3 = vpop.eup %8189  ;;  %8207 = vrcp.f32 %v3990_v61  ;;  %v3994_v35 = vadd.f32 1.0, %v8188_v55  ;;  %4983 = vmatmul.mubr.bf16.gmra.mrb[192].mxu1 %v4454_v60  ;;  %v6544_v51 = vmul.f32 -1.442695, %v10034_v52  ;;  %v6547_v16 = vmul.f32 -1.442695, %v10038_v48 }
 0x44e   :  { %v8192_v30 = vpop.eup %8191  ;;  %8209 = vrcp.f32 %v3991_v20  ;;  %v3995_v25 = vadd.f32 1.0, %v8190_v3  ;;  %4992 = vmatprep.mubr.bf16.mxu1 %v4459_v37  ;;  %5108 = vmatpush1.bf16.msra.mxu1 %v7763_v6  ;;  %v6548_v29 = vmul.f32 -1.442695, %v10041_v39 }
 0x44f   :  { %v8194_v23 = vpop.eup %8193  ;;  %8211 = vrcp.f32 %v3994_v35  ;;  %5109 = vmatprep.subr.bf16.mxu1 %v7768_v53 }
 0x450   :  { %v8196_v42 = vpop.eup %8195  ;;  %8213 = vrcp.f32 %v3995_v25  ;;  %v3302_v1 = vpop.f32.mrb[88].mxu1  ;;  %v4367_v8 = vmul.f32 %v8194_v23, %v9952_v33 }
 0x451   :  { %v8198_v60 = vpop.eup %8197  ;;  %8215 = vpow2.f32 %v6543_v59  ;;  %v10052_v43 = vadd.f32 %v3302_v1, %v9745_v56  ;;  %v3304_v10 = vpop.f32.mrb[89].mxu1  ;;  %v10055_v57 = vmul.f32 %v8196_v42, %v9956_v18  ;;  %v7774_v18 = vld [vmem:[#allocation8 + $0x1f4] ss:$8 sps:$4 sm:$0xff]  }
 0x452   :  { %v8200_v19 = vpop.eup %8199  ;;  %v4371_v13 = vmul.f32 %v8198_v60, %v9960_v5  ;;  %8217 = vpow2.f32 %v6544_v51  ;;  %v10059_v4 = vadd.f32 %v3304_v10, %v9748_v58  ;;  %v3306_v44 = vpop.f32.mrb[90].mxu1  ;;  %5110 = vmatpush1.bf16.msra.mxu1 %v7766_v63  ;;  %v4366_v5 = vmul.f32 %v8192_v30, %v9947_v41  ;;  %v7772_v41 = vld [vmem:[#allocation8 + $0x1f0] ss:$8 sps:$4 sm:$0xff]  }
 0x453   :  { %v8202_v54 = vpop.eup %8201  ;;  %v3998_v27 = vadd.f32 1.0, %v8200_v19  ;;  %8219 = vpow2.f32 %v6547_v16  ;;  %v10063_v38 = vadd.f32 %v3306_v44, %v9745_v56  ;;  %v3308_v50 = vpop.f32.mrb[91].mxu1  ;;  %5111 = vmatprep.subr.bf16.mxu1 %v7771_v7  ;;  %v6551_v33 = vmul.f32 -1.442695, %v10052_v43 }
 0x454   :  { %v8204_v45 = vpop.eup %8203  ;;  %v3999_v46 = vadd.f32 1.0, %v8202_v54  ;;  %8221 = vpow2.f32 %v6548_v29  ;;  %v10067_v9 = vadd.f32 %v3308_v50, %v9748_v58  ;;  %v4463_v34 = vpack.c.bf16 %v4371_v13, %v4367_v8 }
 0x455   :  { %v8206_v49 = vpop.eup %8205  ;;  %8223 = vrcp.f32 %v3998_v27  ;;  %v4002_v36 = vadd.f32 1.0, %v8204_v45  ;;  %4993 = vmatmul.mubr.bf16.gmra.mrb[196].mxu1 %v4458_v24  ;;  %v6552_v6 = vmul.f32 -1.442695, %v10059_v4  ;;  %v4462_v17 = vpack.c.bf16 %v10055_v57, %v4366_v5 }
 0x456   :  { %8225 = vrcp.f32 %v3999_v46  ;;  %v4003_v28 = vadd.f32 1.0, %v8206_v49  ;;  %5112 = vmatpush1.bf16.msra.mxu1 %v7769_v12  ;;  %v6555_v61 = vmul.f32 -1.442695, %v10063_v38  ;;  %5002 = vmatprep.mubr.bf16.mxu1 %v4463_v34  ;;  %v6556_v53 = vmul.f32 -1.442695, %v10067_v9 }
 0x457   :  { %v8208_v32 = vpop.eup %8207  ;;  %8227 = vrcp.f32 %v4002_v36  ;;  %5113 = vmatprep.subr.bf16.mxu1 %v7774_v18 }
 0x458   :  { %v8210_v31 = vpop.eup %8209  ;;  %8229 = vrcp.f32 %v4003_v28  ;;  %v3312_v55 = vpop.f32.mrb[92].mxu1 }
 0x459   :  { %v8212_v20 = vpop.eup %8211  ;;  %8231 = vpow2.f32 %v6551_v33  ;;  %v10075_v37 = vadd.f32 %v3312_v55, %v9745_v56  ;;  %v3314_v3 = vpop.f32.mrb[93].mxu1  ;;  %v4375_v59 = vmul.f32 %v8210_v31, %v9979_v2  ;;  %v4374_v2 = vmul.f32 %v8208_v32, %v9976_v14 }
 0x45a   :  { %v8214_v35 = vpop.eup %8213  ;;  %v4378_v24 = vmul.f32 %v8212_v20, %v9984_v26  ;;  %8233 = vpow2.f32 %v6552_v6  ;;  %v10080_v30 = vadd.f32 %v3314_v3, %v9748_v58  ;;  %v3316_v25 = vpop.f32.mrb[94].mxu1  ;;  %5114 = vmatpush1.bf16.msra.mxu1 %v7772_v41 }
 0x45b   :  { %v8216_v51 = vpop.eup %8215  ;;  %v4379_v63 = vmul.f32 %v8214_v35, %v9988_v40  ;;  %8235 = vpow2.f32 %v6555_v61  ;;  %v6559_v23 = vmul.f32 -1.442695, %v10075_v37  ;;  %v10085_v16 = vadd.f32 %v3316_v25, %v9745_v56  ;;  %v3318_v7 = vpop.f32.mrb[95].mxu1  ;;  %v10883_v35 = vld [vmem:[#allocation16_spill] sm:$0xff] }
 0x45c   :  { %v8218_v42 = vpop.eup %8217  ;;  %v4006_v26 = vadd.f32 1.0, %v8216_v51  ;;  %8237 = vpow2.f32 %v6556_v53  ;;  %v10089_v29 = vadd.f32 %v3318_v7, %v9748_v58  ;;  %v6560_v57 = vmul.f32 -1.442695, %v10080_v30 }
 0x45d   :  { %v8220_v1 = vpop.eup %8219  ;;  %v4007_v60 = vadd.f32 1.0, %v8218_v42  ;;  %8239 = vpow2.f32 %v6559_v23  ;;  %5003 = vmatmul.mubr.bf16.gmra.mrb[200].mxu1 %v4462_v17  ;;  %v4467_v40 = vpack.c.bf16 %v4379_v63, %v4375_v59  ;;  %v4466_v13 = vpack.c.bf16 %v4378_v24, %v4374_v2 }
 0x45e   :  { %v8222_v10 = vpop.eup %8221  ;;  %8241 = vrcp.f32 %v4006_v26  ;;  %v4010_v19 = vadd.f32 1.0, %v8220_v1  ;;  %v6563_v14 = vmul.f32 -1.442695, %v10085_v16  ;;  %v6564_v8 = vmul.f32 -1.442695, %v10089_v29 }
 0x45f   :  { %v8224_v44 = vpop.eup %8223  ;;  %8243 = vrcp.f32 %v4007_v60  ;;  %v4011_v12 = vadd.f32 1.0, %v8222_v10  ;;  %5012 = vmatprep.mubr.bf16.mxu1 %v4467_v40  ;;  %v2818_v59 = vsub.s32 2, %v10883_v35 }
 0x460   :  { %v8226_v54 = vpop.eup %8225  ;;  %8245 = vrcp.f32 %v4010_v19  ;;  %v3322_v27 = vpop.f32.mrb[96].mxu1  ;;  %v4382_v32 = vmul.f32 %v8224_v44, %v10004_v22  ;;  %v8815_v19 = vld [vmem:[%s10870_s4] sm:$0xf] }
 0x461   :  { %v8228_v50 = vpop.eup %8227  ;;  %8247 = vrcp.f32 %v4011_v12  ;;  %v10095_v18 = vadd.f32 %v3322_v27, %v9745_v56  ;;  %v3324_v45 = vpop.f32.mrb[97].mxu1  ;;  %v4383_v46 = vmul.f32 %v8226_v54, %v10007_v11 }
 0x462   :  { %v8230_v5 = vpop.eup %8229  ;;  %v4386_v49 = vmul.f32 %v8228_v50, %v10013_v21  ;;  %8249 = vpow2.f32 %v6560_v57  ;;  %v3326_v36 = vpop.f32.mrb[98].mxu1  ;;  %v10102_v6 = vadd.f32 %v3324_v45, %v9748_v58  ;;  %v10122_v57 = vrot.slane %v8815_v19, %v2818_v59 }
 0x463   :  { %v8232_v33 = vpop.eup %8231  ;;  %v4387_v34 = vmul.f32 %v8230_v5, %v10017_v0  ;;  %8251 = vpow2.f32 %v6563_v14  ;;  %v6567_v28 = vmul.f32 -1.442695, %v10095_v18  ;;  %v3328_v17 = vpop.f32.mrb[99].mxu1  ;;  %v10106_v11 = vadd.f32 %v3326_v36, %v9745_v56 }
 0x464   :  { %v8234_v41 = vpop.eup %8233  ;;  %v4014_v61 = vadd.f32 1.0, %v8232_v33  ;;  %8253 = vpow2.f32 %v6564_v8  ;;  %v10109_v0 = vadd.f32 %v3328_v17, %v9748_v58  ;;  %v4470_v3 = vpack.c.bf16 %v4386_v49, %v4382_v32 }
 0x465   :  { %v8236_v21 = vpop.eup %8235  ;;  %v4015_v31 = vadd.f32 1.0, %v8234_v41  ;;  %8255 = vpow2.f32 %v6567_v28  ;;  %5013 = vmatmul.mubr.bf16.gmra.mrb[204].mxu1 %v4466_v13  ;;  %v4471_v53 = vpack.c.bf16 %v4387_v34, %v4383_v46  ;;  %v6568_v25 = vmul.f32 -1.442695, %v10102_v6 }
 0x466   :  { %v8238_v55 = vpop.eup %8237  ;;  %8257 = vrcp.f32 %v4014_v61  ;;  %v4018_v20 = vadd.f32 1.0, %v8236_v21  ;;  %v6571_v23 = vmul.f32 -1.442695, %v10106_v11  ;;  %v6572_v2 = vmul.f32 -1.442695, %v10109_v0 }
 0x467   :  { %v8240_v22 = vpop.eup %8239  ;;  %8259 = vrcp.f32 %v4015_v31  ;;  %v4019_v24 = vadd.f32 1.0, %v8238_v55  ;;  %5022 = vmatprep.mubr.bf16.mxu1 %v4471_v53  ;;  %v2822_v13 = vsub.s32 3, %v10883_v35 }
 0x468   :  { %v8242_v51 = vpop.eup %8241  ;;  %8261 = vrcp.f32 %v4018_v20  ;;  %v4022_v63 = vadd.f32 1.0, %v8240_v22  ;;  %v3332_v7 = vpop.f32.mrb[100].mxu1 }
 0x469   :  { %v8244_v42 = vpop.eup %8243  ;;  %8263 = vrcp.f32 %v4019_v24  ;;  %v10116_v26 = vadd.f32 %v3332_v7, %v9745_v56  ;;  %v3334_v1 = vpop.f32.mrb[101].mxu1  ;;  %v4390_v40 = vmul.f32 %v8242_v51, %v10029_v47  ;;  %v10138_v28 = vrot.slane %v8815_v19, %v2822_v13 }
 0x46a   :  { %v8246_v60 = vpop.eup %8245  ;;  %8265 = vrcp.f32 %v4022_v63  ;;  %v3336_v10 = vpop.f32.mrb[102].mxu1  ;;  %v10128_v54 = vadd.f32 %v3334_v1, %v9748_v58  ;;  %v4391_v27 = vmul.f32 %v8244_v42, %v10034_v52 }
 0x46b   :  { %v8248_v44 = vpop.eup %8247  ;;  %v4394_v12 = vmul.f32 %v8246_v60, %v10038_v48  ;;  %8267 = vpow2.f32 %v6568_v25  ;;  %v6575_v14 = vmul.f32 -1.442695, %v10116_v26  ;;  %v3338_v47 = vpop.f32.mrb[103].mxu1  ;;  %v10133_v45 = vadd.f32 %v3336_v10, %v9745_v56 }
 0x46c   :  { %v8250_v8 = vpop.eup %8249  ;;  %v4395_v50 = vmul.f32 %v8248_v44, %v10041_v39  ;;  %8269 = vpow2.f32 %v6571_v23  ;;  %v10136_v48 = vadd.f32 %v3338_v47, %v9748_v58  ;;  %v6576_v56 = vmul.f32 -1.442695, %v10128_v54 }
 0x46d   :  { %v8252_v5 = vpop.eup %8251  ;;  %v4023_v46 = vadd.f32 1.0, %v8250_v8  ;;  %8271 = vpow2.f32 %v6572_v2  ;;  %5023 = vmatmul.mubr.bf16.gmra.mrb[208].mxu1 %v4470_v3  ;;  %v4474_v49 = vpack.c.bf16 %v4394_v12, %v4390_v40  ;;  %v6579_v32 = vmul.f32 -1.442695, %v10133_v45 }
 0x46e   :  { %v8254_v36 = vpop.eup %8253  ;;  %v4026_v33 = vadd.f32 1.0, %v8252_v5  ;;  %8273 = vpow2.f32 %v6575_v14  ;;  %v4475_v34 = vpack.c.bf16 %v4395_v50, %v4391_v27  ;;  %v6580_v21 = vmul.f32 -1.442695, %v10136_v48 }
 0x46f   :  { %v8256_v52 = vpop.eup %8255  ;;  %8275 = vrcp.f32 %v4023_v46  ;;  %v4027_v39 = vadd.f32 1.0, %v8254_v36 }
 0x470   :  { %v8258_v17 = vpop.eup %8257  ;;  %8277 = vrcp.f32 %v4026_v33  ;;  %v4030_v41 = vadd.f32 1.0, %v8256_v52  ;;  %5032 = vmatprep.mubr.bf16.mxu1 %v4475_v34  ;;  %v3375_v58 = vpop.f32.mrb[104].mxu1 }
 0x471   :  { %v8260_v61 = vpop.eup %8259  ;;  %8279 = vrcp.f32 %v4027_v39  ;;  %v10144_v31 = vadd.f32 %v3375_v58, %v10122_v57  ;;  %v3377_v53 = vpop.f32.mrb[105].mxu1  ;;  %v4398_v20 = vmul.f32 %v8258_v17, %v10052_v43 }
 0x472   :  { %v8262_v55 = vpop.eup %8261  ;;  %8281 = vrcp.f32 %v4030_v41  ;;  %v10148_v3 = vadd.f32 %v3377_v53, %v10138_v28  ;;  %v3379_v35 = vpop.f32.mrb[106].mxu1  ;;  %v4399_v22 = vmul.f32 %v8260_v61, %v10059_v4 }
 0x473   :  { %v8264_v59 = vpop.eup %8263  ;;  %v4402_v24 = vmul.f32 %v8262_v55, %v10063_v38  ;;  %8283 = vpow2.f32 %v6576_v56  ;;  %v6457_v25 = vmul.f32 -1.442695, %v10144_v31  ;;  %v3381_v51 = vpop.f32.mrb[107].mxu1  ;;  %v10156_v7 = vadd.f32 %v3379_v35, %v10122_v57 }
 0x474   :  { %v8266_v63 = vpop.eup %8265  ;;  %v4403_v23 = vmul.f32 %v8264_v59, %v10067_v9  ;;  %8285 = vpow2.f32 %v6579_v32  ;;  %v6458_v43 = vmul.f32 -1.442695, %v10148_v3  ;;  %v10159_v2 = vadd.f32 %v3381_v51, %v10138_v28 }
 0x475   :  { %v8268_v42 = vpop.eup %8267  ;;  %8287 = vpow2.f32 %v6580_v21  ;;  %5033 = vmatmul.mubr.bf16.gmra.mrb[212].mxu1 %v4474_v49  ;;  %v4478_v4 = vpack.c.bf16 %v4402_v24, %v4398_v20  ;;  %v6461_v13 = vmul.f32 -1.442695, %v10156_v7  ;;  %v4406_v36 = vmul.f32 %v8266_v63, %v10075_v37 }
 0x476   :  { %v8270_v38 = vpop.eup %8269  ;;  %v4031_v1 = vadd.f32 1.0, %v8268_v42  ;;  %8289 = vpow2.f32 %v6457_v25  ;;  %v4479_v60 = vpack.c.bf16 %v4403_v23, %v4399_v22  ;;  %v6462_v47 = vmul.f32 -1.442695, %v10159_v2 }
 0x477   :  { %v8272_v40 = vpop.eup %8271  ;;  %v4034_v10 = vadd.f32 1.0, %v8270_v38  ;;  %8291 = vpow2.f32 %v6458_v43 }
 0x478   :  { %v8274_v9 = vpop.eup %8273  ;;  %8293 = vrcp.f32 %v4031_v1  ;;  %v4035_v19 = vadd.f32 1.0, %v8272_v40  ;;  %5042 = vmatprep.mubr.bf16.mxu1 %v4479_v60  ;;  %v3385_v44 = vpop.f32.mrb[108].mxu1 }
 0x479   :  { %v8276_v12 = vpop.eup %8275  ;;  %8295 = vrcp.f32 %v4034_v10  ;;  %v4038_v14 = vadd.f32 1.0, %v8274_v9  ;;  %v10164_v8 = vadd.f32 %v3385_v44, %v10122_v57  ;;  %v3387_v27 = vpop.f32.mrb[109].mxu1 }
 0x47a   :  { %v8278_v50 = vpop.eup %8277  ;;  %8297 = vrcp.f32 %v4035_v19  ;;  %v10167_v5 = vadd.f32 %v3387_v27, %v10138_v28  ;;  %v3389_v46 = vpop.f32.mrb[110].mxu1  ;;  %v4407_v56 = vmul.f32 %v8276_v12, %v10080_v30 }
 0x47b   :  { %v8280_v49 = vpop.eup %8279  ;;  %v4410_v33 = vmul.f32 %v8278_v50, %v10085_v16  ;;  %8299 = vrcp.f32 %v4038_v14  ;;  %v6465_v34 = vmul.f32 -1.442695, %v10164_v8  ;;  %v3391_v52 = vpop.f32.mrb[111].mxu1  ;;  %v10176_v58 = vadd.f32 %v3389_v46, %v10122_v57 }
 0x47c   :  { %v8282_v39 = vpop.eup %8281  ;;  %v4411_v17 = vmul.f32 %v8280_v49, %v10089_v29  ;;  %8301 = vpow2.f32 %v6461_v13  ;;  %v6466_v41 = vmul.f32 -1.442695, %v10167_v5  ;;  %v10179_v21 = vadd.f32 %v3391_v52, %v10138_v28 }
 0x47d   :  { %v8284_v32 = vpop.eup %8283  ;;  %8303 = vpow2.f32 %v6462_v47  ;;  %5043 = vmatmul.mubr.bf16.gmra.mrb[216].mxu1 %v4478_v4  ;;  %v4482_v37 = vpack.c.bf16 %v4410_v33, %v4406_v36  ;;  %v6469_v24 = vmul.f32 -1.442695, %v10176_v58  ;;  %v4414_v10 = vmul.f32 %v8282_v39, %v10095_v18 }
 0x47e   :  { %v8286_v16 = vpop.eup %8285  ;;  %v4039_v61 = vadd.f32 1.0, %v8284_v32  ;;  %8305 = vpow2.f32 %v6465_v34  ;;  %v4483_v53 = vpack.c.bf16 %v4411_v17, %v4407_v56  ;;  %v6470_v43 = vmul.f32 -1.442695, %v10179_v21 }
 0x47f   :  { %v8288_v30 = vpop.eup %8287  ;;  %v4042_v55 = vadd.f32 1.0, %v8286_v16  ;;  %8307 = vpow2.f32 %v6466_v41 }
 0x480   :  { %v8290_v29 = vpop.eup %8289  ;;  %8309 = vrcp.f32 %v4039_v61  ;;  %v4043_v20 = vadd.f32 1.0, %v8288_v30  ;;  %5052 = vmatprep.mubr.bf16.mxu1 %v4483_v53  ;;  %v3395_v35 = vpop.f32.mrb[112].mxu1 }
 0x481   :  { %v8292_v59 = vpop.eup %8291  ;;  %8311 = vrcp.f32 %v4042_v55  ;;  %v3920_v22 = vadd.f32 1.0, %v8290_v29  ;;  %v10183_v25 = vadd.f32 %v3395_v35, %v10122_v57  ;;  %v3397_v51 = vpop.f32.mrb[113].mxu1 }
 0x482   :  { %v8294_v63 = vpop.eup %8293  ;;  %8313 = vrcp.f32 %v4043_v20  ;;  %v3921_v23 = vadd.f32 1.0, %v8292_v59  ;;  %v10187_v42 = vadd.f32 %v3397_v51, %v10138_v28  ;;  %v3399_v4 = vpop.f32.mrb[114].mxu1 }
 0x483   :  { %v8296_v38 = vpop.eup %8295  ;;  %8315 = vrcp.f32 %v3920_v22  ;;  %v6473_v1 = vmul.f32 -1.442695, %v10183_v25  ;;  %v3401_v60 = vpop.f32.mrb[115].mxu1  ;;  %v4415_v44 = vmul.f32 %v8294_v63, %v10102_v6  ;;  %v10196_v14 = vadd.f32 %v3399_v4, %v10122_v57 }
 0x484   :  { %v8298_v40 = vpop.eup %8297  ;;  %v4418_v9 = vmul.f32 %v8296_v38, %v10106_v11  ;;  %8317 = vrcp.f32 %v3921_v23  ;;  %v6474_v19 = vmul.f32 -1.442695, %v10187_v42  ;;  %v10199_v27 = vadd.f32 %v3401_v60, %v10138_v28 }
 0x485   :  { %v8300_v13 = vpop.eup %8299  ;;  %v4419_v12 = vmul.f32 %v8298_v40, %v10109_v0  ;;  %8319 = vpow2.f32 %v6469_v24  ;;  %5053 = vmatmul.mubr.bf16.gmra.mrb[220].mxu1 %v4482_v37  ;;  %v6477_v34 = vmul.f32 -1.442695, %v10196_v14 }
 0x486   :  { %v8302_v47 = vpop.eup %8301  ;;  %8321 = vpow2.f32 %v6470_v43  ;;  %v4486_v18 = vpack.c.bf16 %v4418_v9, %v4414_v10  ;;  %v6478_v41 = vmul.f32 -1.442695, %v10199_v27  ;;  %v4422_v29 = vmul.f32 %v8300_v13, %v10116_v26 }
 0x487   :  { %v8304_v11 = vpop.eup %8303  ;;  %v3924_v50 = vadd.f32 1.0, %v8302_v47  ;;  %8323 = vpow2.f32 %v6473_v1  ;;  %v4487_v46 = vpack.c.bf16 %v4419_v12, %v4415_v44 }
 0x488   :  { %v8306_v49 = vpop.eup %8305  ;;  %v3925_v36 = vadd.f32 1.0, %v8304_v11  ;;  %8325 = vpow2.f32 %v6474_v19  ;;  %v3405_v6 = vpop.f32.mrb[116].mxu1 }
 0x489   :  { %v8308_v0 = vpop.eup %8307  ;;  %8327 = vrcp.f32 %v3924_v50  ;;  %v3928_v33 = vadd.f32 1.0, %v8306_v49  ;;  %5062 = vmatprep.mubr.bf16.mxu1 %v4487_v46  ;;  %v10203_v52 = vadd.f32 %v3405_v6, %v10122_v57  ;;  %v3407_v39 = vpop.f32.mrb[117].mxu1 }
 0x48a   :  { %v8310_v56 = vpop.eup %8309  ;;  %8329 = vrcp.f32 %v3925_v36  ;;  %v3929_v17 = vadd.f32 1.0, %v8308_v0  ;;  %v10207_v32 = vadd.f32 %v3407_v39, %v10138_v28  ;;  %v3409_v37 = vpop.f32.mrb[118].mxu1 }
 0x48b   :  { %v8312_v16 = vpop.eup %8311  ;;  %8331 = vrcp.f32 %v3928_v33  ;;  %v6481_v61 = vmul.f32 -1.442695, %v10203_v52  ;;  %v10211_v53 = vadd.f32 %v3409_v37, %v10122_v57  ;;  %v3411_v30 = vpop.f32.mrb[119].mxu1  ;;  %v4423_v22 = vmul.f32 %v8310_v56, %v10128_v54  ;;  %v7775_v56 = vld [vmem:[#allocation10 + $0x40] sm:$0xff]  }
 0x48c   :  { %v8314_v55 = vpop.eup %8313  ;;  %v4426_v20 = vmul.f32 %v8312_v16, %v10133_v45  ;;  %8333 = vrcp.f32 %v3929_v17  ;;  %v6482_v35 = vmul.f32 -1.442695, %v10207_v32  ;;  %v10220_v23 = vadd.f32 %v3411_v30, %v10138_v28  ;;  %v7776_v17 = vld [vmem:[#allocation10] sm:$0xff]   ;;  %6728 = vmatprep.subr.bf16.mxu0 %v7775_v56 }
 0x48d   :  { %v8316_v59 = vpop.eup %8315  ;;  %v4427_v24 = vmul.f32 %v8314_v55, %v10136_v48  ;;  %8335 = vpow2.f32 %v6477_v34  ;;  %v6485_v51 = vmul.f32 -1.442695, %v10211_v53  ;;  %5063 = vmatmul.mubr.bf16.gmra.mrb[224].mxu1 %v4486_v18  ;;  %6729 = vmatpush3.bf16.msra.mxu0 %v7776_v17  ;;  %v7778_v55 = vld [vmem:[#allocation10 + $0x8] sm:$0xff]  }
 0x48e   :  { %v8318_v63 = vpop.eup %8317  ;;  %8337 = vpow2.f32 %v6478_v41  ;;  %v4490_v26 = vpack.c.bf16 %v4426_v20, %v4422_v29  ;;  %v6486_v19 = vmul.f32 -1.442695, %v10220_v23  ;;  %v4304_v49 = vmul.f32 %v8316_v59, %v10144_v31  ;;  %v7777_v41 = vld [vmem:[#allocation10 + $0x48] sm:$0xff]  }
 0x48f   :  { %v8320_v43 = vpop.eup %8319  ;;  %8339 = vpow2.f32 %v6481_v61  ;;  %v4491_v45 = vpack.c.bf16 %v4427_v24, %v4423_v22  ;;  %v4305_v33 = vmul.f32 %v8318_v63, %v10148_v3  ;;  %6730 = vmatprep.subr.bf16.mxu0 %v7777_v41 }
 0x490   :  { %v8322_v4 = vpop.eup %8321  ;;  %v3932_v38 = vadd.f32 1.0, %v8320_v43  ;;  %8341 = vpow2.f32 %v6482_v35  ;;  %v3415_v1 = vpop.f32.mrb[120].mxu1 }
 0x491   :  { %v8324_v54 = vpop.eup %8323  ;;  %v3933_v60 = vadd.f32 1.0, %v8322_v4  ;;  %8343 = vpow2.f32 %v6485_v51  ;;  %5072 = vmatprep.mubr.bf16.mxu1 %v4491_v45  ;;  %v10223_v48 = vadd.f32 %v3415_v1, %v10122_v57  ;;  %v3417_v40 = vpop.f32.mrb[121].mxu1  ;;  %6731 = vmatpush3.bf16.msra.mxu0 %v7778_v55 }
 0x492   :  { %v8326_v10 = vpop.eup %8325  ;;  %8345 = vrcp.f32 %v3932_v38  ;;  %v3936_v9 = vadd.f32 1.0, %v8324_v54  ;;  %v10227_v13 = vadd.f32 %v3417_v40, %v10138_v28  ;;  %v3419_v44 = vpop.f32.mrb[122].mxu1 }
 0x493   :  { %v8328_v12 = vpop.eup %8327  ;;  %8347 = vrcp.f32 %v3933_v60  ;;  %v3937_v47 = vadd.f32 1.0, %v8326_v10  ;;  %v6489_v18 = vmul.f32 -1.442695, %v10223_v48  ;;  %v10231_v11 = vadd.f32 %v3419_v44, %v10122_v57  ;;  %v3421_v50 = vpop.f32.mrb[123].mxu1 }
 0x494   :  { %v8330_v46 = vpop.eup %8329  ;;  %v4308_v36 = vmul.f32 %v8328_v12, %v10156_v7  ;;  %8349 = vrcp.f32 %v3936_v9  ;;  %v6490_v6 = vmul.f32 -1.442695, %v10227_v13  ;;  %v10240_v7 = vadd.f32 %v3421_v50, %v10138_v28 }
 0x495   :  { %v8332_v0 = vpop.eup %8331  ;;  %v4309_v34 = vmul.f32 %v8330_v46, %v10159_v2  ;;  %8351 = vrcp.f32 %v3937_v47  ;;  %v6493_v39 = vmul.f32 -1.442695, %v10231_v11  ;;  %5073 = vmatmul.mubr.bf16.gmra.mrb[228].mxu1 %v4490_v26 }
 0x496   :  { %v8334_v37 = vpop.eup %8333  ;;  %v4432_v16 = vpack.c.bf16 %v4308_v36, %v4304_v49  ;;  %8353 = vpow2.f32 %v6486_v19  ;;  %v6494_v45 = vmul.f32 -1.442695, %v10240_v7  ;;  %v4312_v10 = vmul.f32 %v8332_v0, %v10164_v8 }
 0x497   :  { %v8336_v31 = vpop.eup %8335  ;;  %8355 = vpow2.f32 %v6489_v18  ;;  %v4433_v61 = vpack.c.bf16 %v4309_v34, %v4305_v33  ;;  %v4313_v12 = vmul.f32 %v8334_v37, %v10167_v5 }
 0x498   :  { %v8338_v3 = vpop.eup %8337  ;;  %v3940_v30 = vadd.f32 1.0, %v8336_v31  ;;  %8357 = vpow2.f32 %v6490_v6  ;;  %v3425_v2 = vpop.f32.mrb[124].mxu1 }
 0x499   :  { %v8340_v29 = vpop.eup %8339  ;;  %v3941_v20 = vadd.f32 1.0, %v8338_v3  ;;  %8359 = vpow2.f32 %v6493_v39  ;;  %5115 = vmatprep.mubr.bf16.mxu1 %v4433_v61  ;;  %v10243_v35 = vadd.f32 %v3425_v2, %v10122_v57  ;;  %v3427_v59 = vpop.f32.mrb[125].mxu1 }
 0x49a   :  { %v8342_v22 = vpop.eup %8341  ;;  %8361 = vrcp.f32 %v3940_v30  ;;  %v3944_v24 = vadd.f32 1.0, %v8340_v29  ;;  %v10246_v51 = vadd.f32 %v3427_v59, %v10138_v28  ;;  %v3429_v63 = vpop.f32.mrb[126].mxu1 }
 0x49b   :  { %v8344_v26 = vpop.eup %8343  ;;  %8363 = vrcp.f32 %v3941_v20  ;;  %v3945_v43 = vadd.f32 1.0, %v8342_v22  ;;  %v10250_v4 = vadd.f32 %v3429_v63, %v10122_v57  ;;  %v3431_v38 = vpop.f32.mrb[127].mxu1  ;;  %v6497_v60 = vmul.f32 -1.442695, %v10243_v35 }
 0x49c   :  { %v8346_v1 = vpop.eup %8345  ;;  %8365 = vrcp.f32 %v3944_v24  ;;  %v3948_v54 = vadd.f32 1.0, %v8344_v26  ;;  %v6498_v19 = vmul.f32 -1.442695, %v10246_v51  ;;  %v10260_v46 = vadd.f32 %v3431_v38, %v10138_v28 }
 0x49d   :  { %v8348_v40 = vpop.eup %8347  ;;  %v4316_v9 = vmul.f32 %v8346_v1, %v10176_v58  ;;  %8367 = vrcp.f32 %v3945_v43  ;;  %5116 = vmatmul.mubr.bf16.vlgmr.msra.gmra.mrb[168].mxu1 %v4432_v16  ;;  %v6501_v18 = vmul.f32 -1.442695, %v10250_v4 }
 0x49e   :  { %v8350_v44 = vpop.eup %8349  ;;  %v4317_v47 = vmul.f32 %v8348_v40, %v10179_v21  ;;  %8369 = vrcp.f32 %v3948_v54  ;;  %v6502_v37 = vmul.f32 -1.442695, %v10260_v46 }
 0x49f   :  { %v8352_v50 = vpop.eup %8351  ;;  %8371 = vpow2.f32 %v6494_v45  ;;  %v4436_v8 = vpack.c.bf16 %v4316_v9, %v4312_v10  ;;  %v4320_v29 = vmul.f32 %v8350_v44, %v10183_v25 }
 0x4a0   :  { %v8354_v49 = vpop.eup %8353  ;;  %8373 = vpow2.f32 %v6497_v60  ;;  %v4437_v58 = vpack.c.bf16 %v4317_v47, %v4313_v12  ;;  %v3435_v36 = vpop.f32.mrb[128].mxu1  ;;  %v4321_v24 = vmul.f32 %v8352_v50, %v10187_v42 }
 0x4a1   :  { %v8356_v6 = vpop.eup %8355  ;;  %v3949_v0 = vadd.f32 1.0, %v8354_v49  ;;  %8375 = vpow2.f32 %v6498_v19  ;;  %v10263_v5 = vadd.f32 %v3435_v36, %v10122_v57  ;;  %v3437_v21 = vpop.f32.mrb[129].mxu1 }
 0x4a2   :  { %v8358_v33 = vpop.eup %8357  ;;  %v3952_v34 = vadd.f32 1.0, %v8356_v6  ;;  %8377 = vpow2.f32 %v6501_v18  ;;  %5125 = vmatprep.mubr.bf16.mxu1 %v4437_v58  ;;  %v10266_v39 = vadd.f32 %v3437_v21, %v10138_v28  ;;  %v3439_v56 = vpop.f32.mrb[130].mxu1 }
 0x4a3   :  { %v8360_v17 = vpop.eup %8359  ;;  %8379 = vrcp.f32 %v3949_v0  ;;  %v3953_v41 = vadd.f32 1.0, %v8358_v33  ;;  %v10270_v16 = vadd.f32 %v3439_v56, %v10122_v57  ;;  %v3441_v31 = vpop.f32.mrb[131].mxu1  ;;  %v6505_v30 = vmul.f32 -1.442695, %v10263_v5 }
 0x4a4   :  { %v8362_v61 = vpop.eup %8361  ;;  %8381 = vrcp.f32 %v3952_v34  ;;  %v3956_v3 = vadd.f32 1.0, %v8360_v17  ;;  %v10274_v2 = vadd.f32 %v3441_v31, %v10138_v28  ;;  %v6506_v59 = vmul.f32 -1.442695, %v10266_v39 }
 0x4a5   :  { %v8364_v55 = vpop.eup %8363  ;;  %v4324_v20 = vmul.f32 %v8362_v61, %v10196_v14  ;;  %8383 = vrcp.f32 %v3953_v41  ;;  %5126 = vmatmul.mubr.bf16.gmra.mrb[172].mxu1 %v4436_v8  ;;  %v6509_v26 = vmul.f32 -1.442695, %v10270_v16 }
 0x4a6   :  { %v8366_v22 = vpop.eup %8365  ;;  %v4325_v63 = vmul.f32 %v8364_v55, %v10199_v27  ;;  %8385 = vrcp.f32 %v3956_v3  ;;  %v6510_v45 = vmul.f32 -1.442695, %v10274_v2 }
 0x4a7   :  { %v8368_v43 = vpop.eup %8367  ;;  %8387 = vpow2.f32 %v6502_v37  ;;  %v4440_v38 = vpack.c.bf16 %v4324_v20, %v4320_v29  ;;  %v4328_v12 = vmul.f32 %v8366_v22, %v10203_v52 }
 0x4a8   :  { %v8370_v25 = vpop.eup %8369  ;;  %8389 = vpow2.f32 %v6505_v30  ;;  %v4441_v14 = vpack.c.bf16 %v4325_v63, %v4321_v24  ;;  %v3445_v1 = vpop.f32.mrb[132].mxu1  ;;  %v4329_v33 = vmul.f32 %v8368_v43, %v10207_v32 }
 0x4a9   :  { %v8372_v54 = vpop.eup %8371  ;;  %v10284_v60 = vmul.f32 %v8370_v25, %v10211_v53  ;;  %8391 = vpow2.f32 %v6506_v59  ;;  %v10287_v42 = vadd.f32 %v3445_v1, %v10122_v57  ;;  %v3447_v27 = vpop.f32.mrb[133].mxu1 }
 0x4aa   :  { %v8374_v40 = vpop.eup %8373  ;;  %v3957_v10 = vadd.f32 1.0, %v8372_v54  ;;  %8393 = vpow2.f32 %v6509_v26  ;;  %5135 = vmatprep.mubr.bf16.mxu1 %v4441_v14  ;;  %v10290_v9 = vadd.f32 %v3447_v27, %v10138_v28  ;;  %v3449_v19 = vpop.f32.mrb[134].mxu1 }
 0x4ab   :  { %v8376_v44 = vpop.eup %8375  ;;  %v3960_v47 = vadd.f32 1.0, %v8374_v40  ;;  %8395 = vpow2.f32 %v6510_v45  ;;  %v10294_v53 = vadd.f32 %v3449_v19, %v10122_v57  ;;  %v3451_v18 = vpop.f32.mrb[135].mxu1  ;;  %v6513_v49 = vmul.f32 -1.442695, %v10287_v42 }
 0x4ac   :  { %v8378_v50 = vpop.eup %8377  ;;  %8397 = vrcp.f32 %v3957_v10  ;;  %v3961_v8 = vadd.f32 1.0, %v8376_v44  ;;  %v10298_v58 = vadd.f32 %v3451_v18, %v10138_v28  ;;  %v6514_v0 = vmul.f32 -1.442695, %v10290_v9 }
 0x4ad   :  { %v8380_v36 = vpop.eup %8379  ;;  %8399 = vrcp.f32 %v3960_v47  ;;  %v3964_v6 = vadd.f32 1.0, %v8378_v50  ;;  %5136 = vmatmul.mubr.bf16.gmra.mrb[176].mxu1 %v4440_v38  ;;  %v4444_v52 = vpack.c.bf16 %v10284_v60, %v4328_v12  ;;  %v6517_v56 = vmul.f32 -1.442695, %v10294_v53 }
 0x4ae   :  { %v8382_v21 = vpop.eup %8381  ;;  %v4333_v34 = vmul.f32 %v8380_v36, %v10220_v23  ;;  %8401 = vrcp.f32 %v3961_v8  ;;  %v6518_v41 = vmul.f32 -1.442695, %v10298_v58 }
 0x4af   :  { %v8384_v17 = vpop.eup %8383  ;;  %8403 = vrcp.f32 %v3964_v6  ;;  %v4336_v24 = vmul.f32 %v8382_v21, %v10223_v48 }
 0x4b0   :  { %v8386_v37 = vpop.eup %8385  ;;  %8405 = vpow2.f32 %v6513_v49  ;;  %v4445_v31 = vpack.c.bf16 %v4333_v34, %v4329_v33  ;;  %v3455_v61 = vpop.f32.mrb[136].mxu1  ;;  %v4337_v10 = vmul.f32 %v8384_v17, %v10227_v13 }
 0x4b1   :  { %v8388_v3 = vpop.eup %8387  ;;  %v10307_v30 = vmul.f32 %v8386_v37, %v10231_v11  ;;  %8407 = vpow2.f32 %v6514_v0  ;;  %v10310_v32 = vadd.f32 %v3455_v61, %v10122_v57  ;;  %v3457_v23 = vpop.f32.mrb[137].mxu1 }
 0x4b2   :  { %v8390_v55 = vpop.eup %8389  ;;  %v3965_v29 = vadd.f32 1.0, %v8388_v3  ;;  %8409 = vpow2.f32 %v6517_v56  ;;  %5145 = vmatprep.mubr.bf16.mxu1 %v4445_v31  ;;  %v10313_v20 = vadd.f32 %v3457_v23, %v10138_v28  ;;  %v3459_v59 = vpop.f32.mrb[138].mxu1 }
 0x4b3   :  { %v8392_v22 = vpop.eup %8391  ;;  %v3968_v63 = vadd.f32 1.0, %v8390_v55  ;;  %8411 = vpow2.f32 %v6518_v41  ;;  %v10317_v11 = vadd.f32 %v3459_v59, %v10122_v57  ;;  %v3461_v26 = vpop.f32.mrb[139].mxu1  ;;  %v6521_v1 = vmul.f32 -1.442695, %v10310_v32 }
 0x4b4   :  { %v8394_v43 = vpop.eup %8393  ;;  %8413 = vrcp.f32 %v3965_v29  ;;  %v3969_v45 = vadd.f32 1.0, %v8392_v22  ;;  %v10320_v38 = vadd.f32 %v3461_v26, %v10138_v28  ;;  %v4448_v48 = vpack.c.bf16 %v10307_v30, %v4336_v24 }
 0x4b5   :  { %v8396_v25 = vpop.eup %8395  ;;  %8415 = vrcp.f32 %v3968_v63  ;;  %v3972_v14 = vadd.f32 1.0, %v8394_v43  ;;  %5146 = vmatmul.mubr.bf16.gmra.mrb[180].mxu1 %v4444_v52  ;;  %v6522_v27 = vmul.f32 -1.442695, %v10313_v20  ;;  %v6525_v44 = vmul.f32 -1.442695, %v10317_v11 }
 0x4b6   :  { %v8398_v54 = vpop.eup %8397  ;;  %8417 = vrcp.f32 %v3969_v45  ;;  %v3973_v60 = vadd.f32 1.0, %v8396_v25  ;;  %v6526_v47 = vmul.f32 -1.442695, %v10320_v38 }
 0x4b7   :  { %v8400_v40 = vpop.eup %8399  ;;  %v4341_v19 = vmul.f32 %v8398_v54, %v10240_v7  ;;  %8419 = vrcp.f32 %v3972_v14 }
 0x4b8   :  { %v8402_v12 = vpop.eup %8401  ;;  %8421 = vrcp.f32 %v3973_v60  ;;  %v3465_v18 = vpop.f32.mrb[140].mxu1  ;;  %v4344_v21 = vmul.f32 %v8400_v40, %v10243_v35 }
 0x4b9   :  { %v8404_v50 = vpop.eup %8403  ;;  %8423 = vpow2.f32 %v6521_v1  ;;  %v4449_v8 = vpack.c.bf16 %v4341_v19, %v4337_v10  ;;  %v10330_v49 = vadd.f32 %v3465_v18, %v10122_v57  ;;  %v3467_v36 = vpop.f32.mrb[141].mxu1  ;;  %v4345_v29 = vmul.f32 %v8402_v12, %v10246_v51 }
 0x4ba   :  { %v8406_v6 = vpop.eup %8405  ;;  %v4348_v13 = vmul.f32 %v8404_v50, %v10250_v4  ;;  %8425 = vpow2.f32 %v6522_v27  ;;  %v10334_v7 = vadd.f32 %v3467_v36, %v10138_v28  ;;  %v3469_v0 = vpop.f32.mrb[142].mxu1 }
 0x4bb   :  { %v8408_v52 = vpop.eup %8407  ;;  %v3976_v33 = vadd.f32 1.0, %v8406_v6  ;;  %8427 = vpow2.f32 %v6525_v44  ;;  %5155 = vmatprep.mubr.bf16.mxu1 %v4449_v8  ;;  %v10338_v34 = vadd.f32 %v3469_v0, %v10122_v57  ;;  %v3471_v56 = vpop.f32.mrb[143].mxu1  ;;  %v6529_v61 = vmul.f32 -1.442695, %v10330_v49 }
 0x4bc   :  { %v8410_v17 = vpop.eup %8409  ;;  %v3977_v41 = vadd.f32 1.0, %v8408_v52  ;;  %8429 = vpow2.f32 %v6526_v47  ;;  %v10341_v4 = vadd.f32 %v3471_v56, %v10138_v28  ;;  %v4452_v35 = vpack.c.bf16 %v4348_v13, %v4344_v21 }
 0x4bd   :  { %v8412_v37 = vpop.eup %8411  ;;  %8431 = vrcp.f32 %v3976_v33  ;;  %v3980_v31 = vadd.f32 1.0, %v8410_v17  ;;  %5156 = vmatmul.mubr.bf16.gmra.mrb[184].mxu1 %v4448_v48  ;;  %v6530_v23 = vmul.f32 -1.442695, %v10334_v7  ;;  %v6533_v22 = vmul.f32 -1.442695, %v10338_v34 }
 0x4be   :  { %v8414_v3 = vpop.eup %8413  ;;  %8433 = vrcp.f32 %v3977_v41  ;;  %v3981_v30 = vadd.f32 1.0, %v8412_v37  ;;  %v6534_v63 = vmul.f32 -1.442695, %v10341_v4 }
 0x4bf   :  { %v8416_v55 = vpop.eup %8415  ;;  %v4349_v59 = vmul.f32 %v8414_v3, %v10260_v46  ;;  %8435 = vrcp.f32 %v3980_v31 }
 0x4c0   :  { %v8418_v24 = vpop.eup %8417  ;;  %8437 = vrcp.f32 %v3981_v30  ;;  %v3475_v26 = vpop.f32.mrb[144].mxu1 }
 0x4c1   :  { %v8420_v43 = vpop.eup %8419  ;;  %8439 = vpow2.f32 %v6529_v61  ;;  %v4453_v45 = vpack.c.bf16 %v4349_v59, %v4345_v29  ;;  %v10350_v25 = vadd.f32 %v3475_v26, %v10122_v57  ;;  %v3477_v14 = vpop.f32.mrb[145].mxu1  ;;  %v4353_v51 = vmul.f32 %v8418_v24, %v10266_v39 }
 0x4c2   :  { %v8422_v1 = vpop.eup %8421  ;;  %v4356_v46 = vmul.f32 %v8420_v43, %v10270_v16  ;;  %8441 = vpow2.f32 %v6530_v23  ;;  %v10355_v48 = vadd.f32 %v3477_v14, %v10138_v28  ;;  %v3479_v54 = vpop.f32.mrb[146].mxu1  ;;  %v4352_v39 = vmul.f32 %v8416_v55, %v10263_v5 }
 0x4c3   :  { %v8424_v60 = vpop.eup %8423  ;;  %v4357_v27 = vmul.f32 %v8422_v1, %v10274_v2  ;;  %8443 = vpow2.f32 %v6533_v22  ;;  %5165 = vmatprep.mubr.bf16.mxu1 %v4453_v45  ;;  %v6537_v40 = vmul.f32 -1.442695, %v10350_v25  ;;  %v10360_v10 = vadd.f32 %v3479_v54, %v10122_v57  ;;  %v3481_v19 = vpop.f32.mrb[147].mxu1 }
 0x4c4   :  { %v8426_v44 = vpop.eup %8425  ;;  %v3984_v16 = vadd.f32 1.0, %v8424_v60  ;;  %8445 = vpow2.f32 %v6534_v63  ;;  %v10364_v12 = vadd.f32 %v3481_v19, %v10138_v28  ;;  %v6538_v36 = vmul.f32 -1.442695, %v10355_v48 }
 0x4c5   :  { %v8428_v47 = vpop.eup %8427  ;;  %v3985_v18 = vadd.f32 1.0, %v8426_v44  ;;  %8447 = vpow2.f32 %v6537_v40  ;;  %5166 = vmatmul.mubr.bf16.gmra.mrb[188].mxu1 %v4452_v35  ;;  %v4457_v2 = vpack.c.bf16 %v4357_v27, %v4353_v51  ;;  %v4456_v6 = vpack.c.bf16 %v4356_v46, %v4352_v39 }
 0x4c6   :  { %v8430_v50 = vpop.eup %8429  ;;  %8449 = vrcp.f32 %v3984_v16  ;;  %v3988_v8 = vadd.f32 1.0, %v8428_v47  ;;  %v6541_v5 = vmul.f32 -1.442695, %v10360_v10  ;;  %v6542_v21 = vmul.f32 -1.442695, %v10364_v12 }
 0x4c7   :  { %v8432_v13 = vpop.eup %8431  ;;  %8451 = vrcp.f32 %v3985_v18  ;;  %v3989_v0 = vadd.f32 1.0, %v8430_v50  ;;  %5175 = vmatprep.mubr.bf16.mxu1 %v4457_v2 }
 0x4c8   :  { %v8434_v52 = vpop.eup %8433  ;;  %8453 = vrcp.f32 %v3988_v8  ;;  %v3485_v33 = vpop.f32.mrb[148].mxu1  ;;  %v4360_v22 = vmul.f32 %v8432_v13, %v10287_v42 }
 0x4c9   :  { %v8436_v56 = vpop.eup %8435  ;;  %8455 = vrcp.f32 %v3989_v0  ;;  %v10370_v17 = vadd.f32 %v3485_v33, %v10122_v57  ;;  %v3487_v41 = vpop.f32.mrb[149].mxu1  ;;  %v4361_v31 = vmul.f32 %v8434_v52, %v10290_v9 }
 0x4ca   :  { %v8438_v37 = vpop.eup %8437  ;;  %v4364_v61 = vmul.f32 %v8436_v56, %v10294_v53  ;;  %8457 = vpow2.f32 %v6538_v36  ;;  %v3489_v35 = vpop.f32.mrb[150].mxu1  ;;  %v10377_v55 = vadd.f32 %v3487_v41, %v10138_v28 }
 0x4cb   :  { %v8440_v3 = vpop.eup %8439  ;;  %v4365_v30 = vmul.f32 %v8438_v37, %v10298_v58  ;;  %8459 = vpow2.f32 %v6541_v5  ;;  %v6545_v23 = vmul.f32 -1.442695, %v10370_v17  ;;  %v3491_v29 = vpop.f32.mrb[151].mxu1  ;;  %v10381_v9 = vadd.f32 %v3489_v35, %v10122_v57 }
 0x4cc   :  { %v8442_v59 = vpop.eup %8441  ;;  %v3992_v24 = vadd.f32 1.0, %v8440_v3  ;;  %8461 = vpow2.f32 %v6542_v21  ;;  %v10384_v58 = vadd.f32 %v3491_v29, %v10138_v28  ;;  %v4460_v14 = vpack.c.bf16 %v4364_v61, %v4360_v22 }
 0x4cd   :  { %v8444_v53 = vpop.eup %8443  ;;  %v3993_v63 = vadd.f32 1.0, %v8442_v59  ;;  %8463 = vpow2.f32 %v6545_v23  ;;  %5176 = vmatmul.mubr.bf16.gmra.mrb[192].mxu1 %v4456_v6  ;;  %v4461_v26 = vpack.c.bf16 %v4365_v30, %v4361_v31  ;;  %v6546_v51 = vmul.f32 -1.442695, %v10377_v55 }
 0x4ce   :  { %v8446_v43 = vpop.eup %8445  ;;  %8465 = vrcp.f32 %v3992_v24  ;;  %v3996_v45 = vadd.f32 1.0, %v8444_v53  ;;  %v6549_v60 = vmul.f32 -1.442695, %v10381_v9  ;;  %v6550_v19 = vmul.f32 -1.442695, %v10384_v58 }
 0x4cf   :  { %v8448_v1 = vpop.eup %8447  ;;  %8467 = vrcp.f32 %v3993_v63  ;;  %v3997_v42 = vadd.f32 1.0, %v8446_v43  ;;  %5185 = vmatprep.mubr.bf16.mxu1 %v4461_v26 }
 0x4d0   :  { %v8450_v46 = vpop.eup %8449  ;;  %8469 = vrcp.f32 %v3996_v45  ;;  %v4000_v54 = vadd.f32 1.0, %v8448_v1  ;;  %v3495_v27 = vpop.f32.mrb[152].mxu1 }
 0x4d1   :  { %v8452_v40 = vpop.eup %8451  ;;  %8471 = vrcp.f32 %v3997_v42  ;;  %v10390_v44 = vadd.f32 %v3495_v27, %v10122_v57  ;;  %v3497_v39 = vpop.f32.mrb[153].mxu1  ;;  %v4368_v47 = vmul.f32 %v8450_v46, %v10310_v32 }
 0x4d2   :  { %v8454_v16 = vpop.eup %8453  ;;  %8473 = vrcp.f32 %v4000_v54  ;;  %v3499_v18 = vpop.f32.mrb[154].mxu1  ;;  %v10396_v36 = vadd.f32 %v3497_v39, %v10138_v28  ;;  %v4369_v0 = vmul.f32 %v8452_v40, %v10313_v20 }
 0x4d3   :  { %v8456_v2 = vpop.eup %8455  ;;  %v4372_v50 = vmul.f32 %v8454_v16, %v10317_v11  ;;  %8475 = vpow2.f32 %v6546_v51  ;;  %v6553_v8 = vmul.f32 -1.442695, %v10390_v44  ;;  %v3501_v6 = vpop.f32.mrb[155].mxu1  ;;  %v10401_v32 = vadd.f32 %v3499_v18, %v10122_v57 }
 0x4d4   :  { %v8458_v13 = vpop.eup %8457  ;;  %v4373_v5 = vmul.f32 %v8456_v2, %v10320_v38  ;;  %8477 = vpow2.f32 %v6549_v60  ;;  %v10404_v11 = vadd.f32 %v3501_v6, %v10138_v28  ;;  %v6554_v38 = vmul.f32 -1.442695, %v10396_v36 }
 0x4d5   :  { %v8460_v52 = vpop.eup %8459  ;;  %v4001_v21 = vadd.f32 1.0, %v8458_v13  ;;  %8479 = vpow2.f32 %v6550_v19  ;;  %5186 = vmatmul.mubr.bf16.gmra.mrb[196].mxu1 %v4460_v14  ;;  %v4464_v33 = vpack.c.bf16 %v4372_v50, %v4368_v47  ;;  %v6557_v3 = vmul.f32 -1.442695, %v10401_v32 }
 0x4d6   :  { %v8462_v56 = vpop.eup %8461  ;;  %v4004_v41 = vadd.f32 1.0, %v8460_v52  ;;  %8481 = vpow2.f32 %v6553_v8  ;;  %v4465_v37 = vpack.c.bf16 %v4373_v5, %v4369_v0  ;;  %v6558_v29 = vmul.f32 -1.442695, %v10404_v11 }
 0x4d7   :  { %v8464_v31 = vpop.eup %8463  ;;  %8483 = vrcp.f32 %v4001_v21  ;;  %v4005_v20 = vadd.f32 1.0, %v8462_v56 }
 0x4d8   :  { %v8466_v61 = vpop.eup %8465  ;;  %8485 = vrcp.f32 %v4004_v41  ;;  %v4008_v35 = vadd.f32 1.0, %v8464_v31  ;;  %5195 = vmatprep.mubr.bf16.mxu1 %v4465_v37  ;;  %v3505_v30 = vpop.f32.mrb[156].mxu1 }
 0x4d9   :  { %v8468_v23 = vpop.eup %8467  ;;  %8487 = vrcp.f32 %v4005_v20  ;;  %v10410_v59 = vadd.f32 %v3505_v30, %v10122_v57  ;;  %v3507_v22 = vpop.f32.mrb[157].mxu1  ;;  %v4376_v53 = vmul.f32 %v8466_v61, %v10330_v49 }
 0x4da   :  { %v8470_v24 = vpop.eup %8469  ;;  %8489 = vrcp.f32 %v4008_v35  ;;  %v10414_v63 = vadd.f32 %v3507_v22, %v10138_v28  ;;  %v3509_v26 = vpop.f32.mrb[158].mxu1  ;;  %v4377_v45 = vmul.f32 %v8468_v23, %v10334_v7 }
 0x4db   :  { %v8472_v43 = vpop.eup %8471  ;;  %v4380_v14 = vmul.f32 %v8470_v24, %v10338_v34  ;;  %8491 = vpow2.f32 %v6554_v38  ;;  %v6561_v1 = vmul.f32 -1.442695, %v10410_v59  ;;  %v3511_v42 = vpop.f32.mrb[159].mxu1  ;;  %v10422_v54 = vadd.f32 %v3509_v26, %v10122_v57 }
 0x4dc   :  { %v8474_v51 = vpop.eup %8473  ;;  %v4381_v46 = vmul.f32 %v8472_v43, %v10341_v4  ;;  %8493 = vpow2.f32 %v6557_v3  ;;  %v6562_v49 = vmul.f32 -1.442695, %v10414_v63  ;;  %v10425_v27 = vadd.f32 %v3511_v42, %v10138_v28 }
 0x4dd   :  { %v8476_v60 = vpop.eup %8475  ;;  %8495 = vpow2.f32 %v6558_v29  ;;  %5196 = vmatmul.mubr.bf16.gmra.mrb[200].mxu1 %v4464_v33  ;;  %v4468_v7 = vpack.c.bf16 %v4380_v14, %v4376_v53  ;;  %v6565_v18 = vmul.f32 -1.442695, %v10422_v54  ;;  %v4384_v56 = vmul.f32 %v8474_v51, %v10350_v25 }
 0x4de   :  { %v8478_v34 = vpop.eup %8477  ;;  %v4009_v40 = vadd.f32 1.0, %v8476_v60  ;;  %8497 = vpow2.f32 %v6561_v1  ;;  %v4469_v19 = vpack.c.bf16 %v4381_v46, %v4377_v45  ;;  %v6566_v6 = vmul.f32 -1.442695, %v10425_v27 }
 0x4df   :  { %v8480_v39 = vpop.eup %8479  ;;  %v4012_v16 = vadd.f32 1.0, %v8478_v34  ;;  %8499 = vpow2.f32 %v6562_v49 }
 0x4e0   :  { %v8482_v4 = vpop.eup %8481  ;;  %8501 = vrcp.f32 %v4009_v40  ;;  %v4013_v47 = vadd.f32 1.0, %v8480_v39  ;;  %5205 = vmatprep.mubr.bf16.mxu1 %v4469_v19  ;;  %v3515_v2 = vpop.f32.mrb[160].mxu1 }
 0x4e1   :  { %v8484_v50 = vpop.eup %8483  ;;  %8503 = vrcp.f32 %v4012_v16  ;;  %v4016_v8 = vadd.f32 1.0, %v8482_v4  ;;  %v10430_v13 = vadd.f32 %v3515_v2, %v10122_v57  ;;  %v3517_v0 = vpop.f32.mrb[161].mxu1 }
 0x4e2   :  { %v8486_v5 = vpop.eup %8485  ;;  %8505 = vrcp.f32 %v4013_v47  ;;  %v10433_v52 = vadd.f32 %v3517_v0, %v10138_v28  ;;  %v3519_v21 = vpop.f32.mrb[162].mxu1  ;;  %v4385_v38 = vmul.f32 %v8484_v50, %v10355_v48 }
 0x4e3   :  { %v8488_v33 = vpop.eup %8487  ;;  %v4388_v41 = vmul.f32 %v8486_v5, %v10360_v10  ;;  %8507 = vrcp.f32 %v4016_v8  ;;  %v6569_v37 = vmul.f32 -1.442695, %v10430_v13  ;;  %v3521_v31 = vpop.f32.mrb[163].mxu1  ;;  %v10442_v30 = vadd.f32 %v3519_v21, %v10122_v57 }
 0x4e4   :  { %v8490_v20 = vpop.eup %8489  ;;  %v4389_v61 = vmul.f32 %v8488_v33, %v10364_v12  ;;  %8509 = vpow2.f32 %v6565_v18  ;;  %v6570_v35 = vmul.f32 -1.442695, %v10433_v52  ;;  %v10445_v29 = vadd.f32 %v3521_v31, %v10138_v28 }
 0x4e5   :  { %v8492_v3 = vpop.eup %8491  ;;  %8511 = vpow2.f32 %v6566_v6  ;;  %5206 = vmatmul.mubr.bf16.gmra.mrb[204].mxu1 %v4468_v7  ;;  %v4472_v25 = vpack.c.bf16 %v4388_v41, %v4384_v56  ;;  %v6573_v14 = vmul.f32 -1.442695, %v10442_v30  ;;  %v4392_v16 = vmul.f32 %v8490_v20, %v10370_v17 }
 0x4e6   :  { %v8494_v10 = vpop.eup %8493  ;;  %v4017_v23 = vadd.f32 1.0, %v8492_v3  ;;  %8513 = vpow2.f32 %v6569_v37  ;;  %v4473_v22 = vpack.c.bf16 %v4389_v61, %v4385_v38  ;;  %v6574_v49 = vmul.f32 -1.442695, %v10445_v29 }
 0x4e7   :  { %v8496_v48 = vpop.eup %8495  ;;  %v4020_v24 = vadd.f32 1.0, %v8494_v10  ;;  %8515 = vpow2.f32 %v6570_v35 }
 0x4e8   :  { %v8498_v12 = vpop.eup %8497  ;;  %8517 = vrcp.f32 %v4017_v23  ;;  %v4021_v53 = vadd.f32 1.0, %v8496_v48  ;;  %5215 = vmatprep.mubr.bf16.mxu1 %v4473_v22  ;;  %v3525_v26 = vpop.f32.mrb[164].mxu1 }
 0x4e9   :  { %v8500_v43 = vpop.eup %8499  ;;  %8519 = vrcp.f32 %v4020_v24  ;;  %v4024_v45 = vadd.f32 1.0, %v8498_v12  ;;  %v10449_v1 = vadd.f32 %v3525_v26, %v10122_v57  ;;  %v3527_v42 = vpop.f32.mrb[165].mxu1 }
 0x4ea   :  { %v8502_v51 = vpop.eup %8501  ;;  %8521 = vrcp.f32 %v4021_v53  ;;  %v4025_v46 = vadd.f32 1.0, %v8500_v43  ;;  %v10453_v60 = vadd.f32 %v3527_v42, %v10138_v28  ;;  %v3529_v7 = vpop.f32.mrb[166].mxu1 }
 0x4eb   :  { %v8504_v34 = vpop.eup %8503  ;;  %8523 = vrcp.f32 %v4024_v45  ;;  %v6577_v40 = vmul.f32 -1.442695, %v10449_v1  ;;  %v3531_v19 = vpop.f32.mrb[167].mxu1  ;;  %v4393_v2 = vmul.f32 %v8502_v51, %v10377_v55  ;;  %v10462_v8 = vadd.f32 %v3529_v7, %v10122_v57 }
 0x4ec   :  { %v8506_v39 = vpop.eup %8505  ;;  %v4396_v4 = vmul.f32 %v8504_v34, %v10381_v9  ;;  %8525 = vrcp.f32 %v4025_v46  ;;  %v6578_v47 = vmul.f32 -1.442695, %v10453_v60  ;;  %v10465_v0 = vadd.f32 %v3531_v19, %v10138_v28 }
 0x4ed   :  { %v8508_v18 = vpop.eup %8507  ;;  %v4397_v50 = vmul.f32 %v8506_v39, %v10384_v58  ;;  %8527 = vpow2.f32 %v6573_v14  ;;  %5216 = vmatmul.mubr.bf16.gmra.mrb[208].mxu1 %v4472_v25  ;;  %v6581_v58 = vmul.f32 -1.442695, %v10462_v8 }
 0x4ee   :  { %v8510_v6 = vpop.eup %8509  ;;  %8529 = vpow2.f32 %v6574_v49  ;;  %v4476_v17 = vpack.c.bf16 %v4396_v4, %v4392_v16  ;;  %v6582_v41 = vmul.f32 -1.442695, %v10465_v0  ;;  %v4400_v31 = vmul.f32 %v8508_v18, %v10390_v44  ;;  %v7780_v16 = vld [vmem:[#allocation10 + $0x10] sm:$0xff]  }
 0x4ef   :  { %v8512_v9 = vpop.eup %8511  ;;  %v4028_v5 = vadd.f32 1.0, %v8510_v6  ;;  %8531 = vpow2.f32 %v6577_v40  ;;  %v4477_v21 = vpack.c.bf16 %v4397_v50, %v4393_v2  ;;  %v7781_v50 = vld [vmem:[#allocation10 + $0x58] sm:$0xff]  }
 0x4f0   :  { %v8514_v33 = vpop.eup %8513  ;;  %v4029_v56 = vadd.f32 1.0, %v8512_v9  ;;  %8533 = vpow2.f32 %v6578_v47 }
 0x4f1   :  { %v8516_v55 = vpop.eup %8515  ;;  %8535 = vrcp.f32 %v4028_v5  ;;  %5225 = vmatprep.mubr.bf16.mxu1 %v4477_v21  ;;  %v4032_v38 = vadd.f32 1.0, %v8514_v33  ;;  %v7783_v21 = vld [vmem:[#allocation10 + $0x60] sm:$0xff]  }
 0x4f2   :  { %v8518_v57 = vpop.eup %8517  ;;  %8537 = vrcp.f32 %v4029_v56  ;;  %v4033_v25 = vadd.f32 1.0, %v8516_v55  ;;  %v7784_v56 = vld [vmem:[#allocation10 + $0x20] sm:$0xff]  }
 0x4f3   :  { %v8520_v37 = vpop.eup %8519  ;;  %v4401_v35 = vmul.f32 %v8518_v57, %v10396_v36  ;;  %8539 = vpow2.f32 %v6581_v58  ;;  %v7785_v57 = vld [vmem:[#allocation10 + $0x68] sm:$0xff]  }
 0x4f4   :  { %v8522_v28 = vpop.eup %8521  ;;  %v4404_v20 = vmul.f32 %v8520_v37, %v10401_v32  ;;  %8541 = vpow2.f32 %v6582_v41  ;;  %v7786_v37 = vld [vmem:[#allocation10 + $0x28] sm:$0xff]  }
 0x4f5   :  { %v8524_v61 = vpop.eup %8523  ;;  %v4405_v3 = vmul.f32 %v8522_v28, %v10404_v11  ;;  %5226 = vmatmul.mubr.bf16.gmra.mrb[212].mxu1 %v4476_v17  ;;  %8543 = vrcp.f32 %v4032_v38  ;;  %v7782_v17 = vld [vmem:[#allocation10 + $0x18] sm:$0xff]  }
 0x4f6   :  { %v8526_v10 = vpop.eup %8525  ;;  %v4480_v23 = vpack.c.bf16 %v4404_v20, %v4400_v31  ;;  %8545 = vrcp.f32 %v4033_v25  ;;  %v4408_v26 = vmul.f32 %v8524_v61, %v10410_v59  ;;  %v7779_v59 = vld [vmem:[#allocation10 + $0x50] sm:$0xff]  }
 0x4f7   :  { %v8528_v22 = vpop.eup %8527  ;;  %v4481_v48 = vpack.c.bf16 %v4405_v3, %v4401_v35  ;;  %v4409_v14 = vmul.f32 %v8526_v10, %v10414_v63  ;;  %6732 = vmatprep.subr.bf16.mxu0 %v7779_v59  ;;  %v7787_v31 = vld [vmem:[#allocation10 + $0x70] sm:$0xff]  }
 0x4f8   :  { %v8530_v24 = vpop.eup %8529  ;;  %v4036_v12 = vadd.f32 1.0, %v8528_v22  ;;  %6733 = vmatpush3.bf16.msra.mxu0 %v7780_v16  ;;  %v7788_v20 = vld [vmem:[#allocation10 + $0x30] sm:$0xff]  }
 0x4f9   :  { %v8532_v44 = vpop.eup %8531  ;;  %v4037_v32 = vadd.f32 1.0, %v8530_v24  ;;  %5235 = vmatprep.mubr.bf16.mxu1 %v4481_v48  ;;  %6734 = vmatprep.subr.bf16.mxu0 %v7781_v50 }
 0x4fa   :  { %v8534_v53 = vpop.eup %8533  ;;  %8547 = vrcp.f32 %v4036_v12  ;;  %v4040_v45 = vadd.f32 1.0, %v8532_v44 }
 0x4fb   :  { %v8536_v36 = vpop.eup %8535  ;;  %8549 = vrcp.f32 %v4037_v32  ;;  %v4041_v51 = vadd.f32 1.0, %v8534_v53 }
 0x4fc   :  { %v8538_v11 = vpop.eup %8537  ;;  %v4412_v43 = vmul.f32 %v8536_v36, %v10422_v54  ;;  %8551 = vrcp.f32 %v4040_v45  ;;  %6735 = vmatpush3.bf16.msra.mxu0 %v7782_v17 }
 0x4fd   :  { %v4413_v42 = vmul.f32 %v8538_v11, %v10425_v27  ;;  %5236 = vmatmul.mubr.bf16.gmra.mrb[216].mxu1 %v4480_v23  ;;  %v8540_v49 = vpop.eup %8539  ;;  %8553 = vrcp.f32 %v4041_v51  ;;  %6736 = vmatprep.subr.bf16.mxu0 %v7783_v21 }
 0x4fe   :  { %v4484_v46 = vpack.c.bf16 %v4412_v43, %v4408_v26  ;;  %v8542_v34 = vpop.eup %8541  ;;  %v4044_v40 = vadd.f32 1.0, %v8540_v49 }
 0x4ff   :  { %v4485_v7 = vpack.c.bf16 %v4413_v42, %v4409_v14  ;;  %v4045_v19 = vadd.f32 1.0, %v8542_v34  ;;  %v8544_v39 = vpop.eup %8543 }
 0x500   :  { %8555 = vrcp.f32 %v4044_v40  ;;  %v8546_v54 = vpop.eup %8545  ;;  %v4416_v4 = vmul.f32 %v8544_v39, %v10430_v13  ;;  %6737 = vmatpush3.bf16.msra.mxu0 %v7784_v56 }
 0x501   :  { %5245 = vmatprep.mubr.bf16.mxu1 %v4485_v7  ;;  %8557 = vrcp.f32 %v4045_v19  ;;  %v4417_v18 = vmul.f32 %v8546_v54, %v10433_v52  ;;  %6738 = vmatprep.subr.bf16.mxu0 %v7785_v57 }
 0x504   :  { %v8548_v63 = vpop.eup %8547  ;;  %6739 = vmatpush3.bf16.msra.mxu0 %v7786_v37 }
 0x505   :  { %v8550_v27 = vpop.eup %8549  ;;  %v4420_v47 = vmul.f32 %v8548_v63, %v10442_v30  ;;  %5246 = vmatmul.mubr.bf16.gmra.mrb[220].mxu1 %v4484_v46  ;;  %6740 = vmatprep.subr.bf16.mxu0 %v7787_v31 }
 0x506   :  { %v4421_v2 = vmul.f32 %v8550_v27, %v10445_v29  ;;  %v8552_v5 = vpop.eup %8551 }
 0x507   :  { %v4488_v6 = vpack.c.bf16 %v4420_v47, %v4416_v4  ;;  %v8554_v33 = vpop.eup %8553  ;;  %v4424_v55 = vmul.f32 %v8552_v5, %v10449_v1  ;;  %v7789_v1 = vld [vmem:[#allocation10 + $0x78] sm:$0xff]  }
 0x508   :  { %v4489_v9 = vpack.c.bf16 %v4421_v2, %v4417_v18  ;;  %v4425_v29 = vmul.f32 %v8554_v33, %v10453_v60  ;;  %6741 = vmatpush3.bf16.msra.mxu0 %v7788_v20  ;;  %v4558_v60 = vld [vmem:[%s10872_s6] sm:$0x3] }
 0x509   :  { %6742 = vmatprep.subr.bf16.mxu0 %v7789_v1  ;;  %v10492_v38 = vrot.slane %v4558_v60, %v10882_v62 }
 0x50a   :  { %5255 = vmatprep.mubr.bf16.mxu1 %v4489_v9  ;;  %v8556_v13 = vpop.eup %8555 }
 0x50b   :  { %v8558_v30 = vpop.eup %8557  ;;  %v4428_v52 = vmul.f32 %v8556_v13, %v10462_v8  ;;  %v7790_v8 = vld [vmem:[#allocation10 + $0x38] sm:$0xff]  }
 0x50c   :  { %v4429_v58 = vmul.f32 %v8558_v30, %v10465_v0  ;;  %6743 = vmatpush3.bf16.msra.mxu0 %v7790_v8  ;;  %v10489_v0 = vrot.slane %v4558_v60, %v9250_v15 }
 0x50d   :  { %5256 = vmatmul.mubr.bf16.gmra.mrb[224].mxu1 %v4488_v6  ;;  %v4492_v41 = vpack.c.bf16 %v4428_v52, %v4424_v55 }
 0x50e   :  { %v4493_v28 = vpack.c.bf16 %v4429_v58, %v4425_v29 }
 0x510   :  { %5265 = vmatprep.mubr.bf16.mxu1 %v4493_v28 }
 0x515   :  { %5266 = vmatmul.mubr.bf16.gmra.mrb[228].mxu1 %v4492_v41 }
 0x570   :  { %v5117_v61 = vpop.f32.mrb[168].mxu1 }
 0x571   :  { %v10495_v35 = vadd.f32 %v5117_v61, %v10489_v0  ;;  %v5119_v3 = vpop.f32.mrb[169].mxu1 }
 0x572   :  { %v10498_v25 = vadd.f32 %v5119_v3, %v10492_v38  ;;  %v5121_v10 = vpop.f32.mrb[170].mxu1 }
 0x573   :  { %v6647_v23 = vmul.f32 -1.442695, %v10495_v35  ;;  %v10502_v22 = vadd.f32 %v5121_v10, %v10489_v0  ;;  %v5123_v48 = vpop.f32.mrb[171].mxu1 }
 0x574   :  { %v6648_v15 = vmul.f32 -1.442695, %v10498_v25  ;;  %v10506_v62 = vadd.f32 %v5123_v48, %v10492_v38 }
 0x575   :  { %8559 = vpow2.f32 %v6647_v23  ;;  %v6649_v24 = vmul.f32 -1.442695, %v10502_v22 }
 0x576   :  { %8561 = vpow2.f32 %v6648_v15  ;;  %v6650_v12 = vmul.f32 -1.442695, %v10506_v62 }
 0x577   :  { %8563 = vpow2.f32 %v6649_v24 }
 0x578   :  { %8565 = vpow2.f32 %v6650_v12  ;;  %v5127_v44 = vpop.f32.mrb[172].mxu1 }
 0x579   :  { %v10511_v32 = vadd.f32 %v5127_v44, %v10489_v0  ;;  %v5129_v53 = vpop.f32.mrb[173].mxu1 }
 0x57a   :  { %v10514_v36 = vadd.f32 %v5129_v53, %v10492_v38  ;;  %v5131_v11 = vpop.f32.mrb[174].mxu1 }
 0x57b   :  { %v6651_v26 = vmul.f32 -1.442695, %v10511_v32  ;;  %v10518_v43 = vadd.f32 %v5131_v11, %v10489_v0  ;;  %v5133_v45 = vpop.f32.mrb[175].mxu1 }
 0x57c   :  { %v6652_v14 = vmul.f32 -1.442695, %v10514_v36  ;;  %v10522_v42 = vadd.f32 %v5133_v45, %v10492_v38 }
 0x57d   :  { %8567 = vpow2.f32 %v6651_v26  ;;  %v6653_v51 = vmul.f32 -1.442695, %v10518_v43 }
 0x57e   :  { %8569 = vpow2.f32 %v6652_v14  ;;  %v6654_v46 = vmul.f32 -1.442695, %v10522_v42 }
 0x57f   :  { %v8560_v49 = vpop.eup %8559  ;;  %8571 = vpow2.f32 %v6653_v51 }
 0x580   :  { %v8562_v7 = vpop.eup %8561  ;;  %v5468_v34 = vadd.f32 1.0, %v8560_v49  ;;  %8573 = vpow2.f32 %v6654_v46  ;;  %v5137_v40 = vpop.f32.mrb[176].mxu1 }
 0x581   :  { %v8564_v19 = vpop.eup %8563  ;;  %v5469_v39 = vadd.f32 1.0, %v8562_v7  ;;  %v10527_v59 = vadd.f32 %v5137_v40, %v10489_v0  ;;  %v5139_v54 = vpop.f32.mrb[177].mxu1 }
 0x582   :  { %v8566_v16 = vpop.eup %8565  ;;  %8575 = vrcp.f32 %v5468_v34  ;;  %v5470_v63 = vadd.f32 1.0, %v8564_v19  ;;  %v10530_v27 = vadd.f32 %v5139_v54, %v10492_v38  ;;  %v5141_v4 = vpop.f32.mrb[178].mxu1 }
 0x583   :  { %8577 = vrcp.f32 %v5469_v39  ;;  %v5471_v47 = vadd.f32 1.0, %v8566_v16  ;;  %v6655_v18 = vmul.f32 -1.442695, %v10527_v59  ;;  %v10534_v2 = vadd.f32 %v5141_v4, %v10489_v0  ;;  %v5143_v50 = vpop.f32.mrb[179].mxu1 }
 0x584   :  { %8579 = vrcp.f32 %v5470_v63  ;;  %v6656_v6 = vmul.f32 -1.442695, %v10530_v27  ;;  %v10538_v17 = vadd.f32 %v5143_v50, %v10492_v38 }
 0x585   :  { %8581 = vrcp.f32 %v5471_v47  ;;  %v6657_v9 = vmul.f32 -1.442695, %v10534_v2 }
 0x586   :  { %8583 = vpow2.f32 %v6655_v18  ;;  %v6658_v5 = vmul.f32 -1.442695, %v10538_v17 }
 0x587   :  { %v8568_v21 = vpop.eup %8567  ;;  %8585 = vpow2.f32 %v6656_v6 }
 0x588   :  { %v8570_v33 = vpop.eup %8569  ;;  %v5472_v56 = vadd.f32 1.0, %v8568_v21  ;;  %8587 = vpow2.f32 %v6657_v9  ;;  %v5147_v13 = vpop.f32.mrb[180].mxu1 }
 0x589   :  { %v8572_v30 = vpop.eup %8571  ;;  %v5473_v55 = vadd.f32 1.0, %v8570_v33  ;;  %8589 = vpow2.f32 %v6658_v5  ;;  %v10543_v52 = vadd.f32 %v5147_v13, %v10489_v0  ;;  %v5149_v29 = vpop.f32.mrb[181].mxu1 }
 0x58a   :  { %v8574_v58 = vpop.eup %8573  ;;  %8591 = vrcp.f32 %v5472_v56  ;;  %v5474_v57 = vadd.f32 1.0, %v8572_v30  ;;  %v10546_v41 = vadd.f32 %v5149_v29, %v10492_v38  ;;  %v5151_v37 = vpop.f32.mrb[182].mxu1 }
 0x58b   :  { %8593 = vrcp.f32 %v5473_v55  ;;  %v5475_v28 = vadd.f32 1.0, %v8574_v58  ;;  %v6659_v31 = vmul.f32 -1.442695, %v10543_v52  ;;  %v10550_v20 = vadd.f32 %v5151_v37, %v10489_v0  ;;  %v5153_v1 = vpop.f32.mrb[183].mxu1 }
 0x58c   :  { %v8576_v8 = vpop.eup %8575  ;;  %8595 = vrcp.f32 %v5474_v57  ;;  %v6660_v60 = vmul.f32 -1.442695, %v10546_v41  ;;  %v10554_v61 = vadd.f32 %v5153_v1, %v10492_v38 }
 0x58d   :  { %v8578_v3 = vpop.eup %8577  ;;  %8597 = vrcp.f32 %v5475_v28  ;;  %v6661_v10 = vmul.f32 -1.442695, %v10550_v20  ;;  %v5660_v24 = vmul.f32 %v8576_v8, %v10495_v35 }
 0x58e   :  { %v8580_v23 = vpop.eup %8579  ;;  %8599 = vpow2.f32 %v6659_v31  ;;  %v6662_v48 = vmul.f32 -1.442695, %v10554_v61  ;;  %v5661_v53 = vmul.f32 %v8578_v3, %v10498_v25 }
 0x58f   :  { %v8582_v15 = vpop.eup %8581  ;;  %v5662_v12 = vmul.f32 %v8580_v23, %v10502_v22  ;;  %8601 = vpow2.f32 %v6660_v60 }
 0x590   :  { %v8584_v44 = vpop.eup %8583  ;;  %v5663_v11 = vmul.f32 %v8582_v15, %v10506_v62  ;;  %8603 = vpow2.f32 %v6661_v10  ;;  %v5157_v26 = vpop.f32.mrb[184].mxu1 }
 0x591   :  { %v8586_v45 = vpop.eup %8585  ;;  %v5724_v14 = vpack.c.bf16 %v5662_v12, %v5660_v24  ;;  %v5476_v51 = vadd.f32 1.0, %v8584_v44  ;;  %8605 = vpow2.f32 %v6662_v48  ;;  %v10563_v46 = vadd.f32 %v5157_v26, %v10489_v0  ;;  %v5159_v49 = vpop.f32.mrb[185].mxu1 }
 0x592   :  { %v8588_v7 = vpop.eup %8587  ;;  %v5477_v35 = vadd.f32 1.0, %v8586_v45  ;;  %v10566_v22 = vadd.f32 %v5159_v49, %v10492_v38  ;;  %v5161_v34 = vpop.f32.mrb[186].mxu1  ;;  %v5725_v40 = vpack.c.bf16 %v5663_v11, %v5661_v53 }
 0x593   :  { %v8590_v25 = vpop.eup %8589  ;;  %8607 = vrcp.f32 %v5476_v51  ;;  %v5478_v62 = vadd.f32 1.0, %v8588_v7  ;;  %v6663_v19 = vmul.f32 -1.442695, %v10563_v46  ;;  %v10570_v39 = vadd.f32 %v5161_v34, %v10489_v0  ;;  %v5163_v54 = vpop.f32.mrb[187].mxu1 }
 0x594   :  { %v8592_v16 = vpop.eup %8591  ;;  %8609 = vrcp.f32 %v5477_v35  ;;  %v5479_v63 = vadd.f32 1.0, %v8590_v25  ;;  %v6664_v4 = vmul.f32 -1.442695, %v10566_v22  ;;  %v10574_v47 = vadd.f32 %v5163_v54, %v10492_v38  ;;  %5923 = vmatprep.mubr.bf16.mxu0 %v5725_v40 }
 0x595   :  { %v8594_v18 = vpop.eup %8593  ;;  %8611 = vrcp.f32 %v5478_v62  ;;  %v6665_v50 = vmul.f32 -1.442695, %v10570_v39  ;;  %5924 = vmatmul.mubr.bf16.vlgmr.msra.gmra.mrb[64].mxu0 %v5724_v14  ;;  %v5664_v21 = vmul.f32 %v8592_v16, %v10511_v32 }
 0x596   :  { %v8596_v6 = vpop.eup %8595  ;;  %8613 = vrcp.f32 %v5479_v63  ;;  %v6666_v9 = vmul.f32 -1.442695, %v10574_v47  ;;  %v5665_v13 = vmul.f32 %v8594_v18, %v10514_v36 }
 0x597   :  { %v8598_v5 = vpop.eup %8597  ;;  %v5666_v33 = vmul.f32 %v8596_v6, %v10518_v43  ;;  %8615 = vpow2.f32 %v6663_v19 }
 0x598   :  { %v8600_v56 = vpop.eup %8599  ;;  %v5667_v30 = vmul.f32 %v8598_v5, %v10522_v42  ;;  %8617 = vpow2.f32 %v6664_v4  ;;  %v5167_v55 = vpop.f32.mrb[188].mxu1 }
 0x599   :  { %v8602_v29 = vpop.eup %8601  ;;  %v5480_v58 = vadd.f32 1.0, %v8600_v56  ;;  %8619 = vpow2.f32 %v6665_v50  ;;  %v10583_v57 = vadd.f32 %v5167_v55, %v10489_v0  ;;  %v5169_v37 = vpop.f32.mrb[189].mxu1  ;;  %v5726_v28 = vpack.c.bf16 %v5666_v33, %v5664_v21 }
 0x59a   :  { %v8604_v31 = vpop.eup %8603  ;;  %v5481_v32 = vadd.f32 1.0, %v8602_v29  ;;  %8621 = vpow2.f32 %v6666_v9  ;;  %v10586_v43 = vadd.f32 %v5169_v37, %v10492_v38  ;;  %v5171_v1 = vpop.f32.mrb[190].mxu1  ;;  %v5727_v36 = vpack.c.bf16 %v5667_v30, %v5665_v13 }
 0x59b   :  { %v8606_v8 = vpop.eup %8605  ;;  %8623 = vrcp.f32 %v5480_v58  ;;  %v5482_v42 = vadd.f32 1.0, %v8604_v31  ;;  %v6667_v60 = vmul.f32 -1.442695, %v10583_v57  ;;  %v10590_v3 = vadd.f32 %v5171_v1, %v10489_v0  ;;  %v5173_v10 = vpop.f32.mrb[191].mxu1 }
 0x59c   :  { %8625 = vrcp.f32 %v5481_v32  ;;  %v5483_v23 = vadd.f32 1.0, %v8606_v8  ;;  %v6668_v48 = vmul.f32 -1.442695, %v10586_v43  ;;  %v10594_v15 = vadd.f32 %v5173_v10, %v10492_v38  ;;  %5931 = vmatprep.mubr.bf16.mxu0 %v5727_v36 }
 0x59d   :  { %v8608_v24 = vpop.eup %8607  ;;  %8627 = vrcp.f32 %v5482_v42  ;;  %v6669_v12 = vmul.f32 -1.442695, %v10590_v3  ;;  %5932 = vmatmul.mubr.bf16.gmra.mrb[68].mxu0 %v5726_v28 }
 0x59e   :  { %v8610_v44 = vpop.eup %8609  ;;  %8629 = vrcp.f32 %v5483_v23  ;;  %v6670_v53 = vmul.f32 -1.442695, %v10594_v15  ;;  %v5668_v45 = vmul.f32 %v8608_v24, %v10527_v59 }
 0x59f   :  { %v8612_v11 = vpop.eup %8611  ;;  %8631 = vpow2.f32 %v6667_v60  ;;  %v5669_v7 = vmul.f32 %v8610_v44, %v10530_v27 }
 0x5a0   :  { %v8614_v26 = vpop.eup %8613  ;;  %v5670_v14 = vmul.f32 %v8612_v11, %v10534_v2  ;;  %8633 = vpow2.f32 %v6668_v48  ;;  %v5177_v51 = vpop.f32.mrb[192].mxu1 }
 0x5a1   :  { %v8616_v49 = vpop.eup %8615  ;;  %v5671_v35 = vmul.f32 %v8614_v26, %v10538_v17  ;;  %8635 = vpow2.f32 %v6669_v12  ;;  %v10603_v34 = vadd.f32 %v5177_v51, %v10489_v0  ;;  %v5179_v40 = vpop.f32.mrb[193].mxu1 }
 0x5a2   :  { %v8618_v25 = vpop.eup %8617  ;;  %v5484_v62 = vadd.f32 1.0, %v8616_v49  ;;  %8637 = vpow2.f32 %v6670_v53  ;;  %v10606_v19 = vadd.f32 %v5179_v40, %v10492_v38  ;;  %v5181_v59 = vpop.f32.mrb[194].mxu1  ;;  %v5728_v2 = vpack.c.bf16 %v5670_v14, %v5668_v45 }
 0x5a3   :  { %v8620_v54 = vpop.eup %8619  ;;  %v5485_v16 = vadd.f32 1.0, %v8618_v25  ;;  %v10609_v63 = vadd.f32 %v5181_v59, %v10489_v0  ;;  %v5183_v27 = vpop.f32.mrb[195].mxu1  ;;  %v5729_v17 = vpack.c.bf16 %v5671_v35, %v5669_v7  ;;  %v6671_v50 = vmul.f32 -1.442695, %v10603_v34 }
 0x5a4   :  { %v8622_v4 = vpop.eup %8621  ;;  %8639 = vrcp.f32 %v5484_v62  ;;  %v5486_v18 = vadd.f32 1.0, %v8620_v54  ;;  %v10613_v6 = vadd.f32 %v5183_v27, %v10492_v38  ;;  %v6672_v21 = vmul.f32 -1.442695, %v10606_v19 }
 0x5a5   :  { %v8624_v9 = vpop.eup %8623  ;;  %8641 = vrcp.f32 %v5485_v16  ;;  %v5487_v5 = vadd.f32 1.0, %v8622_v4  ;;  %5939 = vmatprep.mubr.bf16.mxu0 %v5729_v17  ;;  %v6673_v56 = vmul.f32 -1.442695, %v10609_v63 }
 0x5a6   :  { %v8626_v33 = vpop.eup %8625  ;;  %8643 = vrcp.f32 %v5486_v18  ;;  %5940 = vmatmul.mubr.bf16.gmra.mrb[72].mxu0 %v5728_v2  ;;  %v6674_v30 = vmul.f32 -1.442695, %v10613_v6  ;;  %v5672_v29 = vmul.f32 %v8624_v9, %v10543_v52 }
 0x5a7   :  { %v8628_v13 = vpop.eup %8627  ;;  %8645 = vrcp.f32 %v5487_v5 }
 0x5a8   :  { %v8630_v55 = vpop.eup %8629  ;;  %v5674_v58 = vmul.f32 %v8628_v13, %v10550_v20  ;;  %8647 = vpow2.f32 %v6671_v50  ;;  %v5187_v37 = vpop.f32.mrb[196].mxu1  ;;  %v5673_v20 = vmul.f32 %v8626_v33, %v10546_v41 }
 0x5a9   :  { %v8632_v28 = vpop.eup %8631  ;;  %v5675_v31 = vmul.f32 %v8630_v55, %v10554_v61  ;;  %8649 = vpow2.f32 %v6672_v21  ;;  %v10622_v32 = vadd.f32 %v5187_v37, %v10489_v0  ;;  %v5189_v1 = vpop.f32.mrb[197].mxu1 }
 0x5aa   :  { %v8634_v36 = vpop.eup %8633  ;;  %v5488_v8 = vadd.f32 1.0, %v8632_v28  ;;  %8651 = vpow2.f32 %v6673_v56  ;;  %v10625_v42 = vadd.f32 %v5189_v1, %v10492_v38  ;;  %v5191_v60 = vpop.f32.mrb[198].mxu1  ;;  %v5730_v52 = vpack.c.bf16 %v5674_v58, %v5672_v29 }
 0x5ab   :  { %v8636_v10 = vpop.eup %8635  ;;  %v5489_v23 = vadd.f32 1.0, %v8634_v36  ;;  %8653 = vpow2.f32 %v6674_v30  ;;  %v10629_v61 = vadd.f32 %v5191_v60, %v10489_v0  ;;  %v5193_v48 = vpop.f32.mrb[199].mxu1  ;;  %v6675_v44 = vmul.f32 -1.442695, %v10622_v32 }
 0x5ac   :  { %v8638_v24 = vpop.eup %8637  ;;  %8655 = vrcp.f32 %v5488_v8  ;;  %v5490_v12 = vadd.f32 1.0, %v8636_v10  ;;  %v10633_v53 = vadd.f32 %v5193_v48, %v10492_v38  ;;  %v6676_v26 = vmul.f32 -1.442695, %v10625_v42 }
 0x5ad   :  { %8657 = vrcp.f32 %v5489_v23  ;;  %v5491_v11 = vadd.f32 1.0, %v8638_v24  ;;  %v5731_v45 = vpack.c.bf16 %v5675_v31, %v5673_v20  ;;  %v6677_v14 = vmul.f32 -1.442695, %v10629_v61 }
 0x5ae   :  { %v8640_v41 = vpop.eup %8639  ;;  %8659 = vrcp.f32 %v5490_v12  ;;  %v6678_v49 = vmul.f32 -1.442695, %v10633_v53 }
 0x5af   :  { %v8642_v51 = vpop.eup %8641  ;;  %8661 = vrcp.f32 %v5491_v11  ;;  %5947 = vmatprep.mubr.bf16.mxu0 %v5731_v45  ;;  %v5676_v18 = vmul.f32 %v8640_v41, %v10563_v46 }
 0x5b0   :  { %v8644_v7 = vpop.eup %8643  ;;  %8663 = vpow2.f32 %v6675_v44  ;;  %5948 = vmatmul.mubr.bf16.gmra.mrb[76].mxu0 %v5730_v52  ;;  %v5197_v35 = vpop.f32.mrb[200].mxu1  ;;  %v5677_v54 = vmul.f32 %v8642_v51, %v10566_v22 }
 0x5b1   :  { %v8646_v40 = vpop.eup %8645  ;;  %v5678_v25 = vmul.f32 %v8644_v7, %v10570_v39  ;;  %8665 = vpow2.f32 %v6676_v26  ;;  %v10640_v62 = vadd.f32 %v5197_v35, %v10489_v0  ;;  %v5199_v59 = vpop.f32.mrb[201].mxu1 }
 0x5b2   :  { %v8648_v2 = vpop.eup %8647  ;;  %v5679_v16 = vmul.f32 %v8646_v40, %v10574_v47  ;;  %8667 = vpow2.f32 %v6677_v14  ;;  %v10645_v27 = vadd.f32 %v5199_v59, %v10492_v38  ;;  %v5201_v17 = vpop.f32.mrb[202].mxu1 }
 0x5b3   :  { %v8650_v4 = vpop.eup %8649  ;;  %v5492_v50 = vadd.f32 1.0, %v8648_v2  ;;  %8669 = vpow2.f32 %v6678_v49  ;;  %v10649_v39 = vadd.f32 %v5201_v17, %v10489_v0  ;;  %v5203_v9 = vpop.f32.mrb[203].mxu1  ;;  %v6679_v13 = vmul.f32 -1.442695, %v10640_v62 }
 0x5b4   :  { %v8652_v5 = vpop.eup %8651  ;;  %v5493_v21 = vadd.f32 1.0, %v8650_v4  ;;  %v10652_v22 = vadd.f32 %v5203_v9, %v10492_v38  ;;  %v5733_v47 = vpack.c.bf16 %v5679_v16, %v5677_v54  ;;  %v5732_v30 = vpack.c.bf16 %v5678_v25, %v5676_v18 }
 0x5b5   :  { %v8654_v33 = vpop.eup %8653  ;;  %8671 = vrcp.f32 %v5492_v50  ;;  %v5494_v56 = vadd.f32 1.0, %v8652_v5  ;;  %v6680_v29 = vmul.f32 -1.442695, %v10645_v27  ;;  %v6681_v37 = vmul.f32 -1.442695, %v10649_v39 }
 0x5b6   :  { %v8656_v55 = vpop.eup %8655  ;;  %8673 = vrcp.f32 %v5493_v21  ;;  %v5495_v46 = vadd.f32 1.0, %v8654_v33  ;;  %5955 = vmatprep.mubr.bf16.mxu0 %v5733_v47  ;;  %v6682_v31 = vmul.f32 -1.442695, %v10652_v22 }
 0x5b7   :  { %v8658_v58 = vpop.eup %8657  ;;  %8675 = vrcp.f32 %v5494_v56  ;;  %v5680_v41 = vmul.f32 %v8656_v55, %v10583_v57 }
 0x5b8   :  { %v8660_v28 = vpop.eup %8659  ;;  %8677 = vrcp.f32 %v5495_v46  ;;  %5956 = vmatmul.mubr.bf16.gmra.mrb[80].mxu0 %v5732_v30  ;;  %v5207_v1 = vpop.f32.mrb[204].mxu1  ;;  %v5681_v12 = vmul.f32 %v8658_v58, %v10586_v43 }
 0x5b9   :  { %v8662_v36 = vpop.eup %8661  ;;  %8679 = vpow2.f32 %v6679_v13  ;;  %v10659_v8 = vadd.f32 %v5207_v1, %v10489_v0  ;;  %v5209_v60 = vpop.f32.mrb[205].mxu1  ;;  %v5682_v10 = vmul.f32 %v8660_v28, %v10590_v3 }
 0x5ba   :  { %v8664_v52 = vpop.eup %8663  ;;  %v5683_v20 = vmul.f32 %v8662_v36, %v10594_v15  ;;  %8681 = vpow2.f32 %v6680_v29  ;;  %v10664_v23 = vadd.f32 %v5209_v60, %v10492_v38  ;;  %v5211_v48 = vpop.f32.mrb[206].mxu1 }
 0x5bb   :  { %v8666_v24 = vpop.eup %8665  ;;  %v5496_v44 = vadd.f32 1.0, %v8664_v52  ;;  %8683 = vpow2.f32 %v6681_v37  ;;  %v10668_v11 = vadd.f32 %v5211_v48, %v10489_v0  ;;  %v5213_v26 = vpop.f32.mrb[207].mxu1  ;;  %v6683_v49 = vmul.f32 -1.442695, %v10659_v8 }
 0x5bc   :  { %v8668_v45 = vpop.eup %8667  ;;  %v5497_v3 = vadd.f32 1.0, %v8666_v24  ;;  %8685 = vpow2.f32 %v6682_v31  ;;  %v10672_v15 = vadd.f32 %v5213_v26, %v10492_v38  ;;  %v5735_v43 = vpack.c.bf16 %v5683_v20, %v5681_v12 }
 0x5bd   :  { %v8670_v14 = vpop.eup %8669  ;;  %8687 = vrcp.f32 %v5496_v44  ;;  %v5498_v51 = vadd.f32 1.0, %v8668_v45  ;;  %v6684_v35 = vmul.f32 -1.442695, %v10664_v23  ;;  %v5734_v40 = vpack.c.bf16 %v5682_v10, %v5680_v41 }
 0x5be   :  { %8689 = vrcp.f32 %v5497_v3  ;;  %v5499_v7 = vadd.f32 1.0, %v8670_v14  ;;  %v6685_v57 = vmul.f32 -1.442695, %v10668_v11  ;;  %5963 = vmatprep.mubr.bf16.mxu0 %v5735_v43  ;;  %v6686_v2 = vmul.f32 -1.442695, %v10672_v15 }
 0x5bf   :  { %v8672_v25 = vpop.eup %8671  ;;  %8691 = vrcp.f32 %v5498_v51 }
 0x5c0   :  { %v8674_v59 = vpop.eup %8673  ;;  %8693 = vrcp.f32 %v5499_v7  ;;  %5964 = vmatmul.mubr.bf16.gmra.mrb[84].mxu0 %v5734_v40  ;;  %v5217_v54 = vpop.f32.mrb[208].mxu1 }
 0x5c1   :  { %v8676_v16 = vpop.eup %8675  ;;  %8695 = vpow2.f32 %v6683_v49  ;;  %v10679_v17 = vadd.f32 %v5217_v54, %v10489_v0  ;;  %v5219_v4 = vpop.f32.mrb[209].mxu1  ;;  %v5685_v50 = vmul.f32 %v8674_v59, %v10606_v19  ;;  %v5684_v19 = vmul.f32 %v8672_v25, %v10603_v34 }
 0x5c2   :  { %v8678_v18 = vpop.eup %8677  ;;  %v5686_v9 = vmul.f32 %v8676_v16, %v10609_v63  ;;  %8697 = vpow2.f32 %v6684_v35  ;;  %v10684_v5 = vadd.f32 %v5219_v4, %v10492_v38  ;;  %v5221_v21 = vpop.f32.mrb[210].mxu1 }
 0x5c3   :  { %v8680_v47 = vpop.eup %8679  ;;  %v5687_v33 = vmul.f32 %v8678_v18, %v10613_v6  ;;  %8699 = vpow2.f32 %v6685_v57  ;;  %v6687_v56 = vmul.f32 -1.442695, %v10679_v17  ;;  %v10689_v13 = vadd.f32 %v5221_v21, %v10489_v0  ;;  %v5223_v30 = vpop.f32.mrb[211].mxu1 }
 0x5c4   :  { %v8682_v55 = vpop.eup %8681  ;;  %v5500_v46 = vadd.f32 1.0, %v8680_v47  ;;  %8701 = vpow2.f32 %v6686_v2  ;;  %v10693_v63 = vadd.f32 %v5223_v30, %v10492_v38  ;;  %v6688_v31 = vmul.f32 -1.442695, %v10684_v5 }
 0x5c5   :  { %v8684_v29 = vpop.eup %8683  ;;  %v5501_v58 = vadd.f32 1.0, %v8682_v55  ;;  %8703 = vpow2.f32 %v6687_v56  ;;  %v5737_v37 = vpack.c.bf16 %v5687_v33, %v5685_v50  ;;  %v5736_v1 = vpack.c.bf16 %v5686_v9, %v5684_v19 }
 0x5c6   :  { %v8686_v6 = vpop.eup %8685  ;;  %8705 = vrcp.f32 %v5500_v46  ;;  %v5502_v28 = vadd.f32 1.0, %v8684_v29  ;;  %v6689_v34 = vmul.f32 -1.442695, %v10689_v13  ;;  %v6690_v10 = vmul.f32 -1.442695, %v10693_v63 }
 0x5c7   :  { %v8688_v36 = vpop.eup %8687  ;;  %8707 = vrcp.f32 %v5501_v58  ;;  %v5503_v60 = vadd.f32 1.0, %v8686_v6  ;;  %5971 = vmatprep.mubr.bf16.mxu0 %v5737_v37 }
 0x5c8   :  { %v8690_v52 = vpop.eup %8689  ;;  %8709 = vrcp.f32 %v5502_v28  ;;  %5972 = vmatmul.mubr.bf16.gmra.mrb[88].mxu0 %v5736_v1  ;;  %v5227_v20 = vpop.f32.mrb[212].mxu1  ;;  %v5688_v35 = vmul.f32 %v8688_v36, %v10622_v32 }
 0x5c9   :  { %v8692_v48 = vpop.eup %8691  ;;  %8711 = vrcp.f32 %v5503_v60  ;;  %v10699_v24 = vadd.f32 %v5227_v20, %v10489_v0  ;;  %v5229_v12 = vpop.f32.mrb[213].mxu1  ;;  %v5689_v26 = vmul.f32 %v8690_v52, %v10625_v42 }
 0x5ca   :  { %v8694_v44 = vpop.eup %8693  ;;  %v5690_v45 = vmul.f32 %v8692_v48, %v10629_v61  ;;  %8713 = vpow2.f32 %v6688_v31  ;;  %v5231_v41 = vpop.f32.mrb[214].mxu1  ;;  %v10706_v49 = vadd.f32 %v5229_v12, %v10492_v38 }
 0x5cb   :  { %v8696_v3 = vpop.eup %8695  ;;  %v5691_v14 = vmul.f32 %v8694_v44, %v10633_v53  ;;  %8715 = vpow2.f32 %v6689_v34  ;;  %v6691_v51 = vmul.f32 -1.442695, %v10699_v24  ;;  %v5233_v43 = vpop.f32.mrb[215].mxu1  ;;  %v10710_v42 = vadd.f32 %v5231_v41, %v10489_v0 }
 0x5cc   :  { %v8698_v7 = vpop.eup %8697  ;;  %v5504_v40 = vadd.f32 1.0, %v8696_v3  ;;  %8717 = vpow2.f32 %v6690_v10  ;;  %v10713_v53 = vadd.f32 %v5233_v43, %v10492_v38  ;;  %v5738_v54 = vpack.c.bf16 %v5690_v45, %v5688_v35 }
 0x5cd   :  { %v8700_v61 = vpop.eup %8699  ;;  %v5505_v25 = vadd.f32 1.0, %v8698_v7  ;;  %8719 = vpow2.f32 %v6691_v51  ;;  %v5739_v57 = vpack.c.bf16 %v5691_v14, %v5689_v26  ;;  %v6692_v32 = vmul.f32 -1.442695, %v10706_v49 }
 0x5ce   :  { %v8702_v59 = vpop.eup %8701  ;;  %8721 = vrcp.f32 %v5504_v40  ;;  %v5506_v2 = vadd.f32 1.0, %v8700_v61  ;;  %v6693_v9 = vmul.f32 -1.442695, %v10710_v42  ;;  %v6694_v33 = vmul.f32 -1.442695, %v10713_v53 }
 0x5cf   :  { %v8704_v16 = vpop.eup %8703  ;;  %8723 = vrcp.f32 %v5505_v25  ;;  %v5507_v4 = vadd.f32 1.0, %v8702_v59  ;;  %5979 = vmatprep.mubr.bf16.mxu0 %v5739_v57 }
 0x5d0   :  { %v8706_v18 = vpop.eup %8705  ;;  %8725 = vrcp.f32 %v5506_v2  ;;  %v5508_v50 = vadd.f32 1.0, %v8704_v16  ;;  %5980 = vmatmul.mubr.bf16.gmra.mrb[92].mxu0 %v5738_v54  ;;  %v5237_v21 = vpop.f32.mrb[216].mxu1 }
 0x5d1   :  { %v8708_v47 = vpop.eup %8707  ;;  %8727 = vrcp.f32 %v5507_v4  ;;  %v10719_v56 = vadd.f32 %v5237_v21, %v10489_v0  ;;  %v5239_v30 = vpop.f32.mrb[217].mxu1  ;;  %v5692_v19 = vmul.f32 %v8706_v18, %v10640_v62 }
 0x5d2   :  { %v8710_v55 = vpop.eup %8709  ;;  %8729 = vrcp.f32 %v5508_v50  ;;  %v5241_v46 = vpop.f32.mrb[218].mxu1  ;;  %v10725_v6 = vadd.f32 %v5239_v30, %v10492_v38  ;;  %v5693_v1 = vmul.f32 %v8708_v47, %v10645_v27 }
 0x5d3   :  { %v8712_v29 = vpop.eup %8711  ;;  %v5694_v58 = vmul.f32 %v8710_v55, %v10649_v39  ;;  %8731 = vpow2.f32 %v6692_v32  ;;  %v6695_v37 = vmul.f32 -1.442695, %v10719_v56  ;;  %v5243_v28 = vpop.f32.mrb[219].mxu1  ;;  %v10730_v62 = vadd.f32 %v5241_v46, %v10489_v0 }
 0x5d4   :  { %v8714_v31 = vpop.eup %8713  ;;  %v5695_v36 = vmul.f32 %v8712_v29, %v10652_v22  ;;  %8733 = vpow2.f32 %v6693_v9  ;;  %v10733_v39 = vadd.f32 %v5243_v28, %v10492_v38  ;;  %v6696_v22 = vmul.f32 -1.442695, %v10725_v6 }
 0x5d5   :  { %v8716_v60 = vpop.eup %8715  ;;  %v5509_v34 = vadd.f32 1.0, %v8714_v31  ;;  %8735 = vpow2.f32 %v6694_v33  ;;  %v5740_v52 = vpack.c.bf16 %v5694_v58, %v5692_v19  ;;  %v6697_v45 = vmul.f32 -1.442695, %v10730_v62 }
 0x5d6   :  { %v8718_v10 = vpop.eup %8717  ;;  %v5510_v20 = vadd.f32 1.0, %v8716_v60  ;;  %8737 = vpow2.f32 %v6695_v37  ;;  %v5741_v48 = vpack.c.bf16 %v5695_v36, %v5693_v1  ;;  %v6698_v14 = vmul.f32 -1.442695, %v10733_v39 }
 0x5d7   :  { %v8720_v12 = vpop.eup %8719  ;;  %8739 = vrcp.f32 %v5509_v34  ;;  %v5511_v27 = vadd.f32 1.0, %v8718_v10 }
 0x5d8   :  { %v8722_v44 = vpop.eup %8721  ;;  %8741 = vrcp.f32 %v5510_v20  ;;  %v5512_v26 = vadd.f32 1.0, %v8720_v12  ;;  %5987 = vmatprep.mubr.bf16.mxu0 %v5741_v48  ;;  %v5247_v41 = vpop.f32.mrb[220].mxu1 }
 0x5d9   :  { %v8724_v3 = vpop.eup %8723  ;;  %8743 = vrcp.f32 %v5511_v27  ;;  %5988 = vmatmul.mubr.bf16.gmra.mrb[96].mxu0 %v5740_v52  ;;  %v10739_v51 = vadd.f32 %v5247_v41, %v10489_v0  ;;  %v5249_v43 = vpop.f32.mrb[221].mxu1  ;;  %v5696_v35 = vmul.f32 %v8722_v44, %v10659_v8 }
 0x5da   :  { %v8726_v7 = vpop.eup %8725  ;;  %8745 = vrcp.f32 %v5512_v26  ;;  %v10743_v40 = vadd.f32 %v5249_v43, %v10492_v38  ;;  %v5251_v61 = vpop.f32.mrb[222].mxu1  ;;  %v5697_v57 = vmul.f32 %v8724_v3, %v10664_v23 }
 0x5db   :  { %v8728_v25 = vpop.eup %8727  ;;  %v5698_v59 = vmul.f32 %v8726_v7, %v10668_v11  ;;  %8747 = vpow2.f32 %v6696_v22  ;;  %v6699_v2 = vmul.f32 -1.442695, %v10739_v51  ;;  %v5253_v54 = vpop.f32.mrb[223].mxu1  ;;  %v10751_v32 = vadd.f32 %v5251_v61, %v10489_v0 }
 0x5dc   :  { %v8730_v16 = vpop.eup %8729  ;;  %v5699_v4 = vmul.f32 %v8728_v25, %v10672_v15  ;;  %8749 = vpow2.f32 %v6697_v45  ;;  %v6700_v8 = vmul.f32 -1.442695, %v10743_v40  ;;  %v10754_v50 = vadd.f32 %v5253_v54, %v10492_v38 }
 0x5dd   :  { %v8732_v18 = vpop.eup %8731  ;;  %8751 = vpow2.f32 %v6698_v14  ;;  %v5742_v23 = vpack.c.bf16 %v5698_v59, %v5696_v35  ;;  %v6701_v55 = vmul.f32 -1.442695, %v10751_v32  ;;  %v5700_v34 = vmul.f32 %v8730_v16, %v10679_v17 }
 0x5de   :  { %v8734_v11 = vpop.eup %8733  ;;  %v5513_v9 = vadd.f32 1.0, %v8732_v18  ;;  %8753 = vpow2.f32 %v6699_v2  ;;  %v5743_v21 = vpack.c.bf16 %v5699_v4, %v5697_v57  ;;  %v6702_v58 = vmul.f32 -1.442695, %v10754_v50 }
 0x5df   :  { %v8736_v47 = vpop.eup %8735  ;;  %v5514_v33 = vadd.f32 1.0, %v8734_v11  ;;  %8755 = vpow2.f32 %v6700_v8 }
 0x5e0   :  { %v8738_v15 = vpop.eup %8737  ;;  %8757 = vrcp.f32 %v5513_v9  ;;  %v5515_v30 = vadd.f32 1.0, %v8736_v47  ;;  %5995 = vmatprep.mubr.bf16.mxu0 %v5743_v21  ;;  %v5257_v19 = vpop.f32.mrb[224].mxu1 }
 0x5e1   :  { %v8740_v46 = vpop.eup %8739  ;;  %8759 = vrcp.f32 %v5514_v33  ;;  %v5516_v29 = vadd.f32 1.0, %v8738_v15  ;;  %5996 = vmatmul.mubr.bf16.gmra.mrb[100].mxu0 %v5742_v23  ;;  %v10759_v37 = vadd.f32 %v5257_v19, %v10489_v0  ;;  %v5259_v28 = vpop.f32.mrb[225].mxu1 }
 0x5e2   :  { %v8742_v31 = vpop.eup %8741  ;;  %8761 = vrcp.f32 %v5515_v30  ;;  %v10762_v1 = vadd.f32 %v5259_v28, %v10492_v38  ;;  %v5261_v36 = vpop.f32.mrb[226].mxu1  ;;  %v5701_v12 = vmul.f32 %v8740_v46, %v10684_v5 }
 0x5e3   :  { %v8744_v60 = vpop.eup %8743  ;;  %v5702_v52 = vmul.f32 %v8742_v31, %v10689_v13  ;;  %8763 = vrcp.f32 %v5516_v29  ;;  %v6703_v10 = vmul.f32 -1.442695, %v10759_v37  ;;  %v5263_v20 = vpop.f32.mrb[227].mxu1  ;;  %v10771_v26 = vadd.f32 %v5261_v36, %v10489_v0 }
 0x5e4   :  { %v8746_v48 = vpop.eup %8745  ;;  %v5703_v27 = vmul.f32 %v8744_v60, %v10693_v63  ;;  %8765 = vpow2.f32 %v6701_v55  ;;  %v6704_v22 = vmul.f32 -1.442695, %v10762_v1  ;;  %v10774_v41 = vadd.f32 %v5263_v20, %v10492_v38 }
 0x5e5   :  { %v8748_v44 = vpop.eup %8747  ;;  %8767 = vpow2.f32 %v6702_v58  ;;  %v5744_v17 = vpack.c.bf16 %v5702_v52, %v5700_v34  ;;  %v6705_v25 = vmul.f32 -1.442695, %v10771_v26  ;;  %v5704_v21 = vmul.f32 %v8746_v48, %v10699_v24 }
 0x5e6   :  { %v8750_v45 = vpop.eup %8749  ;;  %v5517_v13 = vadd.f32 1.0, %v8748_v44  ;;  %8769 = vpow2.f32 %v6703_v10  ;;  %v5745_v3 = vpack.c.bf16 %v5703_v27, %v5701_v12  ;;  %v6706_v16 = vmul.f32 -1.442695, %v10774_v41 }
 0x5e7   :  { %v8752_v14 = vpop.eup %8751  ;;  %v5518_v5 = vadd.f32 1.0, %v8750_v45  ;;  %8771 = vpow2.f32 %v6704_v22 }
 0x5e8   :  { %v8754_v63 = vpop.eup %8753  ;;  %8773 = vrcp.f32 %v5517_v13  ;;  %v5519_v43 = vadd.f32 1.0, %v8752_v14  ;;  %6003 = vmatprep.mubr.bf16.mxu0 %v5745_v3  ;;  %v5267_v7 = vpop.f32.mrb[228].mxu1 }
 0x5e9   :  { %v8756_v35 = vpop.eup %8755  ;;  %8775 = vrcp.f32 %v5518_v5  ;;  %v5520_v61 = vadd.f32 1.0, %v8754_v63  ;;  %6004 = vmatmul.mubr.bf16.gmra.mrb[104].mxu0 %v5744_v17  ;;  %v10778_v57 = vadd.f32 %v5267_v7, %v10489_v0  ;;  %v5269_v59 = vpop.f32.mrb[229].mxu1 }
 0x5ea   :  { %v8758_v2 = vpop.eup %8757  ;;  %8777 = vrcp.f32 %v5519_v43  ;;  %v5521_v54 = vadd.f32 1.0, %v8756_v35  ;;  %v10782_v4 = vadd.f32 %v5269_v59, %v10492_v38  ;;  %v5271_v8 = vpop.f32.mrb[230].mxu1 }
 0x5eb   :  { %v8760_v18 = vpop.eup %8759  ;;  %8779 = vrcp.f32 %v5520_v61  ;;  %v6707_v23 = vmul.f32 -1.442695, %v10778_v57  ;;  %v5273_v11 = vpop.f32.mrb[231].mxu1  ;;  %v5705_v30 = vmul.f32 %v8758_v2, %v10706_v49  ;;  %v10791_v19 = vadd.f32 %v5271_v8, %v10489_v0 }
 0x5ec   :  { %v8762_v9 = vpop.eup %8761  ;;  %v5706_v47 = vmul.f32 %v8760_v18, %v10710_v42  ;;  %8781 = vrcp.f32 %v5521_v54  ;;  %v6708_v33 = vmul.f32 -1.442695, %v10782_v4  ;;  %v10794_v29 = vadd.f32 %v5273_v11, %v10492_v38 }
 0x5ed   :  { %v8764_v15 = vpop.eup %8763  ;;  %v5707_v55 = vmul.f32 %v8762_v9, %v10713_v53  ;;  %8783 = vpow2.f32 %v6705_v25  ;;  %v6709_v53 = vmul.f32 -1.442695, %v10791_v19 }
 0x5ee   :  { %v8766_v46 = vpop.eup %8765  ;;  %8785 = vpow2.f32 %v6706_v16  ;;  %v5746_v24 = vpack.c.bf16 %v5706_v47, %v5704_v21  ;;  %v6710_v60 = vmul.f32 -1.442695, %v10794_v29  ;;  %v5708_v52 = vmul.f32 %v8764_v15, %v10719_v56 }
 0x5ef   :  { %v8768_v58 = vpop.eup %8767  ;;  %v5522_v42 = vadd.f32 1.0, %v8766_v46  ;;  %8787 = vpow2.f32 %v6707_v23  ;;  %v5747_v28 = vpack.c.bf16 %v5707_v55, %v5705_v30 }
 0x5f0   :  { %v8770_v31 = vpop.eup %8769  ;;  %v5523_v36 = vadd.f32 1.0, %v8768_v58  ;;  %8789 = vpow2.f32 %v6708_v33 }
 0x5f1   :  { %v8772_v49 = vpop.eup %8771  ;;  %8791 = vrcp.f32 %v5522_v42  ;;  %6011 = vmatprep.mubr.bf16.mxu0 %v5747_v28  ;;  %v5524_v20 = vadd.f32 1.0, %v8770_v31  ;;  %v10817_v28 = vld [vmem:[%s10874_s8] ss:$0 sm:$0xff]  ;;  %s8970_s8 = smov [#allocation11]  }
 0x5f2   :  { %v8774_v0 = vpop.eup %8773  ;;  %8793 = vrcp.f32 %v5523_v36  ;;  %6012 = vmatmul.mubr.bf16.gmra.mrb[108].mxu0 %v5746_v24  ;;  %v5525_v22 = vadd.f32 1.0, %v8772_v49  ;;  %s6089_s26 = sshll.u32 %s8970_s8, 4  ;;  %s6090_s26 = int_to_ptr.vmem [resolvable:$true] %s6089_s26 }
 0x5f3   :  { %v8776_v38 = vpop.eup %8775  ;;  %v5709_v12 = vmul.f32 %v8774_v0, %v10725_v6  ;;  %8795 = vpow2.f32 %v6709_v53  ;;  %s8926_s17 = scalar_lea.vmem %s6090_s26, 4096  ;;  %p8931_p13 = scmp.lt.s32.totalorder %s6090_s26, %s6090_s26 }
 0x5f4   :  { %v8778_v34 = vpop.eup %8777  ;;  %v5710_v10 = vmul.f32 %v8776_v38, %v10730_v62  ;;  %8797 = vpow2.f32 %v6710_v60  ;;  %p8927_p12 = scmp.ne.s32.totalorder %s6090_s26, %s8926_s17  ;;  %p8932_p0 = scmp.lt.s32.totalorder %s8926_s17, %s8926_s17 }
 0x5f5   :  { %v8780_v48 = vpop.eup %8779  ;;  %v5711_v27 = vmul.f32 %v8778_v34, %v10733_v39  ;;  %8799 = vrcp.f32 %v5524_v20 }
 0x5f6   :  { %v8782_v44 = vpop.eup %8781  ;;  %v5748_v17 = vpack.c.bf16 %v5710_v10, %v5708_v52  ;;  %8801 = vrcp.f32 %v5525_v22  ;;  %v5712_v63 = vmul.f32 %v8780_v48, %v10739_v51  ;;  %p8933_p1 = por %p8932_p0, %p8931_p13 }
 0x5f7   :  { %v8784_v45 = vpop.eup %8783  ;;  %v5749_v13 = vpack.c.bf16 %v5711_v27, %v5709_v12  ;;  %v5713_v35 = vmul.f32 %v8782_v44, %v10743_v40 }
 0x5f8   :  { %v8786_v3 = vpop.eup %8785  ;;  %v5526_v14 = vadd.f32 1.0, %v8784_v45  ;;  %p8934_p2 = pnand %p8933_p1, %p8927_p12 }
 0x5f9   :  { %v8788_v5 = vpop.eup %8787  ;;  %v5527_v56 = vadd.f32 1.0, %v8786_v3  ;;  %6019 = vmatprep.mubr.bf16.mxu0 %v5749_v13 }
 0x5fa   :  { %v8790_v62 = vpop.eup %8789  ;;  %8803 = vrcp.f32 %v5526_v14  ;;  %6020 = vmatmul.mubr.bf16.gmra.mrb[112].mxu0 %v5748_v17  ;;  %v5528_v7 = vadd.f32 1.0, %v8788_v5 }
 0x5fb   :  { %v8792_v6 = vpop.eup %8791  ;;  %8805 = vrcp.f32 %v5527_v56  ;;  %v5529_v25 = vadd.f32 1.0, %v8790_v62 }
 0x5fc   :  { %v8794_v39 = vpop.eup %8793  ;;  %v5714_v43 = vmul.f32 %v8792_v6, %v10751_v32  ;;  %8807 = vrcp.f32 %v5528_v7 }
 0x5fd   :  { %v5715_v61 = vmul.f32 %v8794_v39, %v10754_v50  ;;  %v8796_v2 = vpop.eup %8795  ;;  %8809 = vrcp.f32 %v5529_v25 }
 0x5fe   :  { %v5750_v59 = vpack.c.bf16 %v5714_v43, %v5712_v63  ;;  %v8798_v16 = vpop.eup %8797  ;;  %v5530_v8 = vadd.f32 1.0, %v8796_v2 }
 0x5ff   :  { %v5751_v54 = vpack.c.bf16 %v5715_v61, %v5713_v35  ;;  %v5531_v18 = vadd.f32 1.0, %v8798_v16  ;;  %v8800_v23 = vpop.eup %8799 }
 0x600   :  { %8811 = vrcp.f32 %v5530_v8  ;;  %v8802_v51 = vpop.eup %8801  ;;  %v5716_v40 = vmul.f32 %v8800_v23, %v10759_v37 }
 0x601   :  { %6027 = vmatprep.mubr.bf16.mxu0 %v5751_v54  ;;  %8813 = vrcp.f32 %v5531_v18  ;;  %v5717_v9 = vmul.f32 %v8802_v51, %v10762_v1 }
 0x602   :  { %6028 = vmatmul.mubr.bf16.gmra.mrb[116].mxu0 %v5750_v59 }
 0x604   :  { %v8804_v32 = vpop.eup %8803 }
 0x605   :  { %v8806_v11 = vpop.eup %8805  ;;  %v5718_v50 = vmul.f32 %v8804_v32, %v10771_v26 }
 0x606   :  { %v5719_v21 = vmul.f32 %v8806_v11, %v10774_v41  ;;  %v8808_v15 = vpop.eup %8807 }
 0x607   :  { %v5752_v47 = vpack.c.bf16 %v5718_v50, %v5716_v40  ;;  %v8810_v30 = vpop.eup %8809  ;;  %v5720_v24 = vmul.f32 %v8808_v15, %v10778_v57 }
 0x608   :  { %v5753_v33 = vpack.c.bf16 %v5719_v21, %v5717_v9  ;;  %v5721_v37 = vmul.f32 %v8810_v30, %v10782_v4 }
 0x60a   :  { %6035 = vmatprep.mubr.bf16.mxu0 %v5753_v33  ;;  %v8812_v55 = vpop.eup %8811 }
 0x60b   :  { %6036 = vmatmul.mubr.bf16.gmra.mrb[120].mxu0 %v5752_v47  ;;  %v8814_v46 = vpop.eup %8813  ;;  %v5722_v58 = vmul.f32 %v8812_v55, %v10791_v19 }
 0x60c   :  { %v5723_v26 = vmul.f32 %v8814_v46, %v10794_v29 }
 0x60d   :  { %v5754_v42 = vpack.c.bf16 %v5722_v58, %v5720_v24 }
 0x60e   :  { %v5755_v1 = vpack.c.bf16 %v5723_v26, %v5721_v37 }
 0x610   :  { %6043 = vmatprep.mubr.bf16.mxu0 %v5755_v1 }
 0x613   :  { %6044 = vmatmul.mubr.bf16.gmra.mrb[124].mxu0 %v5754_v42 }
 0x668   :  { %v6744_v41 = vpop.f32.mrb[64].mxu0 }
 0x669   :  { %v6745_v31 = vpop.f32.mrb[65].mxu0 }
 0x66a   :  { %v6746_v36 = vadd.f32 %v6745_v31, %v6744_v41  ;;  %v6747_v49 = vpop.f32.mrb[66].mxu0 }
 0x66b   :  { %v6748_v57 = vpop.f32.mrb[67].mxu0 }
 0x66c   :  { %v5926_v19 = vadd.f32 %v6746_v36, %v10817_v28  ;;  %v6749_v53 = vadd.f32 %v6748_v57, %v6747_v49 }
 0x66e   :  { %6052 = vst [vmem:[#allocation11] sm:$0xff] %v5926_v19  ;;  %v5929_v4 = vadd.f32 %v6749_v53, %v10817_v28 }
 0x670   :  { %6053 = vst [vmem:[#allocation11 + $0x8] sm:$0xff] %v5929_v4  ;;  %v6750_v29 = vpop.f32.mrb[68].mxu0 }
 0x671   :  { %v6751_v0 = vpop.f32.mrb[69].mxu0 }
 0x672   :  { %v6752_v60 = vadd.f32 %v6751_v0, %v6750_v29  ;;  %v6753_v38 = vpop.f32.mrb[70].mxu0 }
 0x673   :  { %v6754_v34 = vpop.f32.mrb[71].mxu0 }
 0x674   :  { %v5934_v52 = vadd.f32 %v6752_v60, %v10817_v28  ;;  %v6755_v10 = vadd.f32 %v6754_v34, %v6753_v38 }
 0x676   :  { %6054 = vst [vmem:[#allocation11 + $0x10] sm:$0xff] %v5934_v52  ;;  %v5937_v20 = vadd.f32 %v6755_v10, %v10817_v28 }
 0x678   :  { %6055 = vst [vmem:[#allocation11 + $0x18] sm:$0xff] %v5937_v20 }
 0x679   :  { %v6756_v48 = vpop.f32.mrb[72].mxu0 }
 0x67a   :  { %v6757_v12 = vpop.f32.mrb[73].mxu0 }
 0x67b   :  { %v6758_v27 = vadd.f32 %v6757_v12, %v6756_v48  ;;  %v6759_v22 = vpop.f32.mrb[74].mxu0 }
 0x67c   :  { %v6760_v44 = vpop.f32.mrb[75].mxu0 }
 0x67d   :  { %v5942_v17 = vadd.f32 %v6758_v27, %v10817_v28  ;;  %v6761_v45 = vadd.f32 %v6760_v44, %v6759_v22 }
 0x67f   :  { %6056 = vst [vmem:[#allocation11 + $0x20] sm:$0xff] %v5942_v17  ;;  %v5945_v13 = vadd.f32 %v6761_v45, %v10817_v28 }
 0x681   :  { %6057 = vst [vmem:[#allocation11 + $0x28] sm:$0xff] %v5945_v13 }
 0x683   :  { %v6762_v3 = vpop.f32.mrb[76].mxu0 }
 0x684   :  { %v6763_v14 = vpop.f32.mrb[77].mxu0 }
 0x685   :  { %v6764_v5 = vadd.f32 %v6763_v14, %v6762_v3  ;;  %v6765_v56 = vpop.f32.mrb[78].mxu0 }
 0x686   :  { %v6766_v62 = vpop.f32.mrb[79].mxu0 }
 0x687   :  { %v5950_v6 = vadd.f32 %v6764_v5, %v10817_v28  ;;  %v6767_v39 = vadd.f32 %v6766_v62, %v6765_v56 }
 0x689   :  { %6058 = vst [vmem:[#allocation11 + $0x30] sm:$0xff] %v5950_v6  ;;  %v5953_v63 = vadd.f32 %v6767_v39, %v10817_v28 }
 0x68b   :  { %6059 = vst [vmem:[#allocation11 + $0x38] sm:$0xff] %v5953_v63  ;;  %v6768_v43 = vpop.f32.mrb[80].mxu0 }
 0x68c   :  { %v6769_v7 = vpop.f32.mrb[81].mxu0 }
 0x68d   :  { %v6770_v35 = vadd.f32 %v6769_v7, %v6768_v43  ;;  %v6771_v61 = vpop.f32.mrb[82].mxu0 }
 0x68e   :  { %v6772_v25 = vpop.f32.mrb[83].mxu0 }
 0x68f   :  { %v5958_v59 = vadd.f32 %v6770_v35, %v10817_v28  ;;  %v6773_v2 = vadd.f32 %v6772_v25, %v6771_v61 }
 0x691   :  { %6060 = vst [vmem:[#allocation11 + $0x40] sm:$0xff] %v5958_v59  ;;  %v5961_v54 = vadd.f32 %v6773_v2, %v10817_v28 }
 0x693   :  { %6061 = vst [vmem:[#allocation11 + $0x48] sm:$0xff] %v5961_v54  ;;  %v6774_v16 = vpop.f32.mrb[84].mxu0 }
 0x694   :  { %v6775_v8 = vpop.f32.mrb[85].mxu0 }
 0x695   :  { %v6776_v18 = vadd.f32 %v6775_v8, %v6774_v16  ;;  %v6777_v23 = vpop.f32.mrb[86].mxu0 }
 0x696   :  { %v6778_v51 = vpop.f32.mrb[87].mxu0 }
 0x697   :  { %v5966_v32 = vadd.f32 %v6776_v18, %v10817_v28  ;;  %v6779_v11 = vadd.f32 %v6778_v51, %v6777_v23 }
 0x699   :  { %6062 = vst [vmem:[#allocation11 + $0x50] sm:$0xff] %v5966_v32  ;;  %v5969_v40 = vadd.f32 %v6779_v11, %v10817_v28 }
 0x69b   :  { %6063 = vst [vmem:[#allocation11 + $0x58] sm:$0xff] %v5969_v40  ;;  %v6780_v50 = vpop.f32.mrb[88].mxu0 }
 0x69c   :  { %v6781_v9 = vpop.f32.mrb[89].mxu0 }
 0x69d   :  { %v6782_v21 = vadd.f32 %v6781_v9, %v6780_v50  ;;  %v6783_v47 = vpop.f32.mrb[90].mxu0 }
 0x69e   :  { %v6784_v33 = vpop.f32.mrb[91].mxu0 }
 0x69f   :  { %v5974_v15 = vadd.f32 %v6782_v21, %v10817_v28  ;;  %v6785_v30 = vadd.f32 %v6784_v33, %v6783_v47 }
 0x6a1   :  { %6064 = vst [vmem:[#allocation11 + $0x60] sm:$0xff] %v5974_v15  ;;  %v5977_v55 = vadd.f32 %v6785_v30, %v10817_v28 }
 0x6a3   :  { %6065 = vst [vmem:[#allocation11 + $0x68] sm:$0xff] %v5977_v55  ;;  %v6786_v46 = vpop.f32.mrb[92].mxu0 }
 0x6a4   :  { %v6787_v24 = vpop.f32.mrb[93].mxu0 }
 0x6a5   :  { %v6788_v58 = vadd.f32 %v6787_v24, %v6786_v46  ;;  %v6789_v37 = vpop.f32.mrb[94].mxu0 }
 0x6a6   :  { %v6790_v26 = vpop.f32.mrb[95].mxu0 }
 0x6a7   :  { %v5982_v42 = vadd.f32 %v6788_v58, %v10817_v28  ;;  %v6791_v1 = vadd.f32 %v6790_v26, %v6789_v37 }
 0x6a9   :  { %6066 = vst [vmem:[#allocation11 + $0x70] sm:$0xff] %v5982_v42  ;;  %v5985_v41 = vadd.f32 %v6791_v1, %v10817_v28 }
 0x6ab   :  { %6067 = vst [vmem:[#allocation11 + $0x78] sm:$0xff] %v5985_v41 }
 0x6ac   :  { %v6792_v31 = vpop.f32.mrb[96].mxu0 }
 0x6ad   :  { %v6793_v36 = vpop.f32.mrb[97].mxu0 }
 0x6ae   :  { %v6794_v49 = vadd.f32 %v6793_v36, %v6792_v31  ;;  %v6795_v57 = vpop.f32.mrb[98].mxu0 }
 0x6af   :  { %v6796_v19 = vpop.f32.mrb[99].mxu0 }
 0x6b0   :  { %v5990_v53 = vadd.f32 %v6794_v49, %v10817_v28  ;;  %v6797_v4 = vadd.f32 %v6796_v19, %v6795_v57 }
 0x6b2   :  { %6068 = vst [vmem:[#allocation11 + $0x80] sm:$0xff] %v5990_v53  ;;  %v5993_v29 = vadd.f32 %v6797_v4, %v10817_v28 }
 0x6b4   :  { %6069 = vst [vmem:[#allocation11 + $0x88] sm:$0xff] %v5993_v29  ;;  %v6798_v0 = vpop.f32.mrb[100].mxu0 }
 0x6b5   :  { %v6799_v60 = vpop.f32.mrb[101].mxu0 }
 0x6b6   :  { %v6800_v38 = vadd.f32 %v6799_v60, %v6798_v0  ;;  %v6801_v34 = vpop.f32.mrb[102].mxu0 }
 0x6b7   :  { %v6802_v52 = vpop.f32.mrb[103].mxu0 }
 0x6b8   :  { %v5998_v10 = vadd.f32 %v6800_v38, %v10817_v28  ;;  %v6803_v20 = vadd.f32 %v6802_v52, %v6801_v34 }
 0x6ba   :  { %6070 = vst [vmem:[#allocation11 + $0x90] sm:$0xff] %v5998_v10  ;;  %v6001_v48 = vadd.f32 %v6803_v20, %v10817_v28 }
 0x6bc   :  { %6071 = vst [vmem:[#allocation11 + $0x98] sm:$0xff] %v6001_v48  ;;  %v6804_v12 = vpop.f32.mrb[104].mxu0 }
 0x6bd   :  { %v6805_v27 = vpop.f32.mrb[105].mxu0 }
 0x6be   :  { %v6806_v22 = vadd.f32 %v6805_v27, %v6804_v12  ;;  %v6807_v44 = vpop.f32.mrb[106].mxu0 }
 0x6bf   :  { %v6808_v17 = vpop.f32.mrb[107].mxu0 }
 0x6c0   :  { %v6006_v45 = vadd.f32 %v6806_v22, %v10817_v28  ;;  %v6809_v13 = vadd.f32 %v6808_v17, %v6807_v44 }
 0x6c2   :  { %6072 = vst [vmem:[#allocation11 + $0xa0] sm:$0xff] %v6006_v45  ;;  %v6009_v3 = vadd.f32 %v6809_v13, %v10817_v28 }
 0x6c4   :  { %6073 = vst [vmem:[#allocation11 + $0xa8] sm:$0xff] %v6009_v3 }
 0x6c5   :  { %v6810_v14 = vpop.f32.mrb[108].mxu0 }
 0x6c6   :  { %v6811_v5 = vpop.f32.mrb[109].mxu0 }
 0x6c7   :  { %v6812_v56 = vadd.f32 %v6811_v5, %v6810_v14  ;;  %v6813_v62 = vpop.f32.mrb[110].mxu0 }
 0x6c8   :  { %v6814_v6 = vpop.f32.mrb[111].mxu0 }
 0x6c9   :  { %v6014_v39 = vadd.f32 %v6812_v56, %v10817_v28  ;;  %v6815_v63 = vadd.f32 %v6814_v6, %v6813_v62 }
 0x6cb   :  { %6074 = vst [vmem:[#allocation11 + $0xb0] sm:$0xff] %v6014_v39  ;;  %v6017_v43 = vadd.f32 %v6815_v63, %v10817_v28 }
 0x6cd   :  { %6075 = vst [vmem:[#allocation11 + $0xb8] sm:$0xff] %v6017_v43  ;;  %v6816_v7 = vpop.f32.mrb[112].mxu0 }
 0x6ce   :  { %v6817_v35 = vpop.f32.mrb[113].mxu0 }
 0x6cf   :  { %v6818_v61 = vadd.f32 %v6817_v35, %v6816_v7  ;;  %v6819_v25 = vpop.f32.mrb[114].mxu0 }
 0x6d0   :  { %v6820_v59 = vpop.f32.mrb[115].mxu0 }
 0x6d1   :  { %v6022_v2 = vadd.f32 %v6818_v61, %v10817_v28  ;;  %v6821_v54 = vadd.f32 %v6820_v59, %v6819_v25 }
 0x6d3   :  { %6076 = vst [vmem:[#allocation11 + $0xc0] sm:$0xff] %v6022_v2  ;;  %v6025_v16 = vadd.f32 %v6821_v54, %v10817_v28 }
 0x6d5   :  { %6077 = vst [vmem:[#allocation11 + $0xc8] sm:$0xff] %v6025_v16  ;;  %v6822_v8 = vpop.f32.mrb[116].mxu0 }
 0x6d6   :  { %v6823_v18 = vpop.f32.mrb[117].mxu0 }
 0x6d7   :  { %v6824_v23 = vadd.f32 %v6823_v18, %v6822_v8  ;;  %v6825_v51 = vpop.f32.mrb[118].mxu0 }
 0x6d8   :  { %v6826_v32 = vpop.f32.mrb[119].mxu0 }
 0x6d9   :  { %v6030_v11 = vadd.f32 %v6824_v23, %v10817_v28  ;;  %v6827_v40 = vadd.f32 %v6826_v32, %v6825_v51 }
 0x6db   :  { %6078 = vst [vmem:[#allocation11 + $0xd0] sm:$0xff] %v6030_v11  ;;  %v6033_v50 = vadd.f32 %v6827_v40, %v10817_v28 }
 0x6dd   :  { %6079 = vst [vmem:[#allocation11 + $0xd8] sm:$0xff] %v6033_v50 }
 0x6de   :  { %v6828_v9 = vpop.f32.mrb[120].mxu0 }
 0x6df   :  { %v6829_v21 = vpop.f32.mrb[121].mxu0 }
 0x6e0   :  { %v6830_v47 = vadd.f32 %v6829_v21, %v6828_v9  ;;  %v6831_v33 = vpop.f32.mrb[122].mxu0 }
 0x6e1   :  { %v6832_v15 = vpop.f32.mrb[123].mxu0 }
 0x6e2   :  { %v6038_v30 = vadd.f32 %v6830_v47, %v10817_v28  ;;  %v6833_v55 = vadd.f32 %v6832_v15, %v6831_v33 }
 0x6e4   :  { %6080 = vst [vmem:[#allocation11 + $0xe0] sm:$0xff] %v6038_v30  ;;  %v6041_v46 = vadd.f32 %v6833_v55, %v10817_v28 }
 0x6e6   :  { %6081 = vst [vmem:[#allocation11 + $0xe8] sm:$0xff] %v6041_v46  ;;  %v6834_v24 = vpop.f32.mrb[124].mxu0 }
 0x6e7   :  { %v6835_v58 = vpop.f32.mrb[125].mxu0 }
 0x6e8   :  { %v6836_v37 = vadd.f32 %v6835_v58, %v6834_v24  ;;  %v6837_v26 = vpop.f32.mrb[126].mxu0 }
 0x6e9   :  { %v6838_v42 = vpop.f32.mrb[127].mxu0 }
 0x6ea   :  { %v6046_v1 = vadd.f32 %v6836_v37, %v10817_v28  ;;  %v6839_v41 = vadd.f32 %v6838_v42, %v6837_v26 }
 0x6ec   :  { %6082 = vst [vmem:[#allocation11 + $0xf0] sm:$0xff] %v6046_v1  ;;  %v6049_v31 = vadd.f32 %v6839_v41, %v10817_v28 }
 0x6ee   :  { %6083 = vst [vmem:[#allocation11 + $0xf8] sm:$0xff] %v6049_v31 }
 0x6ef   :  { %8937 = shalt.err (!%p8934_p2)
}
 0x6f0   :  { %s8938_s22 = scalar_lea.hbm %s10875_s9, 4096 }
 0x6f1   :  { %p8939_p3 = scmp.ne.s32.totalorder %s10875_s9, %s8938_s22  ;;  %p8942_p4 = scmp.lt.u32.totalorder %s8938_s22, %s10875_s9 }
 0x6f3   :  { %p8944_p5 = pnand %p8942_p4, %p8939_p3 }
 0x6f5   :  { %8947 = shalt.err (!%p8944_p5)
}
 0x6f6   :  { %6095 = dma.vmem_to_hbm [thread:$0]  %s6090_s26, 4096, %s10875_s9, [#allocation4], %s8957_s19, %s8957_s19, %s8958_s20  }
 0x6f7   :  { %8954 = dma.done.wait [#allocation4], 4096  }
 0x6f8   :  { %8955 = vsyncadd [#allocation4], 4294963200 }
 0x6f9   :  { %6099 = vsyncpa [#allocation3], 1 }
 0x6fa   :  { %6100 = vsyncpa [#allocation6], 1 }
 0x6fb   :  { %6101 = vsyncpa [#allocation9], 1 }
 0x6fc   :  { %6102 = vsyncpa [#allocation4], 1 }

</bundles_post_ra>
